<compile_context>
chip_gen: v7x
topology: tpu7x:2x2x1
jax: 0.10.0
libtpu: 0.0.40
codegen_flags: <defaults>
</compile_context>

<pallas_src>
import jax
import jax.numpy as jnp
from jax import lax
from jax.experimental import pallas as pl
from jax.experimental.pallas import tpu as pltpu

# ----- hyper-parameters (small, consistent with the module's __init__) -----
BATCH = 2
SEQ = 16                   # LSTM sequence length
INPUT_SIZE_LSTM = 8
HIDDEN_SIZE_LSTM = 16
NUM_LAYERS_LSTM = 1
NUM_FILTERS = 8            # conv1d out channels == transformer "sequence" length
KERNEL_SIZE_CONV = 3
PADDING_CONV = 1
KERNEL_SIZE_POOL = 2
L_CONV = SEQ + 2 * PADDING_CONV - KERNEL_SIZE_CONV + 1      # 16
TRAN_FEATURE = L_CONV // KERNEL_SIZE_POOL                   # 8  (= d_model)
NUM_HEADS = 2
DIM_FF = 2048              # nn.TransformerEncoderLayer default dim_feedforward
NUM_LAYERS_TRAN = 1
LN_EPS = 1e-5


def _vmem_spec():
    return pl.BlockSpec(memory_space=pltpu.MemorySpace.VMEM)


# ---------------------------------------------------------------------------
# Single fused forward kernel.
# x_ref: (T, B, 2*In) time-major, lanes = [x(t) | x(T-1-t)]  (fwd / bwd input).
# ---------------------------------------------------------------------------
def _fused_forward_kernel(x_ref, wih_ref, whh_ref, blstm_ref,
                          wconv_ref, bconv_ref, mask_ref,
                          wqkv_ref, bqkv_ref, wo_ref, bo_ref,
                          w1_ref, b1_ref, w2_ref, b2_ref,
                          g1_ref, be1_ref, g2_ref, be2_ref,
                          wd_ref, bd_ref, wfcblk_ref, bfc_ref,
                          out_ref):
    B, T, H = BATCH, SEQ, HIDDEN_SIZE_LSTM
    H2 = 2 * H
    S = NUM_FILTERS
    E = TRAN_FEATURE
    NH = NUM_HEADS
    HD = E // NH
    LP = TRAN_FEATURE

    # ---------------- BiLSTM: both directions fused via block-diagonal weights.
    # gates layout (8H = 128 lanes): [i | f | g | o] blocks, each = [fwd(H) | bwd(H)]
    # h / c layout (2H = 32 lanes):  [fwd(H) | bwd(H)]
    wih = wih_ref[...]
    whh = whh_ref[...]
    b_lstm = blstm_ref[...]
    h = jnp.zeros((B, H2), jnp.float32)
    c = jnp.zeros((B, H2), jnp.float32)
    hs = []
    for t in range(T):                                   # fully unrolled (T = 16)
        gates = (jnp.dot(x_ref[t], wih, preferred_element_type=jnp.float32)
                 + jnp.dot(h, whh, preferred_element_type=jnp.float32)
                 + b_lstm)                               # (B, 8H)
        sg = jax.nn.sigmoid(gates)                       # full-tile EUP pass
        i_g = sg[:, 0 * H2:1 * H2]
        f_g = sg[:, 1 * H2:2 * H2]
        o_g = sg[:, 3 * H2:4 * H2]
        g_g = jnp.tanh(gates[:, 2 * H2:3 * H2])
        c = f_g * c + i_g * g_g
        h = o_g * jnp.tanh(c)
        hs.append(h)

    # Re-assemble the (time-major, zero-padded) BiLSTM output.  At unrolled step
    # t the bwd half corresponds to original time T-1-t.
    zero_row = jnp.zeros((B, H2), jnp.float32)
    rows = [zero_row]                                    # conv padding (left)
    for t in range(T):
        rows.append(jnp.concatenate([hs[t][:, :H], hs[T - 1 - t][:, H:]], axis=-1))
    rows.append(zero_row)                                # conv padding (right)
    xpad = jnp.stack(rows, axis=0)                       # (T+2, B, 2H)

    # ---------------- Conv1d (im2col, taps folded into one matmul) + ReLU + MaxPool1d(2)
    imcol3 = jnp.concatenate([xpad[0:T], xpad[1:T + 1], xpad[2:T + 2]],
                             axis=-1)                    # (T, B, K*2H) = (16, B, 96)
    wconv = wconv_ref[...]                               # (K*2H, S)
    bconv = bconv_ref[...]                               # (1, S)
    x_tok = []
    for bb in range(B):
        conv_b = jnp.dot(imcol3[:, bb, :], wconv,
                         preferred_element_type=jnp.float32) + bconv     # (T, S)
        conv_b = jnp.maximum(conv_b, 0.0)                                # ReLU
        pooled_rows = [jnp.max(conv_b[2 * p:2 * p + 2, :], axis=0, keepdims=True)
                       for p in range(LP)]
        pooled_b = jnp.concatenate(pooled_rows, axis=0)                  # (Lp, S)
        x_tok.append(pooled_b.T)                                         # (S, E): token s = channel s
    x2 = jnp.concatenate(x_tok, axis=0)                                  # (B*S, E)

    # ---------------- TransformerEncoderLayer (post-norm, ReLU FFN, causal mask)
    def layer_norm(v, g, beta):
        mu = jnp.mean(v, axis=-1, keepdims=True)
        var = jnp.mean((v - mu) ** 2, axis=-1, keepdims=True)
        return (v - mu) * lax.rsqrt(var + LN_EPS) * g + beta

    qkv = jnp.dot(x2, wqkv_ref[...], preferred_element_type=jnp.float32) + bqkv_ref[...]  # (B*S, 3E)
    qh, kh, vh = [], [], []
    for bb in range(B):
        rsel = slice(bb * S, (bb + 1) * S)
        for hh in range(NH):
            qh.append(qkv[rsel, hh * HD:(hh + 1) * HD])
            kh.append(qkv[rsel, E + hh * HD:E + (hh + 1) * HD])
            vh.append(qkv[rsel, 2 * E + hh * HD:2 * E + (hh + 1) * HD])
    qh = jnp.stack(qh, axis=0)                            # (B*NH, S, HD)
    kh = jnp.stack(kh, axis=0)
    vh = jnp.stack(vh, axis=0)
    scale = 1.0 / (HD ** 0.5)
    scores = jnp.einsum('gqd,gkd->gqk', qh, kh,
                        preferred_element_type=jnp.float32) * scale
    scores = scores + mask_ref[...]                       # broadcast (S,S) over groups
    scores = scores - jnp.max(scores, axis=-1, keepdims=True)
    p = jnp.exp(scores)
    p = p * pl.reciprocal(jnp.sum(p, axis=-1, keepdims=True), approx=True)
    ctx = jnp.einsum('gqk,gkd->gqd', p, vh,
                     preferred_element_type=jnp.float32)  # (B*NH, S, HD)
    attn = jnp.concatenate(
        [jnp.concatenate([ctx[bb * NH + hh] for hh in range(NH)], axis=-1)
         for bb in range(B)], axis=0)                     # (B*S, E)
    attn = jnp.dot(attn, wo_ref[...], preferred_element_type=jnp.float32) + bo_ref[...]

    h1 = layer_norm(x2 + attn, g1_ref[...], be1_ref[...])
    ff = jnp.maximum(jnp.dot(h1, w1_ref[...], preferred_element_type=jnp.float32)
                     + b1_ref[...], 0.0)                  # (B*S, DIM_FF)
    ff = jnp.dot(ff, w2_ref[...], preferred_element_type=jnp.float32) + b2_ref[...]
    y2 = layer_norm(h1 + ff, g2_ref[...], be2_ref[...])   # (B*S, E)

    # ---------------- decoder Linear(E,1) -> flatten -> fc Linear(S,1) -> sigmoid
    d = jnp.dot(y2, wd_ref[...], preferred_element_type=jnp.float32) + bd_ref[...]        # (B*S, 1)
    logits = jnp.dot(wfcblk_ref[...], d, preferred_element_type=jnp.float32) + bfc_ref[...]  # (B, 1)
    out_ref[...] = jax.nn.sigmoid(logits)


# ---------------------------------------------------------------------------
# parameters & forward
# ---------------------------------------------------------------------------
def causal_mask(sz):
    idx = jnp.arange(sz)
    allowed = idx[None, :] <= idx[:, None]
    return jnp.where(allowed, 0.0, -jnp.inf).astype(jnp.float32)


def init_params(key):
    def u(k, shape, scale=0.1):
        return jax.random.uniform(k, shape, jnp.float32, -scale, scale)

    keys = iter(jax.random.split(key, 64))
    H, In = HIDDEN_SIZE_LSTM, INPUT_SIZE_LSTM
    params = {}

    # ---- BiLSTM (1 layer): per-direction weights, packed into block-diagonal
    # matrices so one recurrence computes both directions.
    def direction():
        return (u(next(keys), (In, 4 * H)),          # W_ih^T  (gate order i,f,g,o)
                u(next(keys), (H, 4 * H)),           # W_hh^T
                u(next(keys), (4 * H,)))             # b_ih + b_hh combined
    wih_f, whh_f, b_f = direction()
    wih_b, whh_b, b_b = direction()
    wih = jnp.zeros((2 * In, 8 * H), jnp.float32)
    whh = jnp.zeros((2 * H, 8 * H), jnp.float32)
    b = jnp.zeros((8 * H,), jnp.float32)
    for g in range(4):
        cf = slice(2 * H * g, 2 * H * g + H)         # fwd slot of gate g
        cb = slice(2 * H * g + H, 2 * H * (g + 1))   # bwd slot of gate g
        sg = slice(H * g, H * (g + 1))               # gate g in per-direction layout
        wih = wih.at[:In, cf].set(wih_f[:, sg]).at[In:, cb].set(wih_b[:, sg])
        whh = whh.at[:H, cf].set(whh_f[:, sg]).at[H:, cb].set(whh_b[:, sg])
        b = b.at[cf].set(b_f[sg]).at[cb].set(b_b[sg])
    params["wih"], params["whh"], params["blstm"] = wih, whh, b.reshape(1, -1)

    # ---- Conv1d stored in im2col layout (K*Cin, Cout); bias (1, Cout).
    params["wconv"] = u(next(keys), (KERNEL_SIZE_CONV * 2 * H, NUM_FILTERS))
    params["bconv"] = u(next(keys), (1, NUM_FILTERS))

    # ---- TransformerEncoderLayer (1 layer).
    E = TRAN_FEATURE
    params["mask"] = causal_mask(NUM_FILTERS)
    params["wqkv"] = u(next(keys), (E, 3 * E)); params["bqkv"] = u(next(keys), (1, 3 * E))
    params["wo"] = u(next(keys), (E, E));       params["bo"] = u(next(keys), (1, E))
    params["w1"] = u(next(keys), (E, DIM_FF));  params["b1"] = u(next(keys), (1, DIM_FF))
    params["w2"] = u(next(keys), (DIM_FF, E));  params["b2"] = u(next(keys), (1, E))
    params["g1"] = jnp.ones((1, E), jnp.float32);  params["be1"] = jnp.zeros((1, E), jnp.float32)
    params["g2"] = jnp.ones((1, E), jnp.float32);  params["be2"] = jnp.zeros((1, E), jnp.float32)

    # ---- head: decoder (init_weights: uniform +-0.1, bias zero) and fc.
    params["wd"] = u(next(keys), (E, 1))
    params["bd"] = jnp.zeros((1, 1), jnp.float32)
    fc_w = u(next(keys), (NUM_FILTERS, 1))
    # block-diagonal fc weight so the per-batch Linear(S,1) is one matmul in-kernel
    params["wfc_blk"] = jnp.kron(jnp.eye(BATCH, dtype=jnp.float32), fc_w.T)   # (B, B*S)
    params["bfc"] = u(next(keys), (1, 1))
    return params


@jax.jit
def forward(x, params):
    # input staging (tiny, one-time): time-major with fwd and time-reversed
    # inputs concatenated along channels -> (T, B, 2*In)
    x_cat = jnp.concatenate([x, x[:, ::-1, :]], axis=-1)
    x_cat = jnp.transpose(x_cat, (1, 0, 2))
    out = pl.pallas_call(
        _fused_forward_kernel,
        out_shape=jax.ShapeDtypeStruct((BATCH, 1), jnp.float32),
        in_specs=[_vmem_spec()] * 23,
        out_specs=_vmem_spec(),
    )(x_cat,
      params["wih"], params["whh"], params["blstm"],
      params["wconv"], params["bconv"], params["mask"],
      params["wqkv"], params["bqkv"], params["wo"], params["bo"],
      params["w1"], params["b1"], params["w2"], params["b2"],
      params["g1"], params["be1"], params["g2"], params["be2"],
      params["wd"], params["bd"], params["wfc_blk"], params["bfc"])
    return out[:, 0]                                      # squeeze(1) -> (B,)


if __name__ == "__main__":
    key = jax.random.PRNGKey(0)
    pkey, xkey = jax.random.split(key)
    params = init_params(pkey)
    x = jax.random.normal(xkey, (BATCH, SEQ, INPUT_SIZE_LSTM), jnp.float32)
    out = forward(x, params)
    jax.block_until_ready(out)
    assert out.shape == (BATCH,)
    assert bool(jnp.all(jnp.isfinite(out)))
    assert bool(jnp.all((out > 0.0) & (out < 1.0)))       # sigmoid output range
    print("KERNEL_OK")
</pallas_src>

<mosaic_0001>
module attributes {stable_mosaic.version = 11 : i64} {
  func.func @_fused_forward_kernel(%arg0: memref<16x2x16xf32, #tpu.memory_space<vmem>>, %arg1: memref<16x128xf32, #tpu.memory_space<vmem>>, %arg2: memref<32x128xf32, #tpu.memory_space<vmem>>, %arg3: memref<1x128xf32, #tpu.memory_space<vmem>>, %arg4: memref<96x8xf32, #tpu.memory_space<vmem>>, %arg5: memref<1x8xf32, #tpu.memory_space<vmem>>, %arg6: memref<8x8xf32, #tpu.memory_space<vmem>>, %arg7: memref<8x24xf32, #tpu.memory_space<vmem>>, %arg8: memref<1x24xf32, #tpu.memory_space<vmem>>, %arg9: memref<8x8xf32, #tpu.memory_space<vmem>>, %arg10: memref<1x8xf32, #tpu.memory_space<vmem>>, %arg11: memref<8x2048xf32, #tpu.memory_space<vmem>>, %arg12: memref<1x2048xf32, #tpu.memory_space<vmem>>, %arg13: memref<2048x8xf32, #tpu.memory_space<vmem>>, %arg14: memref<1x8xf32, #tpu.memory_space<vmem>>, %arg15: memref<1x8xf32, #tpu.memory_space<vmem>>, %arg16: memref<1x8xf32, #tpu.memory_space<vmem>>, %arg17: memref<1x8xf32, #tpu.memory_space<vmem>>, %arg18: memref<1x8xf32, #tpu.memory_space<vmem>>, %arg19: memref<8x1xf32, #tpu.memory_space<vmem>>, %arg20: memref<1x1xf32, #tpu.memory_space<vmem>>, %arg21: memref<2x16xf32, #tpu.memory_space<vmem>>, %arg22: memref<1x1xf32, #tpu.memory_space<vmem>>, %arg23: memref<2x1xf32, #tpu.memory_space<vmem>>) attributes {dimension_semantics = [], scalar_prefetch = 0 : i64, scratch_operands = 0 : i64, tpu.core_type = #tpu.core_type<tc>} {
    %c0 = arith.constant 0 : index
    %c0_0 = arith.constant 0 : index
    %0 = vector.load %arg1[%c0, %c0_0] : memref<16x128xf32, #tpu.memory_space<vmem>>, vector<16x128xf32>
    %c0_1 = arith.constant 0 : index
    %c0_2 = arith.constant 0 : index
    %1 = vector.load %arg2[%c0_1, %c0_2] : memref<32x128xf32, #tpu.memory_space<vmem>>, vector<32x128xf32>
    %c0_3 = arith.constant 0 : index
    %c0_4 = arith.constant 0 : index
    %2 = vector.load %arg3[%c0_3, %c0_4] : memref<1x128xf32, #tpu.memory_space<vmem>>, vector<1x128xf32>
    %cst = arith.constant 0.000000e+00 : f32
    %3 = vector.broadcast %cst : f32 to vector<2x32xf32>
    %cst_5 = arith.constant 0.000000e+00 : f32
    %4 = vector.broadcast %cst_5 : f32 to vector<2x32xf32>
    %c0_6 = arith.constant 0 : index
    %c0_7 = arith.constant 0 : index
    %c0_8 = arith.constant 0 : index
    %5 = vector.load %arg0[%c0_6, %c0_7, %c0_8] : memref<16x2x16xf32, #tpu.memory_space<vmem>>, vector<1x2x16xf32>
    %6 = vector.shape_cast %5 : vector<1x2x16xf32> to vector<2x16xf32>
    %cst_9 = arith.constant dense<0.000000e+00> : vector<2x128xf32>
    %7 = tpu.matmul %6, %0, %cst_9 {dimension_numbers = #tpu.dot_dimension_numbers<[1], [0], [0], [1], [0, 0, 1, 1], [], []>} : vector<2x16xf32>, vector<16x128xf32>, vector<2x128xf32> -> vector<2x128xf32>
    %cst_10 = arith.constant dense<0.000000e+00> : vector<2x128xf32>
    %8 = tpu.matmul %3, %1, %cst_10 {dimension_numbers = #tpu.dot_dimension_numbers<[1], [0], [0], [1], [0, 0, 1, 1], [], []>} : vector<2x32xf32>, vector<32x128xf32>, vector<2x128xf32> -> vector<2x128xf32>
    %9 = arith.addf %7, %8 : vector<2x128xf32>
    %10 = vector.broadcast %2 : vector<1x128xf32> to vector<2x128xf32>
    %11 = arith.addf %9, %10 : vector<2x128xf32>
    %12 = arith.negf %11 : vector<2x128xf32>
    %13 = math.exp %12 : vector<2x128xf32>
    %cst_11 = arith.constant 1.000000e+00 : f32
    %14 = vector.broadcast %cst_11 : f32 to vector<2x128xf32>
    %15 = arith.addf %14, %13 : vector<2x128xf32>
    %16 = arith.divf %14, %15 : vector<2x128xf32>
    %17 = vector.extract_strided_slice %16 {offsets = [0, 0], sizes = [2, 32], strides = [1, 1]} : vector<2x128xf32> to vector<2x32xf32>
    %18 = vector.extract_strided_slice %16 {offsets = [0, 32], sizes = [2, 32], strides = [1, 1]} : vector<2x128xf32> to vector<2x32xf32>
    %19 = vector.extract_strided_slice %16 {offsets = [0, 96], sizes = [2, 32], strides = [1, 1]} : vector<2x128xf32> to vector<2x32xf32>
    %20 = vector.extract_strided_slice %11 {offsets = [0, 64], sizes = [2, 32], strides = [1, 1]} : vector<2x128xf32> to vector<2x32xf32>
    %21 = math.tanh %20 : vector<2x32xf32>
    %22 = arith.mulf %18, %4 : vector<2x32xf32>
    %23 = arith.mulf %17, %21 : vector<2x32xf32>
    %24 = arith.addf %22, %23 : vector<2x32xf32>
    %25 = math.tanh %24 : vector<2x32xf32>
    %26 = arith.mulf %19, %25 : vector<2x32xf32>
    %c1 = arith.constant 1 : index
    %c0_12 = arith.constant 0 : index
    %c0_13 = arith.constant 0 : index
    %27 = vector.load %arg0[%c1, %c0_12, %c0_13] : memref<16x2x16xf32, #tpu.memory_space<vmem>>, vector<1x2x16xf32>
    %28 = vector.shape_cast %27 : vector<1x2x16xf32> to vector<2x16xf32>
    %cst_14 = arith.constant dense<0.000000e+00> : vector<2x128xf32>
    %29 = tpu.matmul %28, %0, %cst_14 {dimension_numbers = #tpu.dot_dimension_numbers<[1], [0], [0], [1], [0, 0, 1, 1], [], []>} : vector<2x16xf32>, vector<16x128xf32>, vector<2x128xf32> -> vector<2x128xf32>
    %cst_15 = arith.constant dense<0.000000e+00> : vector<2x128xf32>
    %30 = tpu.matmul %26, %1, %cst_15 {dimension_numbers = #tpu.dot_dimension_numbers<[1], [0], [0], [1], [0, 0, 1, 1], [], []>} : vector<2x32xf32>, vector<32x128xf32>, vector<2x128xf32> -> vector<2x128xf32>
    %31 = arith.addf %29, %30 : vector<2x128xf32>
    %32 = vector.broadcast %2 : vector<1x128xf32> to vector<2x128xf32>
    %33 = arith.addf %31, %32 : vector<2x128xf32>
    %34 = arith.negf %33 : vector<2x128xf32>
    %35 = math.exp %34 : vector<2x128xf32>
    %cst_16 = arith.constant 1.000000e+00 : f32
    %36 = vector.broadcast %cst_16 : f32 to vector<2x128xf32>
    %37 = arith.addf %36, %35 : vector<2x128xf32>
    %38 = arith.divf %36, %37 : vector<2x128xf32>
    %39 = vector.extract_strided_slice %38 {offsets = [0, 0], sizes = [2, 32], strides = [1, 1]} : vector<2x128xf32> to vector<2x32xf32>
    %40 = vector.extract_strided_slice %38 {offsets = [0, 32], sizes = [2, 32], strides = [1, 1]} : vector<2x128xf32> to vector<2x32xf32>
    %41 = vector.extract_strided_slice %38 {offsets = [0, 96], sizes = [2, 32], strides = [1, 1]} : vector<2x128xf32> to vector<2x32xf32>
    %42 = vector.extract_strided_slice %33 {offsets = [0, 64], sizes = [2, 32], strides = [1, 1]} : vector<2x128xf32> to vector<2x32xf32>
    %43 = math.tanh %42 : vector<2x32xf32>
    %44 = arith.mulf %40, %24 : vector<2x32xf32>
    %45 = arith.mulf %39, %43 : vector<2x32xf32>
    %46 = arith.addf %44, %45 : vector<2x32xf32>
    %47 = math.tanh %46 : vector<2x32xf32>
    %48 = arith.mulf %41, %47 : vector<2x32xf32>
    %c2 = arith.constant 2 : index
    %c0_17 = arith.constant 0 : index
    %c0_18 = arith.constant 0 : index
    %49 = vector.load %arg0[%c2, %c0_17, %c0_18] : memref<16x2x16xf32, #tpu.memory_space<vmem>>, vector<1x2x16xf32>
    %50 = vector.shape_cast %49 : vector<1x2x16xf32> to vector<2x16xf32>
    %cst_19 = arith.constant dense<0.000000e+00> : vector<2x128xf32>
    %51 = tpu.matmul %50, %0, %cst_19 {dimension_numbers = #tpu.dot_dimension_numbers<[1], [0], [0], [1], [0, 0, 1, 1], [], []>} : vector<2x16xf32>, vector<16x128xf32>, vector<2x128xf32> -> vector<2x128xf32>
    %cst_20 = arith.constant dense<0.000000e+00> : vector<2x128xf32>
    %52 = tpu.matmul %48, %1, %cst_20 {dimension_numbers = #tpu.dot_dimension_numbers<[1], [0], [0], [1], [0, 0, 1, 1], [], []>} : vector<2x32xf32>, vector<32x128xf32>, vector<2x128xf32> -> vector<2x128xf32>
    %53 = arith.addf %51, %52 : vector<2x128xf32>
    %54 = vector.broadcast %2 : vector<1x128xf32> to vector<2x128xf32>
    %55 = arith.addf %53, %54 : vector<2x128xf32>
    %56 = arith.negf %55 : vector<2x128xf32>
    %57 = math.exp %56 : vector<2x128xf32>
    %cst_21 = arith.constant 1.000000e+00 : f32
    %58 = vector.broadcast %cst_21 : f32 to vector<2x128xf32>
    %59 = arith.addf %58, %57 : vector<2x128xf32>
    %60 = arith.divf %58, %59 : vector<2x128xf32>
    %61 = vector.extract_strided_slice %60 {offsets = [0, 0], sizes = [2, 32], strides = [1, 1]} : vector<2x128xf32> to vector<2x32xf32>
    %62 = vector.extract_strided_slice %60 {offsets = [0, 32], sizes = [2, 32], strides = [1, 1]} : vector<2x128xf32> to vector<2x32xf32>
    %63 = vector.extract_strided_slice %60 {offsets = [0, 96], sizes = [2, 32], strides = [1, 1]} : vector<2x128xf32> to vector<2x32xf32>
    %64 = vector.extract_strided_slice %55 {offsets = [0, 64], sizes = [2, 32], strides = [1, 1]} : vector<2x128xf32> to vector<2x32xf32>
    %65 = math.tanh %64 : vector<2x32xf32>
    %66 = arith.mulf %62, %46 : vector<2x32xf32>
    %67 = arith.mulf %61, %65 : vector<2x32xf32>
    %68 = arith.addf %66, %67 : vector<2x32xf32>
    %69 = math.tanh %68 : vector<2x32xf32>
    %70 = arith.mulf %63, %69 : vector<2x32xf32>
    %c3 = arith.constant 3 : index
    %c0_22 = arith.constant 0 : index
    %c0_23 = arith.constant 0 : index
    %71 = vector.load %arg0[%c3, %c0_22, %c0_23] : memref<16x2x16xf32, #tpu.memory_space<vmem>>, vector<1x2x16xf32>
    %72 = vector.shape_cast %71 : vector<1x2x16xf32> to vector<2x16xf32>
    %cst_24 = arith.constant dense<0.000000e+00> : vector<2x128xf32>
    %73 = tpu.matmul %72, %0, %cst_24 {dimension_numbers = #tpu.dot_dimension_numbers<[1], [0], [0], [1], [0, 0, 1, 1], [], []>} : vector<2x16xf32>, vector<16x128xf32>, vector<2x128xf32> -> vector<2x128xf32>
    %cst_25 = arith.constant dense<0.000000e+00> : vector<2x128xf32>
    %74 = tpu.matmul %70, %1, %cst_25 {dimension_numbers = #tpu.dot_dimension_numbers<[1], [0], [0], [1], [0, 0, 1, 1], [], []>} : vector<2x32xf32>, vector<32x128xf32>, vector<2x128xf32> -> vector<2x128xf32>
    %75 = arith.addf %73, %74 : vector<2x128xf32>
    %76 = vector.broadcast %2 : vector<1x128xf32> to vector<2x128xf32>
    %77 = arith.addf %75, %76 : vector<2x128xf32>
    %78 = arith.negf %77 : vector<2x128xf32>
    %79 = math.exp %78 : vector<2x128xf32>
    %cst_26 = arith.constant 1.000000e+00 : f32
    %80 = vector.broadcast %cst_26 : f32 to vector<2x128xf32>
    %81 = arith.addf %80, %79 : vector<2x128xf32>
    %82 = arith.divf %80, %81 : vector<2x128xf32>
    %83 = vector.extract_strided_slice %82 {offsets = [0, 0], sizes = [2, 32], strides = [1, 1]} : vector<2x128xf32> to vector<2x32xf32>
    %84 = vector.extract_strided_slice %82 {offsets = [0, 32], sizes = [2, 32], strides = [1, 1]} : vector<2x128xf32> to vector<2x32xf32>
    %85 = vector.extract_strided_slice %82 {offsets = [0, 96], sizes = [2, 32], strides = [1, 1]} : vector<2x128xf32> to vector<2x32xf32>
    %86 = vector.extract_strided_slice %77 {offsets = [0, 64], sizes = [2, 32], strides = [1, 1]} : vector<2x128xf32> to vector<2x32xf32>
    %87 = math.tanh %86 : vector<2x32xf32>
    %88 = arith.mulf %84, %68 : vector<2x32xf32>
    %89 = arith.mulf %83, %87 : vector<2x32xf32>
    %90 = arith.addf %88, %89 : vector<2x32xf32>
    %91 = math.tanh %90 : vector<2x32xf32>
    %92 = arith.mulf %85, %91 : vector<2x32xf32>
    %c4 = arith.constant 4 : index
    %c0_27 = arith.constant 0 : index
    %c0_28 = arith.constant 0 : index
    %93 = vector.load %arg0[%c4, %c0_27, %c0_28] : memref<16x2x16xf32, #tpu.memory_space<vmem>>, vector<1x2x16xf32>
    %94 = vector.shape_cast %93 : vector<1x2x16xf32> to vector<2x16xf32>
    %cst_29 = arith.constant dense<0.000000e+00> : vector<2x128xf32>
    %95 = tpu.matmul %94, %0, %cst_29 {dimension_numbers = #tpu.dot_dimension_numbers<[1], [0], [0], [1], [0, 0, 1, 1], [], []>} : vector<2x16xf32>, vector<16x128xf32>, vector<2x128xf32> -> vector<2x128xf32>
    %cst_30 = arith.constant dense<0.000000e+00> : vector<2x128xf32>
    %96 = tpu.matmul %92, %1, %cst_30 {dimension_numbers = #tpu.dot_dimension_numbers<[1], [0], [0], [1], [0, 0, 1, 1], [], []>} : vector<2x32xf32>, vector<32x128xf32>, vector<2x128xf32> -> vector<2x128xf32>
    %97 = arith.addf %95, %96 : vector<2x128xf32>
    %98 = vector.broadcast %2 : vector<1x128xf32> to vector<2x128xf32>
    %99 = arith.addf %97, %98 : vector<2x128xf32>
    %100 = arith.negf %99 : vector<2x128xf32>
    %101 = math.exp %100 : vector<2x128xf32>
    %cst_31 = arith.constant 1.000000e+00 : f32
    %102 = vector.broadcast %cst_31 : f32 to vector<2x128xf32>
    %103 = arith.addf %102, %101 : vector<2x128xf32>
    %104 = arith.divf %102, %103 : vector<2x128xf32>
    %105 = vector.extract_strided_slice %104 {offsets = [0, 0], sizes = [2, 32], strides = [1, 1]} : vector<2x128xf32> to vector<2x32xf32>
    %106 = vector.extract_strided_slice %104 {offsets = [0, 32], sizes = [2, 32], strides = [1, 1]} : vector<2x128xf32> to vector<2x32xf32>
    %107 = vector.extract_strided_slice %104 {offsets = [0, 96], sizes = [2, 32], strides = [1, 1]} : vector<2x128xf32> to vector<2x32xf32>
    %108 = vector.extract_strided_slice %99 {offsets = [0, 64], sizes = [2, 32], strides = [1, 1]} : vector<2x128xf32> to vector<2x32xf32>
    %109 = math.tanh %108 : vector<2x32xf32>
    %110 = arith.mulf %106, %90 : vector<2x32xf32>
    %111 = arith.mulf %105, %109 : vector<2x32xf32>
    %112 = arith.addf %110, %111 : vector<2x32xf32>
    %113 = math.tanh %112 : vector<2x32xf32>
    %114 = arith.mulf %107, %113 : vector<2x32xf32>
    %c5 = arith.constant 5 : index
    %c0_32 = arith.constant 0 : index
    %c0_33 = arith.constant 0 : index
    %115 = vector.load %arg0[%c5, %c0_32, %c0_33] : memref<16x2x16xf32, #tpu.memory_space<vmem>>, vector<1x2x16xf32>
    %116 = vector.shape_cast %115 : vector<1x2x16xf32> to vector<2x16xf32>
    %cst_34 = arith.constant dense<0.000000e+00> : vector<2x128xf32>
    %117 = tpu.matmul %116, %0, %cst_34 {dimension_numbers = #tpu.dot_dimension_numbers<[1], [0], [0], [1], [0, 0, 1, 1], [], []>} : vector<2x16xf32>, vector<16x128xf32>, vector<2x128xf32> -> vector<2x128xf32>
    %cst_35 = arith.constant dense<0.000000e+00> : vector<2x128xf32>
    %118 = tpu.matmul %114, %1, %cst_35 {dimension_numbers = #tpu.dot_dimension_numbers<[1], [0], [0], [1], [0, 0, 1, 1], [], []>} : vector<2x32xf32>, vector<32x128xf32>, vector<2x128xf32> -> vector<2x128xf32>
    %119 = arith.addf %117, %118 : vector<2x128xf32>
    %120 = vector.broadcast %2 : vector<1x128xf32> to vector<2x128xf32>
    %121 = arith.addf %119, %120 : vector<2x128xf32>
    %122 = arith.negf %121 : vector<2x128xf32>
    %123 = math.exp %122 : vector<2x128xf32>
    %cst_36 = arith.constant 1.000000e+00 : f32
    %124 = vector.broadcast %cst_36 : f32 to vector<2x128xf32>
    %125 = arith.addf %124, %123 : vector<2x128xf32>
    %126 = arith.divf %124, %125 : vector<2x128xf32>
    %127 = vector.extract_strided_slice %126 {offsets = [0, 0], sizes = [2, 32], strides = [1, 1]} : vector<2x128xf32> to vector<2x32xf32>
    %128 = vector.extract_strided_slice %126 {offsets = [0, 32], sizes = [2, 32], strides = [1, 1]} : vector<2x128xf32> to vector<2x32xf32>
    %129 = vector.extract_strided_slice %126 {offsets = [0, 96], sizes = [2, 32], strides = [1, 1]} : vector<2x128xf32> to vector<2x32xf32>
    %130 = vector.extract_strided_slice %121 {offsets = [0, 64], sizes = [2, 32], strides = [1, 1]} : vector<2x128xf32> to vector<2x32xf32>
    %131 = math.tanh %130 : vector<2x32xf32>
    %132 = arith.mulf %128, %112 : vector<2x32xf32>
    %133 = arith.mulf %127, %131 : vector<2x32xf32>
    %134 = arith.addf %132, %133 : vector<2x32xf32>
    %135 = math.tanh %134 : vector<2x32xf32>
    %136 = arith.mulf %129, %135 : vector<2x32xf32>
    %c6 = arith.constant 6 : index
    %c0_37 = arith.constant 0 : index
    %c0_38 = arith.constant 0 : index
    %137 = vector.load %arg0[%c6, %c0_37, %c0_38] : memref<16x2x16xf32, #tpu.memory_space<vmem>>, vector<1x2x16xf32>
    %138 = vector.shape_cast %137 : vector<1x2x16xf32> to vector<2x16xf32>
    %cst_39 = arith.constant dense<0.000000e+00> : vector<2x128xf32>
    %139 = tpu.matmul %138, %0, %cst_39 {dimension_numbers = #tpu.dot_dimension_numbers<[1], [0], [0], [1], [0, 0, 1, 1], [], []>} : vector<2x16xf32>, vector<16x128xf32>, vector<2x128xf32> -> vector<2x128xf32>
    %cst_40 = arith.constant dense<0.000000e+00> : vector<2x128xf32>
    %140 = tpu.matmul %136, %1, %cst_40 {dimension_numbers = #tpu.dot_dimension_numbers<[1], [0], [0], [1], [0, 0, 1, 1], [], []>} : vector<2x32xf32>, vector<32x128xf32>, vector<2x128xf32> -> vector<2x128xf32>
    %141 = arith.addf %139, %140 : vector<2x128xf32>
    %142 = vector.broadcast %2 : vector<1x128xf32> to vector<2x128xf32>
    %143 = arith.addf %141, %142 : vector<2x128xf32>
    %144 = arith.negf %143 : vector<2x128xf32>
    %145 = math.exp %144 : vector<2x128xf32>
    %cst_41 = arith.constant 1.000000e+00 : f32
    %146 = vector.broadcast %cst_41 : f32 to vector<2x128xf32>
    %147 = arith.addf %146, %145 : vector<2x128xf32>
    %148 = arith.divf %146, %147 : vector<2x128xf32>
    %149 = vector.extract_strided_slice %148 {offsets = [0, 0], sizes = [2, 32], strides = [1, 1]} : vector<2x128xf32> to vector<2x32xf32>
    %150 = vector.extract_strided_slice %148 {offsets = [0, 32], sizes = [2, 32], strides = [1, 1]} : vector<2x128xf32> to vector<2x32xf32>
    %151 = vector.extract_strided_slice %148 {offsets = [0, 96], sizes = [2, 32], strides = [1, 1]} : vector<2x128xf32> to vector<2x32xf32>
    %152 = vector.extract_strided_slice %143 {offsets = [0, 64], sizes = [2, 32], strides = [1, 1]} : vector<2x128xf32> to vector<2x32xf32>
    %153 = math.tanh %152 : vector<2x32xf32>
    %154 = arith.mulf %150, %134 : vector<2x32xf32>
    %155 = arith.mulf %149, %153 : vector<2x32xf32>
    %156 = arith.addf %154, %155 : vector<2x32xf32>
    %157 = math.tanh %156 : vector<2x32xf32>
    %158 = arith.mulf %151, %157 : vector<2x32xf32>
    %c7 = arith.constant 7 : index
    %c0_42 = arith.constant 0 : index
    %c0_43 = arith.constant 0 : index
    %159 = vector.load %arg0[%c7, %c0_42, %c0_43] : memref<16x2x16xf32, #tpu.memory_space<vmem>>, vector<1x2x16xf32>
    %160 = vector.shape_cast %159 : vector<1x2x16xf32> to vector<2x16xf32>
    %cst_44 = arith.constant dense<0.000000e+00> : vector<2x128xf32>
    %161 = tpu.matmul %160, %0, %cst_44 {dimension_numbers = #tpu.dot_dimension_numbers<[1], [0], [0], [1], [0, 0, 1, 1], [], []>} : vector<2x16xf32>, vector<16x128xf32>, vector<2x128xf32> -> vector<2x128xf32>
    %cst_45 = arith.constant dense<0.000000e+00> : vector<2x128xf32>
    %162 = tpu.matmul %158, %1, %cst_45 {dimension_numbers = #tpu.dot_dimension_numbers<[1], [0], [0], [1], [0, 0, 1, 1], [], []>} : vector<2x32xf32>, vector<32x128xf32>, vector<2x128xf32> -> vector<2x128xf32>
    %163 = arith.addf %161, %162 : vector<2x128xf32>
    %164 = vector.broadcast %2 : vector<1x128xf32> to vector<2x128xf32>
    %165 = arith.addf %163, %164 : vector<2x128xf32>
    %166 = arith.negf %165 : vector<2x128xf32>
    %167 = math.exp %166 : vector<2x128xf32>
    %cst_46 = arith.constant 1.000000e+00 : f32
    %168 = vector.broadcast %cst_46 : f32 to vector<2x128xf32>
    %169 = arith.addf %168, %167 : vector<2x128xf32>
    %170 = arith.divf %168, %169 : vector<2x128xf32>
    %171 = vector.extract_strided_slice %170 {offsets = [0, 0], sizes = [2, 32], strides = [1, 1]} : vector<2x128xf32> to vector<2x32xf32>
    %172 = vector.extract_strided_slice %170 {offsets = [0, 32], sizes = [2, 32], strides = [1, 1]} : vector<2x128xf32> to vector<2x32xf32>
    %173 = vector.extract_strided_slice %170 {offsets = [0, 96], sizes = [2, 32], strides = [1, 1]} : vector<2x128xf32> to vector<2x32xf32>
    %174 = vector.extract_strided_slice %165 {offsets = [0, 64], sizes = [2, 32], strides = [1, 1]} : vector<2x128xf32> to vector<2x32xf32>
    %175 = math.tanh %174 : vector<2x32xf32>
    %176 = arith.mulf %172, %156 : vector<2x32xf32>
    %177 = arith.mulf %171, %175 : vector<2x32xf32>
    %178 = arith.addf %176, %177 : vector<2x32xf32>
    %179 = math.tanh %178 : vector<2x32xf32>
    %180 = arith.mulf %173, %179 : vector<2x32xf32>
    %c8 = arith.constant 8 : index
    %c0_47 = arith.constant 0 : index
    %c0_48 = arith.constant 0 : index
    %181 = vector.load %arg0[%c8, %c0_47, %c0_48] : memref<16x2x16xf32, #tpu.memory_space<vmem>>, vector<1x2x16xf32>
    %182 = vector.shape_cast %181 : vector<1x2x16xf32> to vector<2x16xf32>
    %cst_49 = arith.constant dense<0.000000e+00> : vector<2x128xf32>
    %183 = tpu.matmul %182, %0, %cst_49 {dimension_numbers = #tpu.dot_dimension_numbers<[1], [0], [0], [1], [0, 0, 1, 1], [], []>} : vector<2x16xf32>, vector<16x128xf32>, vector<2x128xf32> -> vector<2x128xf32>
    %cst_50 = arith.constant dense<0.000000e+00> : vector<2x128xf32>
    %184 = tpu.matmul %180, %1, %cst_50 {dimension_numbers = #tpu.dot_dimension_numbers<[1], [0], [0], [1], [0, 0, 1, 1], [], []>} : vector<2x32xf32>, vector<32x128xf32>, vector<2x128xf32> -> vector<2x128xf32>
    %185 = arith.addf %183, %184 : vector<2x128xf32>
    %186 = vector.broadcast %2 : vector<1x128xf32> to vector<2x128xf32>
    %187 = arith.addf %185, %186 : vector<2x128xf32>
    %188 = arith.negf %187 : vector<2x128xf32>
    %189 = math.exp %188 : vector<2x128xf32>
    %cst_51 = arith.constant 1.000000e+00 : f32
    %190 = vector.broadcast %cst_51 : f32 to vector<2x128xf32>
    %191 = arith.addf %190, %189 : vector<2x128xf32>
    %192 = arith.divf %190, %191 : vector<2x128xf32>
    %193 = vector.extract_strided_slice %192 {offsets = [0, 0], sizes = [2, 32], strides = [1, 1]} : vector<2x128xf32> to vector<2x32xf32>
    %194 = vector.extract_strided_slice %192 {offsets = [0, 32], sizes = [2, 32], strides = [1, 1]} : vector<2x128xf32> to vector<2x32xf32>
    %195 = vector.extract_strided_slice %192 {offsets = [0, 96], sizes = [2, 32], strides = [1, 1]} : vector<2x128xf32> to vector<2x32xf32>
    %196 = vector.extract_strided_slice %187 {offsets = [0, 64], sizes = [2, 32], strides = [1, 1]} : vector<2x128xf32> to vector<2x32xf32>
    %197 = math.tanh %196 : vector<2x32xf32>
    %198 = arith.mulf %194, %178 : vector<2x32xf32>
    %199 = arith.mulf %193, %197 : vector<2x32xf32>
    %200 = arith.addf %198, %199 : vector<2x32xf32>
    %201 = math.tanh %200 : vector<2x32xf32>
    %202 = arith.mulf %195, %201 : vector<2x32xf32>
    %c9 = arith.constant 9 : index
    %c0_52 = arith.constant 0 : index
    %c0_53 = arith.constant 0 : index
    %203 = vector.load %arg0[%c9, %c0_52, %c0_53] : memref<16x2x16xf32, #tpu.memory_space<vmem>>, vector<1x2x16xf32>
    %204 = vector.shape_cast %203 : vector<1x2x16xf32> to vector<2x16xf32>
    %cst_54 = arith.constant dense<0.000000e+00> : vector<2x128xf32>
    %205 = tpu.matmul %204, %0, %cst_54 {dimension_numbers = #tpu.dot_dimension_numbers<[1], [0], [0], [1], [0, 0, 1, 1], [], []>} : vector<2x16xf32>, vector<16x128xf32>, vector<2x128xf32> -> vector<2x128xf32>
    %cst_55 = arith.constant dense<0.000000e+00> : vector<2x128xf32>
    %206 = tpu.matmul %202, %1, %cst_55 {dimension_numbers = #tpu.dot_dimension_numbers<[1], [0], [0], [1], [0, 0, 1, 1], [], []>} : vector<2x32xf32>, vector<32x128xf32>, vector<2x128xf32> -> vector<2x128xf32>
    %207 = arith.addf %205, %206 : vector<2x128xf32>
    %208 = vector.broadcast %2 : vector<1x128xf32> to vector<2x128xf32>
    %209 = arith.addf %207, %208 : vector<2x128xf32>
    %210 = arith.negf %209 : vector<2x128xf32>
    %211 = math.exp %210 : vector<2x128xf32>
    %cst_56 = arith.constant 1.000000e+00 : f32
    %212 = vector.broadcast %cst_56 : f32 to vector<2x128xf32>
    %213 = arith.addf %212, %211 : vector<2x128xf32>
    %214 = arith.divf %212, %213 : vector<2x128xf32>
    %215 = vector.extract_strided_slice %214 {offsets = [0, 0], sizes = [2, 32], strides = [1, 1]} : vector<2x128xf32> to vector<2x32xf32>
    %216 = vector.extract_strided_slice %214 {offsets = [0, 32], sizes = [2, 32], strides = [1, 1]} : vector<2x128xf32> to vector<2x32xf32>
    %217 = vector.extract_strided_slice %214 {offsets = [0, 96], sizes = [2, 32], strides = [1, 1]} : vector<2x128xf32> to vector<2x32xf32>
    %218 = vector.extract_strided_slice %209 {offsets = [0, 64], sizes = [2, 32], strides = [1, 1]} : vector<2x128xf32> to vector<2x32xf32>
    %219 = math.tanh %218 : vector<2x32xf32>
    %220 = arith.mulf %216, %200 : vector<2x32xf32>
    %221 = arith.mulf %215, %219 : vector<2x32xf32>
    %222 = arith.addf %220, %221 : vector<2x32xf32>
    %223 = math.tanh %222 : vector<2x32xf32>
    %224 = arith.mulf %217, %223 : vector<2x32xf32>
    %c10 = arith.constant 10 : index
    %c0_57 = arith.constant 0 : index
    %c0_58 = arith.constant 0 : index
    %225 = vector.load %arg0[%c10, %c0_57, %c0_58] : memref<16x2x16xf32, #tpu.memory_space<vmem>>, vector<1x2x16xf32>
    %226 = vector.shape_cast %225 : vector<1x2x16xf32> to vector<2x16xf32>
    %cst_59 = arith.constant dense<0.000000e+00> : vector<2x128xf32>
    %227 = tpu.matmul %226, %0, %cst_59 {dimension_numbers = #tpu.dot_dimension_numbers<[1], [0], [0], [1], [0, 0, 1, 1], [], []>} : vector<2x16xf32>, vector<16x128xf32>, vector<2x128xf32> -> vector<2x128xf32>
    %cst_60 = arith.constant dense<0.000000e+00> : vector<2x128xf32>
    %228 = tpu.matmul %224, %1, %cst_60 {dimension_numbers = #tpu.dot_dimension_numbers<[1], [0], [0], [1], [0, 0, 1, 1], [], []>} : vector<2x32xf32>, vector<32x128xf32>, vector<2x128xf32> -> vector<2x128xf32>
    %229 = arith.addf %227, %228 : vector<2x128xf32>
    %230 = vector.broadcast %2 : vector<1x128xf32> to vector<2x128xf32>
    %231 = arith.addf %229, %230 : vector<2x128xf32>
    %232 = arith.negf %231 : vector<2x128xf32>
    %233 = math.exp %232 : vector<2x128xf32>
    %cst_61 = arith.constant 1.000000e+00 : f32
    %234 = vector.broadcast %cst_61 : f32 to vector<2x128xf32>
    %235 = arith.addf %234, %233 : vector<2x128xf32>
    %236 = arith.divf %234, %235 : vector<2x128xf32>
    %237 = vector.extract_strided_slice %236 {offsets = [0, 0], sizes = [2, 32], strides = [1, 1]} : vector<2x128xf32> to vector<2x32xf32>
    %238 = vector.extract_strided_slice %236 {offsets = [0, 32], sizes = [2, 32], strides = [1, 1]} : vector<2x128xf32> to vector<2x32xf32>
    %239 = vector.extract_strided_slice %236 {offsets = [0, 96], sizes = [2, 32], strides = [1, 1]} : vector<2x128xf32> to vector<2x32xf32>
    %240 = vector.extract_strided_slice %231 {offsets = [0, 64], sizes = [2, 32], strides = [1, 1]} : vector<2x128xf32> to vector<2x32xf32>
    %241 = math.tanh %240 : vector<2x32xf32>
    %242 = arith.mulf %238, %222 : vector<2x32xf32>
    %243 = arith.mulf %237, %241 : vector<2x32xf32>
    %244 = arith.addf %242, %243 : vector<2x32xf32>
    %245 = math.tanh %244 : vector<2x32xf32>
    %246 = arith.mulf %239, %245 : vector<2x32xf32>
    %c11 = arith.constant 11 : index
    %c0_62 = arith.constant 0 : index
    %c0_63 = arith.constant 0 : index
    %247 = vector.load %arg0[%c11, %c0_62, %c0_63] : memref<16x2x16xf32, #tpu.memory_space<vmem>>, vector<1x2x16xf32>
    %248 = vector.shape_cast %247 : vector<1x2x16xf32> to vector<2x16xf32>
    %cst_64 = arith.constant dense<0.000000e+00> : vector<2x128xf32>
    %249 = tpu.matmul %248, %0, %cst_64 {dimension_numbers = #tpu.dot_dimension_numbers<[1], [0], [0], [1], [0, 0, 1, 1], [], []>} : vector<2x16xf32>, vector<16x128xf32>, vector<2x128xf32> -> vector<2x128xf32>
    %cst_65 = arith.constant dense<0.000000e+00> : vector<2x128xf32>
    %250 = tpu.matmul %246, %1, %cst_65 {dimension_numbers = #tpu.dot_dimension_numbers<[1], [0], [0], [1], [0, 0, 1, 1], [], []>} : vector<2x32xf32>, vector<32x128xf32>, vector<2x128xf32> -> vector<2x128xf32>
    %251 = arith.addf %249, %250 : vector<2x128xf32>
    %252 = vector.broadcast %2 : vector<1x128xf32> to vector<2x128xf32>
    %253 = arith.addf %251, %252 : vector<2x128xf32>
    %254 = arith.negf %253 : vector<2x128xf32>
    %255 = math.exp %254 : vector<2x128xf32>
    %cst_66 = arith.constant 1.000000e+00 : f32
    %256 = vector.broadcast %cst_66 : f32 to vector<2x128xf32>
    %257 = arith.addf %256, %255 : vector<2x128xf32>
    %258 = arith.divf %256, %257 : vector<2x128xf32>
    %259 = vector.extract_strided_slice %258 {offsets = [0, 0], sizes = [2, 32], strides = [1, 1]} : vector<2x128xf32> to vector<2x32xf32>
    %260 = vector.extract_strided_slice %258 {offsets = [0, 32], sizes = [2, 32], strides = [1, 1]} : vector<2x128xf32> to vector<2x32xf32>
    %261 = vector.extract_strided_slice %258 {offsets = [0, 96], sizes = [2, 32], strides = [1, 1]} : vector<2x128xf32> to vector<2x32xf32>
    %262 = vector.extract_strided_slice %253 {offsets = [0, 64], sizes = [2, 32], strides = [1, 1]} : vector<2x128xf32> to vector<2x32xf32>
    %263 = math.tanh %262 : vector<2x32xf32>
    %264 = arith.mulf %260, %244 : vector<2x32xf32>
    %265 = arith.mulf %259, %263 : vector<2x32xf32>
    %266 = arith.addf %264, %265 : vector<2x32xf32>
    %267 = math.tanh %266 : vector<2x32xf32>
    %268 = arith.mulf %261, %267 : vector<2x32xf32>
    %c12 = arith.constant 12 : index
    %c0_67 = arith.constant 0 : index
    %c0_68 = arith.constant 0 : index
    %269 = vector.load %arg0[%c12, %c0_67, %c0_68] : memref<16x2x16xf32, #tpu.memory_space<vmem>>, vector<1x2x16xf32>
    %270 = vector.shape_cast %269 : vector<1x2x16xf32> to vector<2x16xf32>
    %cst_69 = arith.constant dense<0.000000e+00> : vector<2x128xf32>
    %271 = tpu.matmul %270, %0, %cst_69 {dimension_numbers = #tpu.dot_dimension_numbers<[1], [0], [0], [1], [0, 0, 1, 1], [], []>} : vector<2x16xf32>, vector<16x128xf32>, vector<2x128xf32> -> vector<2x128xf32>
    %cst_70 = arith.constant dense<0.000000e+00> : vector<2x128xf32>
    %272 = tpu.matmul %268, %1, %cst_70 {dimension_numbers = #tpu.dot_dimension_numbers<[1], [0], [0], [1], [0, 0, 1, 1], [], []>} : vector<2x32xf32>, vector<32x128xf32>, vector<2x128xf32> -> vector<2x128xf32>
    %273 = arith.addf %271, %272 : vector<2x128xf32>
    %274 = vector.broadcast %2 : vector<1x128xf32> to vector<2x128xf32>
    %275 = arith.addf %273, %274 : vector<2x128xf32>
    %276 = arith.negf %275 : vector<2x128xf32>
    %277 = math.exp %276 : vector<2x128xf32>
    %cst_71 = arith.constant 1.000000e+00 : f32
    %278 = vector.broadcast %cst_71 : f32 to vector<2x128xf32>
    %279 = arith.addf %278, %277 : vector<2x128xf32>
    %280 = arith.divf %278, %279 : vector<2x128xf32>
    %281 = vector.extract_strided_slice %280 {offsets = [0, 0], sizes = [2, 32], strides = [1, 1]} : vector<2x128xf32> to vector<2x32xf32>
    %282 = vector.extract_strided_slice %280 {offsets = [0, 32], sizes = [2, 32], strides = [1, 1]} : vector<2x128xf32> to vector<2x32xf32>
    %283 = vector.extract_strided_slice %280 {offsets = [0, 96], sizes = [2, 32], strides = [1, 1]} : vector<2x128xf32> to vector<2x32xf32>
    %284 = vector.extract_strided_slice %275 {offsets = [0, 64], sizes = [2, 32], strides = [1, 1]} : vector<2x128xf32> to vector<2x32xf32>
    %285 = math.tanh %284 : vector<2x32xf32>
    %286 = arith.mulf %282, %266 : vector<2x32xf32>
    %287 = arith.mulf %281, %285 : vector<2x32xf32>
    %288 = arith.addf %286, %287 : vector<2x32xf32>
    %289 = math.tanh %288 : vector<2x32xf32>
    %290 = arith.mulf %283, %289 : vector<2x32xf32>
    %c13 = arith.constant 13 : index
    %c0_72 = arith.constant 0 : index
    %c0_73 = arith.constant 0 : index
    %291 = vector.load %arg0[%c13, %c0_72, %c0_73] : memref<16x2x16xf32, #tpu.memory_space<vmem>>, vector<1x2x16xf32>
    %292 = vector.shape_cast %291 : vector<1x2x16xf32> to vector<2x16xf32>
    %cst_74 = arith.constant dense<0.000000e+00> : vector<2x128xf32>
    %293 = tpu.matmul %292, %0, %cst_74 {dimension_numbers = #tpu.dot_dimension_numbers<[1], [0], [0], [1], [0, 0, 1, 1], [], []>} : vector<2x16xf32>, vector<16x128xf32>, vector<2x128xf32> -> vector<2x128xf32>
    %cst_75 = arith.constant dense<0.000000e+00> : vector<2x128xf32>
    %294 = tpu.matmul %290, %1, %cst_75 {dimension_numbers = #tpu.dot_dimension_numbers<[1], [0], [0], [1], [0, 0, 1, 1], [], []>} : vector<2x32xf32>, vector<32x128xf32>, vector<2x128xf32> -> vector<2x128xf32>
    %295 = arith.addf %293, %294 : vector<2x128xf32>
    %296 = vector.broadcast %2 : vector<1x128xf32> to vector<2x128xf32>
    %297 = arith.addf %295, %296 : vector<2x128xf32>
    %298 = arith.negf %297 : vector<2x128xf32>
    %299 = math.exp %298 : vector<2x128xf32>
    %cst_76 = arith.constant 1.000000e+00 : f32
    %300 = vector.broadcast %cst_76 : f32 to vector<2x128xf32>
    %301 = arith.addf %300, %299 : vector<2x128xf32>
    %302 = arith.divf %300, %301 : vector<2x128xf32>
    %303 = vector.extract_strided_slice %302 {offsets = [0, 0], sizes = [2, 32], strides = [1, 1]} : vector<2x128xf32> to vector<2x32xf32>
    %304 = vector.extract_strided_slice %302 {offsets = [0, 32], sizes = [2, 32], strides = [1, 1]} : vector<2x128xf32> to vector<2x32xf32>
    %305 = vector.extract_strided_slice %302 {offsets = [0, 96], sizes = [2, 32], strides = [1, 1]} : vector<2x128xf32> to vector<2x32xf32>
    %306 = vector.extract_strided_slice %297 {offsets = [0, 64], sizes = [2, 32], strides = [1, 1]} : vector<2x128xf32> to vector<2x32xf32>
    %307 = math.tanh %306 : vector<2x32xf32>
    %308 = arith.mulf %304, %288 : vector<2x32xf32>
    %309 = arith.mulf %303, %307 : vector<2x32xf32>
    %310 = arith.addf %308, %309 : vector<2x32xf32>
    %311 = math.tanh %310 : vector<2x32xf32>
    %312 = arith.mulf %305, %311 : vector<2x32xf32>
    %c14 = arith.constant 14 : index
    %c0_77 = arith.constant 0 : index
    %c0_78 = arith.constant 0 : index
    %313 = vector.load %arg0[%c14, %c0_77, %c0_78] : memref<16x2x16xf32, #tpu.memory_space<vmem>>, vector<1x2x16xf32>
    %314 = vector.shape_cast %313 : vector<1x2x16xf32> to vector<2x16xf32>
    %cst_79 = arith.constant dense<0.000000e+00> : vector<2x128xf32>
    %315 = tpu.matmul %314, %0, %cst_79 {dimension_numbers = #tpu.dot_dimension_numbers<[1], [0], [0], [1], [0, 0, 1, 1], [], []>} : vector<2x16xf32>, vector<16x128xf32>, vector<2x128xf32> -> vector<2x128xf32>
    %cst_80 = arith.constant dense<0.000000e+00> : vector<2x128xf32>
    %316 = tpu.matmul %312, %1, %cst_80 {dimension_numbers = #tpu.dot_dimension_numbers<[1], [0], [0], [1], [0, 0, 1, 1], [], []>} : vector<2x32xf32>, vector<32x128xf32>, vector<2x128xf32> -> vector<2x128xf32>
    %317 = arith.addf %315, %316 : vector<2x128xf32>
    %318 = vector.broadcast %2 : vector<1x128xf32> to vector<2x128xf32>
    %319 = arith.addf %317, %318 : vector<2x128xf32>
    %320 = arith.negf %319 : vector<2x128xf32>
    %321 = math.exp %320 : vector<2x128xf32>
    %cst_81 = arith.constant 1.000000e+00 : f32
    %322 = vector.broadcast %cst_81 : f32 to vector<2x128xf32>
    %323 = arith.addf %322, %321 : vector<2x128xf32>
    %324 = arith.divf %322, %323 : vector<2x128xf32>
    %325 = vector.extract_strided_slice %324 {offsets = [0, 0], sizes = [2, 32], strides = [1, 1]} : vector<2x128xf32> to vector<2x32xf32>
    %326 = vector.extract_strided_slice %324 {offsets = [0, 32], sizes = [2, 32], strides = [1, 1]} : vector<2x128xf32> to vector<2x32xf32>
    %327 = vector.extract_strided_slice %324 {offsets = [0, 96], sizes = [2, 32], strides = [1, 1]} : vector<2x128xf32> to vector<2x32xf32>
    %328 = vector.extract_strided_slice %319 {offsets = [0, 64], sizes = [2, 32], strides = [1, 1]} : vector<2x128xf32> to vector<2x32xf32>
    %329 = math.tanh %328 : vector<2x32xf32>
    %330 = arith.mulf %326, %310 : vector<2x32xf32>
    %331 = arith.mulf %325, %329 : vector<2x32xf32>
    %332 = arith.addf %330, %331 : vector<2x32xf32>
    %333 = math.tanh %332 : vector<2x32xf32>
    %334 = arith.mulf %327, %333 : vector<2x32xf32>
    %c15 = arith.constant 15 : index
    %c0_82 = arith.constant 0 : index
    %c0_83 = arith.constant 0 : index
    %335 = vector.load %arg0[%c15, %c0_82, %c0_83] : memref<16x2x16xf32, #tpu.memory_space<vmem>>, vector<1x2x16xf32>
    %336 = vector.shape_cast %335 : vector<1x2x16xf32> to vector<2x16xf32>
    %cst_84 = arith.constant dense<0.000000e+00> : vector<2x128xf32>
    %337 = tpu.matmul %336, %0, %cst_84 {dimension_numbers = #tpu.dot_dimension_numbers<[1], [0], [0], [1], [0, 0, 1, 1], [], []>} : vector<2x16xf32>, vector<16x128xf32>, vector<2x128xf32> -> vector<2x128xf32>
    %cst_85 = arith.constant dense<0.000000e+00> : vector<2x128xf32>
    %338 = tpu.matmul %334, %1, %cst_85 {dimension_numbers = #tpu.dot_dimension_numbers<[1], [0], [0], [1], [0, 0, 1, 1], [], []>} : vector<2x32xf32>, vector<32x128xf32>, vector<2x128xf32> -> vector<2x128xf32>
    %339 = arith.addf %337, %338 : vector<2x128xf32>
    %340 = vector.broadcast %2 : vector<1x128xf32> to vector<2x128xf32>
    %341 = arith.addf %339, %340 : vector<2x128xf32>
    %342 = arith.negf %341 : vector<2x128xf32>
    %343 = math.exp %342 : vector<2x128xf32>
    %cst_86 = arith.constant 1.000000e+00 : f32
    %344 = vector.broadcast %cst_86 : f32 to vector<2x128xf32>
    %345 = arith.addf %344, %343 : vector<2x128xf32>
    %346 = arith.divf %344, %345 : vector<2x128xf32>
    %347 = vector.extract_strided_slice %346 {offsets = [0, 0], sizes = [2, 32], strides = [1, 1]} : vector<2x128xf32> to vector<2x32xf32>
    %348 = vector.extract_strided_slice %346 {offsets = [0, 32], sizes = [2, 32], strides = [1, 1]} : vector<2x128xf32> to vector<2x32xf32>
    %349 = vector.extract_strided_slice %346 {offsets = [0, 96], sizes = [2, 32], strides = [1, 1]} : vector<2x128xf32> to vector<2x32xf32>
    %350 = vector.extract_strided_slice %341 {offsets = [0, 64], sizes = [2, 32], strides = [1, 1]} : vector<2x128xf32> to vector<2x32xf32>
    %351 = math.tanh %350 : vector<2x32xf32>
    %352 = arith.mulf %348, %332 : vector<2x32xf32>
    %353 = arith.mulf %347, %351 : vector<2x32xf32>
    %354 = arith.addf %352, %353 : vector<2x32xf32>
    %355 = math.tanh %354 : vector<2x32xf32>
    %356 = arith.mulf %349, %355 : vector<2x32xf32>
    %cst_87 = arith.constant 0.000000e+00 : f32
    %357 = vector.broadcast %cst_87 : f32 to vector<2x32xf32>
    %358 = vector.extract_strided_slice %26 {offsets = [0, 0], sizes = [2, 16], strides = [1, 1]} : vector<2x32xf32> to vector<2x16xf32>
    %359 = vector.extract_strided_slice %356 {offsets = [0, 16], sizes = [2, 16], strides = [1, 1]} : vector<2x32xf32> to vector<2x16xf32>
    %360 = tpu.concatenate %358, %359 in 1 : vector<2x16xf32>, vector<2x16xf32> -> vector<2x32xf32>
    %361 = vector.extract_strided_slice %48 {offsets = [0, 0], sizes = [2, 16], strides = [1, 1]} : vector<2x32xf32> to vector<2x16xf32>
    %362 = vector.extract_strided_slice %334 {offsets = [0, 16], sizes = [2, 16], strides = [1, 1]} : vector<2x32xf32> to vector<2x16xf32>
    %363 = tpu.concatenate %361, %362 in 1 : vector<2x16xf32>, vector<2x16xf32> -> vector<2x32xf32>
    %364 = vector.extract_strided_slice %70 {offsets = [0, 0], sizes = [2, 16], strides = [1, 1]} : vector<2x32xf32> to vector<2x16xf32>
    %365 = vector.extract_strided_slice %312 {offsets = [0, 16], sizes = [2, 16], strides = [1, 1]} : vector<2x32xf32> to vector<2x16xf32>
    %366 = tpu.concatenate %364, %365 in 1 : vector<2x16xf32>, vector<2x16xf32> -> vector<2x32xf32>
    %367 = vector.extract_strided_slice %92 {offsets = [0, 0], sizes = [2, 16], strides = [1, 1]} : vector<2x32xf32> to vector<2x16xf32>
    %368 = vector.extract_strided_slice %290 {offsets = [0, 16], sizes = [2, 16], strides = [1, 1]} : vector<2x32xf32> to vector<2x16xf32>
    %369 = tpu.concatenate %367, %368 in 1 : vector<2x16xf32>, vector<2x16xf32> -> vector<2x32xf32>
    %370 = vector.extract_strided_slice %114 {offsets = [0, 0], sizes = [2, 16], strides = [1, 1]} : vector<2x32xf32> to vector<2x16xf32>
    %371 = vector.extract_strided_slice %268 {offsets = [0, 16], sizes = [2, 16], strides = [1, 1]} : vector<2x32xf32> to vector<2x16xf32>
    %372 = tpu.concatenate %370, %371 in 1 : vector<2x16xf32>, vector<2x16xf32> -> vector<2x32xf32>
    %373 = vector.extract_strided_slice %136 {offsets = [0, 0], sizes = [2, 16], strides = [1, 1]} : vector<2x32xf32> to vector<2x16xf32>
    %374 = vector.extract_strided_slice %246 {offsets = [0, 16], sizes = [2, 16], strides = [1, 1]} : vector<2x32xf32> to vector<2x16xf32>
    %375 = tpu.concatenate %373, %374 in 1 : vector<2x16xf32>, vector<2x16xf32> -> vector<2x32xf32>
    %376 = vector.extract_strided_slice %158 {offsets = [0, 0], sizes = [2, 16], strides = [1, 1]} : vector<2x32xf32> to vector<2x16xf32>
    %377 = vector.extract_strided_slice %224 {offsets = [0, 16], sizes = [2, 16], strides = [1, 1]} : vector<2x32xf32> to vector<2x16xf32>
    %378 = tpu.concatenate %376, %377 in 1 : vector<2x16xf32>, vector<2x16xf32> -> vector<2x32xf32>
    %379 = vector.extract_strided_slice %180 {offsets = [0, 0], sizes = [2, 16], strides = [1, 1]} : vector<2x32xf32> to vector<2x16xf32>
    %380 = vector.extract_strided_slice %202 {offsets = [0, 16], sizes = [2, 16], strides = [1, 1]} : vector<2x32xf32> to vector<2x16xf32>
    %381 = tpu.concatenate %379, %380 in 1 : vector<2x16xf32>, vector<2x16xf32> -> vector<2x32xf32>
    %382 = vector.extract_strided_slice %202 {offsets = [0, 0], sizes = [2, 16], strides = [1, 1]} : vector<2x32xf32> to vector<2x16xf32>
    %383 = vector.extract_strided_slice %180 {offsets = [0, 16], sizes = [2, 16], strides = [1, 1]} : vector<2x32xf32> to vector<2x16xf32>
    %384 = tpu.concatenate %382, %383 in 1 : vector<2x16xf32>, vector<2x16xf32> -> vector<2x32xf32>
    %385 = vector.extract_strided_slice %224 {offsets = [0, 0], sizes = [2, 16], strides = [1, 1]} : vector<2x32xf32> to vector<2x16xf32>
    %386 = vector.extract_strided_slice %158 {offsets = [0, 16], sizes = [2, 16], strides = [1, 1]} : vector<2x32xf32> to vector<2x16xf32>
    %387 = tpu.concatenate %385, %386 in 1 : vector<2x16xf32>, vector<2x16xf32> -> vector<2x32xf32>
    %388 = vector.extract_strided_slice %246 {offsets = [0, 0], sizes = [2, 16], strides = [1, 1]} : vector<2x32xf32> to vector<2x16xf32>
    %389 = vector.extract_strided_slice %136 {offsets = [0, 16], sizes = [2, 16], strides = [1, 1]} : vector<2x32xf32> to vector<2x16xf32>
    %390 = tpu.concatenate %388, %389 in 1 : vector<2x16xf32>, vector<2x16xf32> -> vector<2x32xf32>
    %391 = vector.extract_strided_slice %268 {offsets = [0, 0], sizes = [2, 16], strides = [1, 1]} : vector<2x32xf32> to vector<2x16xf32>
    %392 = vector.extract_strided_slice %114 {offsets = [0, 16], sizes = [2, 16], strides = [1, 1]} : vector<2x32xf32> to vector<2x16xf32>
    %393 = tpu.concatenate %391, %392 in 1 : vector<2x16xf32>, vector<2x16xf32> -> vector<2x32xf32>
    %394 = vector.extract_strided_slice %290 {offsets = [0, 0], sizes = [2, 16], strides = [1, 1]} : vector<2x32xf32> to vector<2x16xf32>
    %395 = vector.extract_strided_slice %92 {offsets = [0, 16], sizes = [2, 16], strides = [1, 1]} : vector<2x32xf32> to vector<2x16xf32>
    %396 = tpu.concatenate %394, %395 in 1 : vector<2x16xf32>, vector<2x16xf32> -> vector<2x32xf32>
    %397 = vector.extract_strided_slice %312 {offsets = [0, 0], sizes = [2, 16], strides = [1, 1]} : vector<2x32xf32> to vector<2x16xf32>
    %398 = vector.extract_strided_slice %70 {offsets = [0, 16], sizes = [2, 16], strides = [1, 1]} : vector<2x32xf32> to vector<2x16xf32>
    %399 = tpu.concatenate %397, %398 in 1 : vector<2x16xf32>, vector<2x16xf32> -> vector<2x32xf32>
    %400 = vector.extract_strided_slice %334 {offsets = [0, 0], sizes = [2, 16], strides = [1, 1]} : vector<2x32xf32> to vector<2x16xf32>
    %401 = vector.extract_strided_slice %48 {offsets = [0, 16], sizes = [2, 16], strides = [1, 1]} : vector<2x32xf32> to vector<2x16xf32>
    %402 = tpu.concatenate %400, %401 in 1 : vector<2x16xf32>, vector<2x16xf32> -> vector<2x32xf32>
    %403 = vector.extract_strided_slice %356 {offsets = [0, 0], sizes = [2, 16], strides = [1, 1]} : vector<2x32xf32> to vector<2x16xf32>
    %404 = vector.extract_strided_slice %26 {offsets = [0, 16], sizes = [2, 16], strides = [1, 1]} : vector<2x32xf32> to vector<2x16xf32>
    %405 = tpu.concatenate %403, %404 in 1 : vector<2x16xf32>, vector<2x16xf32> -> vector<2x32xf32>
    %406 = vector.shape_cast %357 : vector<2x32xf32> to vector<1x2x32xf32>
    %407 = vector.shape_cast %360 : vector<2x32xf32> to vector<1x2x32xf32>
    %408 = vector.shape_cast %363 : vector<2x32xf32> to vector<1x2x32xf32>
    %409 = vector.shape_cast %366 : vector<2x32xf32> to vector<1x2x32xf32>
    %410 = vector.shape_cast %369 : vector<2x32xf32> to vector<1x2x32xf32>
    %411 = vector.shape_cast %372 : vector<2x32xf32> to vector<1x2x32xf32>
    %412 = vector.shape_cast %375 : vector<2x32xf32> to vector<1x2x32xf32>
    %413 = vector.shape_cast %378 : vector<2x32xf32> to vector<1x2x32xf32>
    %414 = vector.shape_cast %381 : vector<2x32xf32> to vector<1x2x32xf32>
    %415 = vector.shape_cast %384 : vector<2x32xf32> to vector<1x2x32xf32>
    %416 = vector.shape_cast %387 : vector<2x32xf32> to vector<1x2x32xf32>
    %417 = vector.shape_cast %390 : vector<2x32xf32> to vector<1x2x32xf32>
    %418 = vector.shape_cast %393 : vector<2x32xf32> to vector<1x2x32xf32>
    %419 = vector.shape_cast %396 : vector<2x32xf32> to vector<1x2x32xf32>
    %420 = vector.shape_cast %399 : vector<2x32xf32> to vector<1x2x32xf32>
    %421 = vector.shape_cast %402 : vector<2x32xf32> to vector<1x2x32xf32>
    %422 = vector.shape_cast %405 : vector<2x32xf32> to vector<1x2x32xf32>
    %423 = vector.shape_cast %357 : vector<2x32xf32> to vector<1x2x32xf32>
    %424 = tpu.concatenate %406, %407, %408, %409, %410, %411, %412, %413, %414, %415, %416, %417, %418, %419, %420, %421 in 0 : vector<1x2x32xf32>, vector<1x2x32xf32>, vector<1x2x32xf32>, vector<1x2x32xf32>, vector<1x2x32xf32>, vector<1x2x32xf32>, vector<1x2x32xf32>, vector<1x2x32xf32>, vector<1x2x32xf32>, vector<1x2x32xf32>, vector<1x2x32xf32>, vector<1x2x32xf32>, vector<1x2x32xf32>, vector<1x2x32xf32>, vector<1x2x32xf32>, vector<1x2x32xf32> -> vector<16x2x32xf32>
    %425 = tpu.concatenate %422, %423 in 0 : vector<1x2x32xf32>, vector<1x2x32xf32> -> vector<2x2x32xf32>
    %426 = tpu.concatenate %424, %425 in 0 : vector<16x2x32xf32>, vector<2x2x32xf32> -> vector<18x2x32xf32>
    %427 = vector.extract_strided_slice %426 {offsets = [0, 0, 0], sizes = [16, 2, 32], strides = [1, 1, 1]} : vector<18x2x32xf32> to vector<16x2x32xf32>
    %428 = vector.extract_strided_slice %426 {offsets = [1, 0, 0], sizes = [16, 2, 32], strides = [1, 1, 1]} : vector<18x2x32xf32> to vector<16x2x32xf32>
    %429 = vector.extract_strided_slice %426 {offsets = [2, 0, 0], sizes = [16, 2, 32], strides = [1, 1, 1]} : vector<18x2x32xf32> to vector<16x2x32xf32>
    %430 = tpu.concatenate %427, %428, %429 in 2 : vector<16x2x32xf32>, vector<16x2x32xf32>, vector<16x2x32xf32> -> vector<16x2x96xf32>
    %c0_88 = arith.constant 0 : index
    %c0_89 = arith.constant 0 : index
    %431 = vector.load %arg4[%c0_88, %c0_89] : memref<96x8xf32, #tpu.memory_space<vmem>>, vector<96x8xf32>
    %c0_90 = arith.constant 0 : index
    %c0_91 = arith.constant 0 : index
    %432 = vector.load %arg5[%c0_90, %c0_91] : memref<1x8xf32, #tpu.memory_space<vmem>>, vector<1x8xf32>
    %433 = vector.extract_strided_slice %430 {offsets = [0, 0, 0], sizes = [16, 1, 96], strides = [1, 1, 1]} : vector<16x2x96xf32> to vector<16x1x96xf32>
    %434 = vector.shape_cast %433 : vector<16x1x96xf32> to vector<16x96xf32>
    %cst_92 = arith.constant dense<0.000000e+00> : vector<16x8xf32>
    %435 = tpu.matmul %434, %431, %cst_92 {dimension_numbers = #tpu.dot_dimension_numbers<[1], [0], [0], [1], [0, 0, 1, 1], [], []>} : vector<16x96xf32>, vector<96x8xf32>, vector<16x8xf32> -> vector<16x8xf32>
    %436 = vector.broadcast %432 : vector<1x8xf32> to vector<16x8xf32>
    %437 = arith.addf %435, %436 : vector<16x8xf32>
    %cst_93 = arith.constant 0.000000e+00 : f32
    %438 = vector.broadcast %cst_93 : f32 to vector<16x8xf32>
    %439 = arith.maximumf %437, %438 : vector<16x8xf32>
    %440 = vector.extract_strided_slice %439 {offsets = [0, 0], sizes = [2, 8], strides = [1, 1]} : vector<16x8xf32> to vector<2x8xf32>
    %cst_94 = arith.constant dense<0xFF800000> : vector<8xf32>
    %441 = vector.multi_reduction <maximumf>, %440, %cst_94 [0] : vector<2x8xf32> to vector<8xf32>
    %442 = vector.shape_cast %441 : vector<8xf32> to vector<1x8xf32>
    %443 = vector.extract_strided_slice %439 {offsets = [2, 0], sizes = [2, 8], strides = [1, 1]} : vector<16x8xf32> to vector<2x8xf32>
    %cst_95 = arith.constant dense<0xFF800000> : vector<8xf32>
    %444 = vector.multi_reduction <maximumf>, %443, %cst_95 [0] : vector<2x8xf32> to vector<8xf32>
    %445 = vector.shape_cast %444 : vector<8xf32> to vector<1x8xf32>
    %446 = vector.extract_strided_slice %439 {offsets = [4, 0], sizes = [2, 8], strides = [1, 1]} : vector<16x8xf32> to vector<2x8xf32>
    %cst_96 = arith.constant dense<0xFF800000> : vector<8xf32>
    %447 = vector.multi_reduction <maximumf>, %446, %cst_96 [0] : vector<2x8xf32> to vector<8xf32>
    %448 = vector.shape_cast %447 : vector<8xf32> to vector<1x8xf32>
    %449 = vector.extract_strided_slice %439 {offsets = [6, 0], sizes = [2, 8], strides = [1, 1]} : vector<16x8xf32> to vector<2x8xf32>
    %cst_97 = arith.constant dense<0xFF800000> : vector<8xf32>
    %450 = vector.multi_reduction <maximumf>, %449, %cst_97 [0] : vector<2x8xf32> to vector<8xf32>
    %451 = vector.shape_cast %450 : vector<8xf32> to vector<1x8xf32>
    %452 = vector.extract_strided_slice %439 {offsets = [8, 0], sizes = [2, 8], strides = [1, 1]} : vector<16x8xf32> to vector<2x8xf32>
    %cst_98 = arith.constant dense<0xFF800000> : vector<8xf32>
    %453 = vector.multi_reduction <maximumf>, %452, %cst_98 [0] : vector<2x8xf32> to vector<8xf32>
    %454 = vector.shape_cast %453 : vector<8xf32> to vector<1x8xf32>
    %455 = vector.extract_strided_slice %439 {offsets = [10, 0], sizes = [2, 8], strides = [1, 1]} : vector<16x8xf32> to vector<2x8xf32>
    %cst_99 = arith.constant dense<0xFF800000> : vector<8xf32>
    %456 = vector.multi_reduction <maximumf>, %455, %cst_99 [0] : vector<2x8xf32> to vector<8xf32>
    %457 = vector.shape_cast %456 : vector<8xf32> to vector<1x8xf32>
    %458 = vector.extract_strided_slice %439 {offsets = [12, 0], sizes = [2, 8], strides = [1, 1]} : vector<16x8xf32> to vector<2x8xf32>
    %cst_100 = arith.constant dense<0xFF800000> : vector<8xf32>
    %459 = vector.multi_reduction <maximumf>, %458, %cst_100 [0] : vector<2x8xf32> to vector<8xf32>
    %460 = vector.shape_cast %459 : vector<8xf32> to vector<1x8xf32>
    %461 = vector.extract_strided_slice %439 {offsets = [14, 0], sizes = [2, 8], strides = [1, 1]} : vector<16x8xf32> to vector<2x8xf32>
    %cst_101 = arith.constant dense<0xFF800000> : vector<8xf32>
    %462 = vector.multi_reduction <maximumf>, %461, %cst_101 [0] : vector<2x8xf32> to vector<8xf32>
    %463 = vector.shape_cast %462 : vector<8xf32> to vector<1x8xf32>
    %464 = tpu.concatenate %442, %445, %448, %451, %454, %457, %460, %463 in 0 : vector<1x8xf32>, vector<1x8xf32>, vector<1x8xf32>, vector<1x8xf32>, vector<1x8xf32>, vector<1x8xf32>, vector<1x8xf32>, vector<1x8xf32> -> vector<8x8xf32>
    %465 = tpu.transpose %464, [1, 0] : vector<8x8xf32> -> vector<8x8xf32>
    %466 = vector.extract_strided_slice %430 {offsets = [0, 1, 0], sizes = [16, 1, 96], strides = [1, 1, 1]} : vector<16x2x96xf32> to vector<16x1x96xf32>
    %467 = vector.shape_cast %466 : vector<16x1x96xf32> to vector<16x96xf32>
    %cst_102 = arith.constant dense<0.000000e+00> : vector<16x8xf32>
    %468 = tpu.matmul %467, %431, %cst_102 {dimension_numbers = #tpu.dot_dimension_numbers<[1], [0], [0], [1], [0, 0, 1, 1], [], []>} : vector<16x96xf32>, vector<96x8xf32>, vector<16x8xf32> -> vector<16x8xf32>
    %469 = vector.broadcast %432 : vector<1x8xf32> to vector<16x8xf32>
    %470 = arith.addf %468, %469 : vector<16x8xf32>
    %cst_103 = arith.constant 0.000000e+00 : f32
    %471 = vector.broadcast %cst_103 : f32 to vector<16x8xf32>
    %472 = arith.maximumf %470, %471 : vector<16x8xf32>
    %473 = vector.extract_strided_slice %472 {offsets = [0, 0], sizes = [2, 8], strides = [1, 1]} : vector<16x8xf32> to vector<2x8xf32>
    %cst_104 = arith.constant dense<0xFF800000> : vector<8xf32>
    %474 = vector.multi_reduction <maximumf>, %473, %cst_104 [0] : vector<2x8xf32> to vector<8xf32>
    %475 = vector.shape_cast %474 : vector<8xf32> to vector<1x8xf32>
    %476 = vector.extract_strided_slice %472 {offsets = [2, 0], sizes = [2, 8], strides = [1, 1]} : vector<16x8xf32> to vector<2x8xf32>
    %cst_105 = arith.constant dense<0xFF800000> : vector<8xf32>
    %477 = vector.multi_reduction <maximumf>, %476, %cst_105 [0] : vector<2x8xf32> to vector<8xf32>
    %478 = vector.shape_cast %477 : vector<8xf32> to vector<1x8xf32>
    %479 = vector.extract_strided_slice %472 {offsets = [4, 0], sizes = [2, 8], strides = [1, 1]} : vector<16x8xf32> to vector<2x8xf32>
    %cst_106 = arith.constant dense<0xFF800000> : vector<8xf32>
    %480 = vector.multi_reduction <maximumf>, %479, %cst_106 [0] : vector<2x8xf32> to vector<8xf32>
    %481 = vector.shape_cast %480 : vector<8xf32> to vector<1x8xf32>
    %482 = vector.extract_strided_slice %472 {offsets = [6, 0], sizes = [2, 8], strides = [1, 1]} : vector<16x8xf32> to vector<2x8xf32>
    %cst_107 = arith.constant dense<0xFF800000> : vector<8xf32>
    %483 = vector.multi_reduction <maximumf>, %482, %cst_107 [0] : vector<2x8xf32> to vector<8xf32>
    %484 = vector.shape_cast %483 : vector<8xf32> to vector<1x8xf32>
    %485 = vector.extract_strided_slice %472 {offsets = [8, 0], sizes = [2, 8], strides = [1, 1]} : vector<16x8xf32> to vector<2x8xf32>
    %cst_108 = arith.constant dense<0xFF800000> : vector<8xf32>
    %486 = vector.multi_reduction <maximumf>, %485, %cst_108 [0] : vector<2x8xf32> to vector<8xf32>
    %487 = vector.shape_cast %486 : vector<8xf32> to vector<1x8xf32>
    %488 = vector.extract_strided_slice %472 {offsets = [10, 0], sizes = [2, 8], strides = [1, 1]} : vector<16x8xf32> to vector<2x8xf32>
    %cst_109 = arith.constant dense<0xFF800000> : vector<8xf32>
    %489 = vector.multi_reduction <maximumf>, %488, %cst_109 [0] : vector<2x8xf32> to vector<8xf32>
    %490 = vector.shape_cast %489 : vector<8xf32> to vector<1x8xf32>
    %491 = vector.extract_strided_slice %472 {offsets = [12, 0], sizes = [2, 8], strides = [1, 1]} : vector<16x8xf32> to vector<2x8xf32>
    %cst_110 = arith.constant dense<0xFF800000> : vector<8xf32>
    %492 = vector.multi_reduction <maximumf>, %491, %cst_110 [0] : vector<2x8xf32> to vector<8xf32>
    %493 = vector.shape_cast %492 : vector<8xf32> to vector<1x8xf32>
    %494 = vector.extract_strided_slice %472 {offsets = [14, 0], sizes = [2, 8], strides = [1, 1]} : vector<16x8xf32> to vector<2x8xf32>
    %cst_111 = arith.constant dense<0xFF800000> : vector<8xf32>
    %495 = vector.multi_reduction <maximumf>, %494, %cst_111 [0] : vector<2x8xf32> to vector<8xf32>
    %496 = vector.shape_cast %495 : vector<8xf32> to vector<1x8xf32>
    %497 = tpu.concatenate %475, %478, %481, %484, %487, %490, %493, %496 in 0 : vector<1x8xf32>, vector<1x8xf32>, vector<1x8xf32>, vector<1x8xf32>, vector<1x8xf32>, vector<1x8xf32>, vector<1x8xf32>, vector<1x8xf32> -> vector<8x8xf32>
    %498 = tpu.transpose %497, [1, 0] : vector<8x8xf32> -> vector<8x8xf32>
    %499 = tpu.concatenate %465, %498 in 0 : vector<8x8xf32>, vector<8x8xf32> -> vector<16x8xf32>
    %c0_112 = arith.constant 0 : index
    %c0_113 = arith.constant 0 : index
    %500 = vector.load %arg7[%c0_112, %c0_113] : memref<8x24xf32, #tpu.memory_space<vmem>>, vector<8x24xf32>
    %cst_114 = arith.constant dense<0.000000e+00> : vector<16x24xf32>
    %501 = tpu.matmul %499, %500, %cst_114 {dimension_numbers = #tpu.dot_dimension_numbers<[1], [0], [0], [1], [0, 0, 1, 1], [], []>} : vector<16x8xf32>, vector<8x24xf32>, vector<16x24xf32> -> vector<16x24xf32>
    %c0_115 = arith.constant 0 : index
    %c0_116 = arith.constant 0 : index
    %502 = vector.load %arg8[%c0_115, %c0_116] : memref<1x24xf32, #tpu.memory_space<vmem>>, vector<1x24xf32>
    %503 = vector.broadcast %502 : vector<1x24xf32> to vector<16x24xf32>
    %504 = arith.addf %501, %503 : vector<16x24xf32>
    %505 = vector.extract_strided_slice %504 {offsets = [0, 0], sizes = [8, 4], strides = [1, 1]} : vector<16x24xf32> to vector<8x4xf32>
    %506 = vector.extract_strided_slice %504 {offsets = [0, 8], sizes = [8, 4], strides = [1, 1]} : vector<16x24xf32> to vector<8x4xf32>
    %507 = vector.extract_strided_slice %504 {offsets = [0, 16], sizes = [8, 4], strides = [1, 1]} : vector<16x24xf32> to vector<8x4xf32>
    %508 = vector.extract_strided_slice %504 {offsets = [0, 4], sizes = [8, 4], strides = [1, 1]} : vector<16x24xf32> to vector<8x4xf32>
    %509 = vector.extract_strided_slice %504 {offsets = [0, 12], sizes = [8, 4], strides = [1, 1]} : vector<16x24xf32> to vector<8x4xf32>
    %510 = vector.extract_strided_slice %504 {offsets = [0, 20], sizes = [8, 4], strides = [1, 1]} : vector<16x24xf32> to vector<8x4xf32>
    %511 = vector.extract_strided_slice %504 {offsets = [8, 0], sizes = [8, 4], strides = [1, 1]} : vector<16x24xf32> to vector<8x4xf32>
    %512 = vector.extract_strided_slice %504 {offsets = [8, 8], sizes = [8, 4], strides = [1, 1]} : vector<16x24xf32> to vector<8x4xf32>
    %513 = vector.extract_strided_slice %504 {offsets = [8, 16], sizes = [8, 4], strides = [1, 1]} : vector<16x24xf32> to vector<8x4xf32>
    %514 = vector.extract_strided_slice %504 {offsets = [8, 4], sizes = [8, 4], strides = [1, 1]} : vector<16x24xf32> to vector<8x4xf32>
    %515 = vector.extract_strided_slice %504 {offsets = [8, 12], sizes = [8, 4], strides = [1, 1]} : vector<16x24xf32> to vector<8x4xf32>
    %516 = vector.extract_strided_slice %504 {offsets = [8, 20], sizes = [8, 4], strides = [1, 1]} : vector<16x24xf32> to vector<8x4xf32>
    %517 = vector.shape_cast %505 : vector<8x4xf32> to vector<1x8x4xf32>
    %518 = vector.shape_cast %508 : vector<8x4xf32> to vector<1x8x4xf32>
    %519 = vector.shape_cast %511 : vector<8x4xf32> to vector<1x8x4xf32>
    %520 = vector.shape_cast %514 : vector<8x4xf32> to vector<1x8x4xf32>
    %521 = tpu.concatenate %517, %518, %519, %520 in 0 : vector<1x8x4xf32>, vector<1x8x4xf32>, vector<1x8x4xf32>, vector<1x8x4xf32> -> vector<4x8x4xf32>
    %522 = vector.shape_cast %506 : vector<8x4xf32> to vector<1x8x4xf32>
    %523 = vector.shape_cast %509 : vector<8x4xf32> to vector<1x8x4xf32>
    %524 = vector.shape_cast %512 : vector<8x4xf32> to vector<1x8x4xf32>
    %525 = vector.shape_cast %515 : vector<8x4xf32> to vector<1x8x4xf32>
    %526 = tpu.concatenate %522, %523, %524, %525 in 0 : vector<1x8x4xf32>, vector<1x8x4xf32>, vector<1x8x4xf32>, vector<1x8x4xf32> -> vector<4x8x4xf32>
    %527 = vector.shape_cast %507 : vector<8x4xf32> to vector<1x8x4xf32>
    %528 = vector.shape_cast %510 : vector<8x4xf32> to vector<1x8x4xf32>
    %529 = vector.shape_cast %513 : vector<8x4xf32> to vector<1x8x4xf32>
    %530 = vector.shape_cast %516 : vector<8x4xf32> to vector<1x8x4xf32>
    %531 = tpu.concatenate %527, %528, %529, %530 in 0 : vector<1x8x4xf32>, vector<1x8x4xf32>, vector<1x8x4xf32>, vector<1x8x4xf32> -> vector<4x8x4xf32>
    "tpu.trace_start"() <{level = 10 : i32, message = "gqd,gkd->gqk"}> : () -> ()
    %cst_117 = arith.constant dense<0.000000e+00> : vector<4x8x8xf32>
    %532 = tpu.matmul %521, %526, %cst_117 {dimension_numbers = #tpu.dot_dimension_numbers<[2], [2], [1], [1], [0, 0, 0, 1, 1, 1], [0], [0]>} : vector<4x8x4xf32>, vector<4x8x4xf32>, vector<4x8x8xf32> -> vector<4x8x8xf32>
    "tpu.trace_stop"() : () -> ()
    %cst_118 = arith.constant 5.000000e-01 : f32
    %533 = vector.broadcast %cst_118 : f32 to vector<4x8x8xf32>
    %534 = arith.mulf %532, %533 : vector<4x8x8xf32>
    %c0_119 = arith.constant 0 : index
    %c0_120 = arith.constant 0 : index
    %535 = vector.load %arg6[%c0_119, %c0_120] : memref<8x8xf32, #tpu.memory_space<vmem>>, vector<8x8xf32>
    %536 = vector.shape_cast %535 : vector<8x8xf32> to vector<1x8x8xf32>
    %537 = vector.broadcast %536 : vector<1x8x8xf32> to vector<4x8x8xf32>
    %538 = arith.addf %534, %537 : vector<4x8x8xf32>
    %cst_121 = arith.constant dense<0xFF800000> : vector<4x8xf32>
    %539 = vector.multi_reduction <maximumf>, %538, %cst_121 [2] : vector<4x8x8xf32> to vector<4x8xf32>
    %540 = vector.shape_cast %539 : vector<4x8xf32> to vector<4x8x1xf32>
    %541 = vector.broadcast %540 : vector<4x8x1xf32> to vector<4x8x8xf32>
    %542 = arith.subf %538, %541 : vector<4x8x8xf32>
    %543 = math.exp %542 : vector<4x8x8xf32>
    %cst_122 = arith.constant dense<0.000000e+00> : vector<4x8xf32>
    %544 = vector.multi_reduction <add>, %543, %cst_122 [2] : vector<4x8x8xf32> to vector<4x8xf32>
    %545 = vector.shape_cast %544 : vector<4x8xf32> to vector<4x8x1xf32>
    %546 = tpu.reciprocal %545 {approx = true} : vector<4x8x1xf32> -> vector<4x8x1xf32>
    %547 = vector.broadcast %546 : vector<4x8x1xf32> to vector<4x8x8xf32>
    %548 = arith.mulf %543, %547 : vector<4x8x8xf32>
    "tpu.trace_start"() <{level = 10 : i32, message = "gqk,gkd->gqd"}> : () -> ()
    %cst_123 = arith.constant dense<0.000000e+00> : vector<4x8x4xf32>
    %549 = tpu.matmul %548, %531, %cst_123 {dimension_numbers = #tpu.dot_dimension_numbers<[2], [1], [1], [2], [0, 0, 0, 1, 1, 2], [0], [0]>} : vector<4x8x8xf32>, vector<4x8x4xf32>, vector<4x8x4xf32> -> vector<4x8x4xf32>
    "tpu.trace_stop"() : () -> ()
    %550 = vector.extract_strided_slice %549 {offsets = [0, 0, 0], sizes = [1, 8, 4], strides = [1, 1, 1]} : vector<4x8x4xf32> to vector<1x8x4xf32>
    %551 = vector.shape_cast %550 : vector<1x8x4xf32> to vector<8x4xf32>
    %552 = vector.extract_strided_slice %549 {offsets = [1, 0, 0], sizes = [1, 8, 4], strides = [1, 1, 1]} : vector<4x8x4xf32> to vector<1x8x4xf32>
    %553 = vector.shape_cast %552 : vector<1x8x4xf32> to vector<8x4xf32>
    %554 = tpu.concatenate %551, %553 in 1 : vector<8x4xf32>, vector<8x4xf32> -> vector<8x8xf32>
    %555 = vector.extract_strided_slice %549 {offsets = [2, 0, 0], sizes = [1, 8, 4], strides = [1, 1, 1]} : vector<4x8x4xf32> to vector<1x8x4xf32>
    %556 = vector.shape_cast %555 : vector<1x8x4xf32> to vector<8x4xf32>
    %557 = vector.extract_strided_slice %549 {offsets = [3, 0, 0], sizes = [1, 8, 4], strides = [1, 1, 1]} : vector<4x8x4xf32> to vector<1x8x4xf32>
    %558 = vector.shape_cast %557 : vector<1x8x4xf32> to vector<8x4xf32>
    %559 = tpu.concatenate %556, %558 in 1 : vector<8x4xf32>, vector<8x4xf32> -> vector<8x8xf32>
    %560 = tpu.concatenate %554, %559 in 0 : vector<8x8xf32>, vector<8x8xf32> -> vector<16x8xf32>
    %c0_124 = arith.constant 0 : index
    %c0_125 = arith.constant 0 : index
    %561 = vector.load %arg9[%c0_124, %c0_125] : memref<8x8xf32, #tpu.memory_space<vmem>>, vector<8x8xf32>
    %cst_126 = arith.constant dense<0.000000e+00> : vector<16x8xf32>
    %562 = tpu.matmul %560, %561, %cst_126 {dimension_numbers = #tpu.dot_dimension_numbers<[1], [0], [0], [1], [0, 0, 1, 1], [], []>} : vector<16x8xf32>, vector<8x8xf32>, vector<16x8xf32> -> vector<16x8xf32>
    %c0_127 = arith.constant 0 : index
    %c0_128 = arith.constant 0 : index
    %563 = vector.load %arg10[%c0_127, %c0_128] : memref<1x8xf32, #tpu.memory_space<vmem>>, vector<1x8xf32>
    %564 = vector.broadcast %563 : vector<1x8xf32> to vector<16x8xf32>
    %565 = arith.addf %562, %564 : vector<16x8xf32>
    %566 = arith.addf %499, %565 : vector<16x8xf32>
    %c0_129 = arith.constant 0 : index
    %c0_130 = arith.constant 0 : index
    %567 = vector.load %arg15[%c0_129, %c0_130] : memref<1x8xf32, #tpu.memory_space<vmem>>, vector<1x8xf32>
    %c0_131 = arith.constant 0 : index
    %c0_132 = arith.constant 0 : index
    %568 = vector.load %arg16[%c0_131, %c0_132] : memref<1x8xf32, #tpu.memory_space<vmem>>, vector<1x8xf32>
    %cst_133 = arith.constant dense<0.000000e+00> : vector<16xf32>
    %569 = vector.multi_reduction <add>, %566, %cst_133 [1] : vector<16x8xf32> to vector<16xf32>
    %570 = vector.shape_cast %569 : vector<16xf32> to vector<16x1xf32>
    %cst_134 = arith.constant 8.000000e+00 : f32
    %571 = vector.broadcast %cst_134 : f32 to vector<16x1xf32>
    %572 = arith.divf %570, %571 : vector<16x1xf32>
    %573 = vector.broadcast %572 : vector<16x1xf32> to vector<16x8xf32>
    %574 = arith.subf %566, %573 : vector<16x8xf32>
    %575 = arith.mulf %574, %574 : vector<16x8xf32>
    %cst_135 = arith.constant dense<0.000000e+00> : vector<16xf32>
    %576 = vector.multi_reduction <add>, %575, %cst_135 [1] : vector<16x8xf32> to vector<16xf32>
    %577 = vector.shape_cast %576 : vector<16xf32> to vector<16x1xf32>
    %cst_136 = arith.constant 8.000000e+00 : f32
    %578 = vector.broadcast %cst_136 : f32 to vector<16x1xf32>
    %579 = arith.divf %577, %578 : vector<16x1xf32>
    %580 = vector.broadcast %572 : vector<16x1xf32> to vector<16x8xf32>
    %581 = arith.subf %566, %580 : vector<16x8xf32>
    %cst_137 = arith.constant 9.99999974E-6 : f32
    %582 = vector.broadcast %cst_137 : f32 to vector<16x1xf32>
    %583 = arith.addf %579, %582 : vector<16x1xf32>
    %584 = math.rsqrt %583 : vector<16x1xf32>
    %585 = vector.broadcast %584 : vector<16x1xf32> to vector<16x8xf32>
    %586 = arith.mulf %581, %585 : vector<16x8xf32>
    %587 = vector.broadcast %567 : vector<1x8xf32> to vector<16x8xf32>
    %588 = arith.mulf %586, %587 : vector<16x8xf32>
    %589 = vector.broadcast %568 : vector<1x8xf32> to vector<16x8xf32>
    %590 = arith.addf %588, %589 : vector<16x8xf32>
    %c0_138 = arith.constant 0 : index
    %c0_139 = arith.constant 0 : index
    %591 = vector.load %arg11[%c0_138, %c0_139] : memref<8x2048xf32, #tpu.memory_space<vmem>>, vector<8x2048xf32>
    %cst_140 = arith.constant dense<0.000000e+00> : vector<16x2048xf32>
    %592 = tpu.matmul %590, %591, %cst_140 {dimension_numbers = #tpu.dot_dimension_numbers<[1], [0], [0], [1], [0, 0, 1, 1], [], []>} : vector<16x8xf32>, vector<8x2048xf32>, vector<16x2048xf32> -> vector<16x2048xf32>
    %c0_141 = arith.constant 0 : index
    %c0_142 = arith.constant 0 : index
    %593 = vector.load %arg12[%c0_141, %c0_142] : memref<1x2048xf32, #tpu.memory_space<vmem>>, vector<1x2048xf32>
    %594 = vector.broadcast %593 : vector<1x2048xf32> to vector<16x2048xf32>
    %595 = arith.addf %592, %594 : vector<16x2048xf32>
    %cst_143 = arith.constant 0.000000e+00 : f32
    %596 = vector.broadcast %cst_143 : f32 to vector<16x2048xf32>
    %597 = arith.maximumf %595, %596 : vector<16x2048xf32>
    %c0_144 = arith.constant 0 : index
    %c0_145 = arith.constant 0 : index
    %598 = vector.load %arg13[%c0_144, %c0_145] : memref<2048x8xf32, #tpu.memory_space<vmem>>, vector<2048x8xf32>
    %cst_146 = arith.constant dense<0.000000e+00> : vector<16x8xf32>
    %599 = tpu.matmul %597, %598, %cst_146 {dimension_numbers = #tpu.dot_dimension_numbers<[1], [0], [0], [1], [0, 0, 1, 1], [], []>} : vector<16x2048xf32>, vector<2048x8xf32>, vector<16x8xf32> -> vector<16x8xf32>
    %c0_147 = arith.constant 0 : index
    %c0_148 = arith.constant 0 : index
    %600 = vector.load %arg14[%c0_147, %c0_148] : memref<1x8xf32, #tpu.memory_space<vmem>>, vector<1x8xf32>
    %601 = vector.broadcast %600 : vector<1x8xf32> to vector<16x8xf32>
    %602 = arith.addf %599, %601 : vector<16x8xf32>
    %603 = arith.addf %590, %602 : vector<16x8xf32>
    %c0_149 = arith.constant 0 : index
    %c0_150 = arith.constant 0 : index
    %604 = vector.load %arg17[%c0_149, %c0_150] : memref<1x8xf32, #tpu.memory_space<vmem>>, vector<1x8xf32>
    %c0_151 = arith.constant 0 : index
    %c0_152 = arith.constant 0 : index
    %605 = vector.load %arg18[%c0_151, %c0_152] : memref<1x8xf32, #tpu.memory_space<vmem>>, vector<1x8xf32>
    %cst_153 = arith.constant dense<0.000000e+00> : vector<16xf32>
    %606 = vector.multi_reduction <add>, %603, %cst_153 [1] : vector<16x8xf32> to vector<16xf32>
    %607 = vector.shape_cast %606 : vector<16xf32> to vector<16x1xf32>
    %cst_154 = arith.constant 8.000000e+00 : f32
    %608 = vector.broadcast %cst_154 : f32 to vector<16x1xf32>
    %609 = arith.divf %607, %608 : vector<16x1xf32>
    %610 = vector.broadcast %609 : vector<16x1xf32> to vector<16x8xf32>
    %611 = arith.subf %603, %610 : vector<16x8xf32>
    %612 = arith.mulf %611, %611 : vector<16x8xf32>
    %cst_155 = arith.constant dense<0.000000e+00> : vector<16xf32>
    %613 = vector.multi_reduction <add>, %612, %cst_155 [1] : vector<16x8xf32> to vector<16xf32>
    %614 = vector.shape_cast %613 : vector<16xf32> to vector<16x1xf32>
    %cst_156 = arith.constant 8.000000e+00 : f32
    %615 = vector.broadcast %cst_156 : f32 to vector<16x1xf32>
    %616 = arith.divf %614, %615 : vector<16x1xf32>
    %617 = vector.broadcast %609 : vector<16x1xf32> to vector<16x8xf32>
    %618 = arith.subf %603, %617 : vector<16x8xf32>
    %cst_157 = arith.constant 9.99999974E-6 : f32
    %619 = vector.broadcast %cst_157 : f32 to vector<16x1xf32>
    %620 = arith.addf %616, %619 : vector<16x1xf32>
    %621 = math.rsqrt %620 : vector<16x1xf32>
    %622 = vector.broadcast %621 : vector<16x1xf32> to vector<16x8xf32>
    %623 = arith.mulf %618, %622 : vector<16x8xf32>
    %624 = vector.broadcast %604 : vector<1x8xf32> to vector<16x8xf32>
    %625 = arith.mulf %623, %624 : vector<16x8xf32>
    %626 = vector.broadcast %605 : vector<1x8xf32> to vector<16x8xf32>
    %627 = arith.addf %625, %626 : vector<16x8xf32>
    %c0_158 = arith.constant 0 : index
    %c0_159 = arith.constant 0 : index
    %628 = vector.load %arg19[%c0_158, %c0_159] : memref<8x1xf32, #tpu.memory_space<vmem>>, vector<8x1xf32>
    %cst_160 = arith.constant dense<0.000000e+00> : vector<16x1xf32>
    %629 = tpu.matmul %627, %628, %cst_160 {dimension_numbers = #tpu.dot_dimension_numbers<[1], [0], [0], [1], [0, 0, 1, 1], [], []>} : vector<16x8xf32>, vector<8x1xf32>, vector<16x1xf32> -> vector<16x1xf32>
    %c0_161 = arith.constant 0 : index
    %c0_162 = arith.constant 0 : index
    %630 = vector.load %arg20[%c0_161, %c0_162] : memref<1x1xf32, #tpu.memory_space<vmem>>, vector<1x1xf32>
    %631 = vector.broadcast %630 : vector<1x1xf32> to vector<16x1xf32>
    %632 = arith.addf %629, %631 : vector<16x1xf32>
    %c0_163 = arith.constant 0 : index
    %c0_164 = arith.constant 0 : index
    %633 = vector.load %arg21[%c0_163, %c0_164] : memref<2x16xf32, #tpu.memory_space<vmem>>, vector<2x16xf32>
    %cst_165 = arith.constant dense<0.000000e+00> : vector<2x1xf32>
    %634 = tpu.matmul %633, %632, %cst_165 {dimension_numbers = #tpu.dot_dimension_numbers<[1], [0], [0], [1], [0, 0, 1, 1], [], []>} : vector<2x16xf32>, vector<16x1xf32>, vector<2x1xf32> -> vector<2x1xf32>
    %c0_166 = arith.constant 0 : index
    %c0_167 = arith.constant 0 : index
    %635 = vector.load %arg22[%c0_166, %c0_167] : memref<1x1xf32, #tpu.memory_space<vmem>>, vector<1x1xf32>
    %636 = vector.broadcast %635 : vector<1x1xf32> to vector<2x1xf32>
    %637 = arith.addf %634, %636 : vector<2x1xf32>
    %638 = arith.negf %637 : vector<2x1xf32>
    %639 = math.exp %638 : vector<2x1xf32>
    %cst_168 = arith.constant 1.000000e+00 : f32
    %640 = vector.broadcast %cst_168 : f32 to vector<2x1xf32>
    %641 = arith.addf %640, %639 : vector<2x1xf32>
    %642 = arith.divf %640, %641 : vector<2x1xf32>
    %c0_169 = arith.constant 0 : index
    %c0_170 = arith.constant 0 : index
    %643 = vector.load %arg23[%c0_169, %c0_170] : memref<2x1xf32, #tpu.memory_space<vmem>>, vector<2x1xf32>
    tpu.vector_store %arg23[%c0_169, %c0_170], %642 {strides = array<i32>} : memref<2x1xf32, #tpu.memory_space<vmem>>, vector<2x1xf32>,
    return
  }
}

</mosaic_0001>

<bundles_post_ra>
// kernel: forward.1
= control target key start
LH: loop header
LB: loop body
LE: loop exit
PB: predicated region body
PF: predicated region fallthrough
CT: control target
= control target key end

     0   :  { %v7903_v0 = vmov 0.0|0.0   ;;  %vm7904_vm0 = vmmov 0   ;;  %v7905_v8 = vmov 0.0   ;;  %vm160_vm1 = vcmask 130048   ;;  %s7907_s26 = smov 32   ;;  %s7908_s28 = smov 124   ;;  %s9923_s2 = inlined_call_operand.vmem [shape: f32[32,128], index: 2, kind: input, shape index: {}]   ;;  %s9924_s1 = inlined_call_operand.vmem [shape: f32[16,128], index: 1, kind: input, shape index: {}]   ;;  %s9925_s0 = inlined_call_operand.vmem [shape: f32[16,2,16], index: 0, kind: input, shape index: {}]   ;;  %s9926_s3 = inlined_call_operand.vmem [shape: f32[1,128], index: 3, kind: input, shape index: {}]   ;;  %s9927_s4 = inlined_call_operand.vmem [shape: f32[96,8], index: 4, kind: input, shape index: {}]   ;;  %s9928_s7 = inlined_call_operand.vmem [shape: f32[8,24], index: 7, kind: input, shape index: {}]   ;;  %s9929_s5 = inlined_call_operand.vmem [shape: f32[1,8], index: 5, kind: input, shape index: {}]   ;;  %s9930_s8 = inlined_call_operand.vmem [shape: f32[1,24], index: 8, kind: input, shape index: {}]   ;;  %s9931_s6 = inlined_call_operand.vmem [shape: f32[8,8], index: 6, kind: input, shape index: {}]   ;;  %s9932_s9 = inlined_call_operand.vmem [shape: f32[8,8], index: 9, kind: input, shape index: {}]   ;;  %s9933_s10 = inlined_call_operand.vmem [shape: f32[1,8], index: 10, kind: input, shape index: {}]   ;;  %s9934_s11 = inlined_call_operand.vmem [shape: f32[8,2048], index: 11, kind: input, shape index: {}]   ;;  %s9935_s15 = inlined_call_operand.vmem [shape: f32[1,8], index: 15, kind: input, shape index: {}]   ;;  %s9936_s16 = inlined_call_operand.vmem [shape: f32[1,8], index: 16, kind: input, shape index: {}]   ;;  %s9937_s13 = inlined_call_operand.vmem [shape: f32[2048,8], index: 13, kind: input, shape index: {}]   ;;  %s9938_s12 = inlined_call_operand.vmem [shape: f32[1,2048], index: 12, kind: input, shape index: {}]   ;;  %s9939_s14 = inlined_call_operand.vmem [shape: f32[1,8], index: 14, kind: input, shape index: {}]   ;;  %s9940_s19 = inlined_call_operand.vmem [shape: f32[8,1], index: 19, kind: input, shape index: {}]   ;;  %s9941_s20 = inlined_call_operand.<no memory space> [shape: f32[1,1], index: 20, kind: input, shape index: {}]   ;;  %s9942_s17 = inlined_call_operand.vmem [shape: f32[1,8], index: 17, kind: input, shape index: {}]   ;;  %s9943_s18 = inlined_call_operand.vmem [shape: f32[1,8], index: 18, kind: input, shape index: {}]   ;;  %s9944_s22 = inlined_call_operand.<no memory space> [shape: f32[1,1], index: 22, kind: input, shape index: {}]   ;;  %s9945_s21 = inlined_call_operand.vmem [shape: f32[2,16], index: 21, kind: input, shape index: {}]   ;;  %s9946_s23 = inlined_call_operand.vmem [shape: f32[2,1], index: 23, kind: output, shape index: {}]  }
   0x1   :  { %9952 = sst [smem:[#allocation4_spill]] %s9923_s2  ;;  %7286 = vmatprep.subr.bf16.mxu0 %v7903_v0  ;;  %7292 = vmatprep.subr.bf16.mxu1 %v7903_v0  ;;  %vm86_vm2 = vcmask 261120   ;;  %vm3053_vm3 = vcmask 523264   ;;  %vm3106_vm4 = vcmask 1041409   ;;  %vm3109_vm5 = vcmask 1042434   ;;  %s7909_s29 = smov 120  }
   0x2   :  { %9953 = sst [smem:[#allocation5_spill]] %s9924_s1  ;;  %s9960_s24 = sld [smem:[#allocation4_spill]]  ;;  %6897 = vmatprep.mubr.msk.f32.mxu1 %vm7904_vm0, %v7905_v8  ;;  %6890 = vmatprep.mubr.msk.f32.mxu0 %vm7904_vm0, %v7905_v8  ;;  %vm3112_vm6 = vcmask 1043459   ;;  %vm3115_vm7 = vcmask 1044484   ;;  %vm3118_vm8 = vcmask 1045509   ;;  %vm3121_vm9 = vcmask 1046534  }
   0x3   :  { %9954 = sst [smem:[#allocation6_spill]] %s9925_s0  ;;  %s9961_s0 = sld [smem:[#allocation5_spill]]  ;;  %vm3124_vm10 = vcmask 1047559   ;;  %vm3140_vm11 = vcmask 785408   ;;  %vm3222_vm12 = vcmask 58368   ;;  %vm3230_vm13 = vcmask 60418  }
   0x4   :  { %9955 = sst [smem:[#allocation7_spill]] %s9926_s3  ;;  %s9962_s30 = sld [smem:[#allocation6_spill]]  ;;  %vm3238_vm14 = vcmask 62468   ;;  %vm3246_vm15 = vcmask 64518  }
   0x5   :  { %9956 = sst [smem:[#allocation8_spill]] %s9927_s4  ;;  %s7906_s1 = smov 64  }
   0x6   :  { %9957 = sst [smem:[#allocation9_spill]] %s9928_s7  ;;  %s9963_s7 = sld [smem:[#allocation7_spill]] }
   0x7   :  { %9958 = sst [smem:[#allocation10_spill]] %s9929_s5  ;;  %s9964_s25 = sld [smem:[#allocation8_spill]] }
   0x8   :  { %9959 = sst [smem:[#allocation11_spill]] %s9930_s8  ;;  %v80_v1 = vld [vmem:[%s9960_s24] sm:$0xff]  ;;  %v81_v2 = vld [vmem:[%s9960_s24 + $0x8] sm:$0xff]  ;;  %v82_v6 = vld [vmem:[%s9960_s24 + $0x10] sm:$0xff] }
   0x9   :  { %v78_v3 = vld [vmem:[%s9961_s0] sm:$0xff]  ;;  %v8043_v4 = vpack.c.bf16 %v81_v2, %v80_v1  ;;  %v79_v5 = vld [vmem:[%s9961_s0 + $0x8] sm:$0xff]  ;;  %v83_v7 = vld [vmem:[%s9960_s24 + $0x18] sm:$0xff]  ;;  %s9966_s0 = sld [smem:[#allocation10_spill]]  ;;  %s9967_s8 = sld [smem:[#allocation11_spill]] }
   0xa   :  { %v8058_v9 = vpack.c.bf16 %v79_v5, %v78_v3  ;;  %v8061_v10 = vpack.c.bf16 %v83_v7, %v82_v6  ;;  %v85_v11 = vld [vmem:[%s9962_s30] sm:$0x3]  ;;  %v6284_v29 = vld [vmem:[%s9962_s30 + $0x2] sm:$0x3]  ;;  %v6288_v50 = vld [vmem:[%s9962_s30 + $0x4] sm:$0x3] }
   0xb   :  { %7288 = vmatpush3.bf16.msra.mxu0 %v8043_v4 }
   0xc   :  { %7289 = vmatprep.subr.bf16.mxu0 %v7903_v0  ;;  %7294 = vmatpush3.bf16.msra.mxu1 %v8058_v9  ;;  %v8086_v14 = vld [vmem:[%s9963_s7] ss:$0 sm:$0xff] }
   0xd   :  { %7295 = vmatprep.subr.bf16.mxu1 %v7903_v0 }
   0xf   :  { %7291 = vmatpush3.bf16.msra.mxu0 %v8061_v10  ;;  %6898 = vmatmul.mubr.msk.f32.vlgmr.msra.gmra.mrb[0].mxu1 %vm160_vm1, %v85_v11 }
  0x10   :  { %7297 = vmatpush3.bf16.msra.mxu1 %v8043_v4  ;;  %7301 = vmatprep.subr.bf16.mxu0 %v7903_v0 }
  0x11   :  { %7298 = vmatprep.subr.bf16.mxu1 %v7903_v0  ;;  %6908 = vmatprep.mubr.msk.f32.mxu1 %vm7904_vm0, %v7905_v8 }
  0x12   :  { %6891 = vmatmul.mubr.f32.vlgmr.msra.gmra.mrb[0].mxu0 %v7905_v8 }
  0x13   :  { %7303 = vmatpush3.bf16.msra.mxu0 %v8058_v9  ;;  %6915 = vmatprep.mubr.msk.f32.mxu0 %vm7904_vm0, %v7905_v8 }
  0x14   :  { %7300 = vmatpush3.bf16.msra.mxu1 %v8061_v10  ;;  %7304 = vmatprep.subr.bf16.mxu0 %v7903_v0 }
  0x15   :  { %7310 = vmatprep.subr.bf16.mxu1 %v7903_v0 }
  0x16   :  { %6916 = vmatmul.mubr.msk.f32.vlgmr.msra.gmra.mrb[2].mxu0 %vm160_vm1, %v6284_v29 }
  0x17   :  { %7306 = vmatpush3.bf16.msra.mxu0 %v8043_v4  ;;  %6926 = vmatprep.mubr.msk.f32.mxu0 %vm7904_vm0, %v7905_v8 }
  0x18   :  { %7307 = vmatprep.subr.bf16.mxu0 %v7903_v0 }
  0x1b   :  { %7309 = vmatpush3.bf16.msra.mxu0 %v8061_v10 }
  0x1c   :  { %7319 = vmatprep.subr.bf16.mxu0 %v7903_v0 }
  0xe2   :  { %v230_v12 = vpop.f32.mrb[0].mxu1 }
  0xe3   :  { %v6899_v13 = vpop.f32.mrb[1].mxu1 }
  0xe5   :  { %v156_v15 = vpop.f32.mrb[0].mxu0 }
  0xe6   :  { %v231_v16 = vadd.f32 %v230_v12, %v156_v15  ;;  %v6892_v17 = vpop.f32.mrb[1].mxu0  ;;  %v6292_v12 = vld [vmem:[%s9962_s30 + $0x6] sm:$0x3] }
  0xe8   :  { %v240_v18 = vadd.f32 %v8086_v14, %v231_v16 }
  0xe9   :  { %v411_v33 = vpop.f32.mrb[2].mxu0 }
  0xea   :  { %7746 = vtanh.f32 %v240_v18  ;;  %v6283_v20 = vmul.f32 -1.442695, %v240_v18  ;;  %v6917_v34 = vpop.f32.mrb[3].mxu0 }
  0xeb   :  { %v6296_v34 = vld [vmem:[%s9962_s30 + $0x8] sm:$0x3] }
  0xec   :  { %7748 = vpow2.f32 %v6283_v20 }
  0xf4   :  { %v7747_v19 = vpop.eup %7746 }
  0xf5   :  { %250 = vrot.lane.b32.xlu0 %v7747_v19, %s7906_s1 }
  0xf6   :  { %v7749_v21 = vpop.eup %7748 }
  0xf7   :  { %v244_v22 = vadd.f32 1.0, %v7749_v21 }
  0xf9   :  { %7750 = vrcp.f32 %v244_v22 }
 0x103   :  { %v7751_v23 = vpop.eup %7750 }
 0x104   :  { %v248_v26 = vmul.f32 0.0, %v7751_v23 }
 0x167   :  { %v251_v24 = vpop.permute.xlu0 %250 }
 0x168   :  { %v253_v25 = vmul.f32 %v7751_v23, %v251_v24 }
 0x16a   :  { %255 = vrot.lane.b32.xlu0 %v253_v25, %s7907_s26 }
 0x1dc   :  { %v256_v27 = vpop.permute.xlu0 %255 }
 0x1dd   :  { %v258_v28 = vadd.f32 %v256_v27, %v248_v26 }
 0x1df   :  { %7752 = vtanh.f32 %v258_v28 }
 0x1e9   :  { %v7753_v30 = vpop.eup %7752 }
 0x1ea   :  { %261 = vrot.lane.b32.xlu1 %v7753_v30, %s7906_s1 }
 0x25c   :  { %v262_v31 = vpop.permute.xlu1 %261 }
 0x25d   :  { %v264_v32 = vmul.f32 %v7751_v23, %v262_v31 }
 0x25f   :  { %268 = vrot.lane.b32.xlu1 %v264_v32, %s7907_s26 }
 0x2d1   :  { %v8103_v35 = vpop.permute.xlu1 %268 }
 0x2d2   :  { %6909 = vmatmul.mubr.msk.f32.vlgmr.msra.gmra.mrb[2].mxu1 %vm86_vm2, %v8103_v35 }
 0x2d3   :  { %7312 = vmatpush3.bf16.msra.mxu1 %v8058_v9  ;;  %6933 = vmatprep.mubr.msk.f32.mxu1 %vm7904_vm0, %v7905_v8 }
 0x2d4   :  { %7313 = vmatprep.subr.bf16.mxu1 %v7903_v0 }
 0x2d6   :  { %6934 = vmatmul.mubr.msk.f32.vlgmr.msra.gmra.mrb[4].mxu1 %vm160_vm1, %v6288_v50 }
 0x2d7   :  { %7315 = vmatpush3.bf16.msra.mxu1 %v8043_v4  ;;  %6944 = vmatprep.mubr.msk.f32.mxu1 %vm7904_vm0, %v7905_v8 }
 0x2d8   :  { %7316 = vmatprep.subr.bf16.mxu1 %v7903_v0 }
 0x2db   :  { %7318 = vmatpush3.bf16.msra.mxu1 %v8061_v10 }
 0x2dc   :  { %7328 = vmatprep.subr.bf16.mxu1 %v7903_v0 }
 0x3a5   :  { %v338_v36 = vpop.f32.mrb[2].mxu1 }
 0x3a6   :  { %v412_v37 = vadd.f32 %v411_v33, %v338_v36  ;;  %v6910_v38 = vpop.f32.mrb[3].mxu1 }
 0x3a8   :  { %v415_v39 = vadd.f32 %v8086_v14, %v412_v37 }
 0x3a9   :  { %v586_v54 = vpop.f32.mrb[4].mxu1 }
 0x3aa   :  { %7754 = vtanh.f32 %v415_v39  ;;  %v6287_v41 = vmul.f32 -1.442695, %v415_v39  ;;  %v6935_v55 = vpop.f32.mrb[5].mxu1 }
 0x3ac   :  { %7756 = vpow2.f32 %v6287_v41 }
 0x3b4   :  { %v7755_v40 = vpop.eup %7754 }
 0x3b5   :  { %425 = vrot.lane.b32.xlu0 %v7755_v40, %s7906_s1 }
 0x3b6   :  { %v7757_v42 = vpop.eup %7756 }
 0x3b7   :  { %v419_v43 = vadd.f32 1.0, %v7757_v42 }
 0x3b9   :  { %7758 = vrcp.f32 %v419_v43 }
 0x3c3   :  { %v7759_v44 = vpop.eup %7758 }
 0x3c4   :  { %v423_v47 = vmul.f32 %v7759_v44, %v258_v28 }
 0x427   :  { %v426_v45 = vpop.permute.xlu0 %425 }
 0x428   :  { %v428_v46 = vmul.f32 %v7759_v44, %v426_v45 }
 0x42a   :  { %430 = vrot.lane.b32.xlu1 %v428_v46, %s7907_s26 }
 0x49c   :  { %v431_v48 = vpop.permute.xlu1 %430 }
 0x49d   :  { %v433_v49 = vadd.f32 %v431_v48, %v423_v47 }
 0x49f   :  { %7760 = vtanh.f32 %v433_v49 }
 0x4a9   :  { %v7761_v51 = vpop.eup %7760 }
 0x4aa   :  { %436 = vrot.lane.b32.xlu0 %v7761_v51, %s7906_s1 }
 0x51c   :  { %v437_v52 = vpop.permute.xlu0 %436 }
 0x51d   :  { %v439_v53 = vmul.f32 %v7759_v44, %v437_v52 }
 0x51f   :  { %443 = vrot.lane.b32.xlu1 %v439_v53, %s7907_s26 }
 0x591   :  { %v8126_v56 = vpop.permute.xlu1 %443 }
 0x592   :  { %6927 = vmatmul.mubr.msk.f32.vlgmr.msra.gmra.mrb[4].mxu0 %vm86_vm2, %v8126_v56 }
 0x593   :  { %7321 = vmatpush3.bf16.msra.mxu0 %v8058_v9  ;;  %6951 = vmatprep.mubr.msk.f32.mxu0 %vm7904_vm0, %v7905_v8 }
 0x594   :  { %7322 = vmatprep.subr.bf16.mxu0 %v7903_v0 }
 0x596   :  { %6952 = vmatmul.mubr.msk.f32.vlgmr.msra.gmra.mrb[6].mxu0 %vm160_vm1, %v6292_v12 }
 0x597   :  { %7324 = vmatpush3.bf16.msra.mxu0 %v8043_v4  ;;  %6962 = vmatprep.mubr.msk.f32.mxu0 %vm7904_vm0, %v7905_v8 }
 0x598   :  { %7325 = vmatprep.subr.bf16.mxu0 %v7903_v0 }
 0x59b   :  { %7327 = vmatpush3.bf16.msra.mxu0 %v8061_v10 }
 0x59c   :  { %7337 = vmatprep.subr.bf16.mxu0 %v7903_v0 }
 0x665   :  { %v513_v57 = vpop.f32.mrb[4].mxu0 }
 0x666   :  { %v587_v58 = vadd.f32 %v586_v54, %v513_v57  ;;  %v6928_v59 = vpop.f32.mrb[5].mxu0  ;;  %v6300_v57 = vld [vmem:[%s9962_s30 + $0xa] sm:$0x3] }
 0x668   :  { %v590_v60 = vadd.f32 %v8086_v14, %v587_v58 }
 0x669   :  { %v761_v17 = vpop.f32.mrb[6].mxu0 }
 0x66a   :  { %7762 = vtanh.f32 %v590_v60  ;;  %v6291_v62 = vmul.f32 -1.442695, %v590_v60  ;;  %v6953_v18 = vpop.f32.mrb[7].mxu0 }
 0x66c   :  { %7764 = vpow2.f32 %v6291_v62 }
 0x674   :  { %v7763_v61 = vpop.eup %7762 }
 0x675   :  { %600 = vrot.lane.b32.xlu0 %v7763_v61, %s7906_s1 }
 0x676   :  { %v7765_v63 = vpop.eup %7764 }
 0x677   :  { %v594_v1 = vadd.f32 1.0, %v7765_v63 }
 0x679   :  { %7766 = vrcp.f32 %v594_v1 }
 0x683   :  { %v7767_v2 = vpop.eup %7766 }
 0x684   :  { %v598_v6 = vmul.f32 %v7767_v2, %v433_v49 }
 0x6e7   :  { %v601_v3 = vpop.permute.xlu0 %600 }
 0x6e8   :  { %v603_v5 = vmul.f32 %v7767_v2, %v601_v3 }
 0x6ea   :  { %605 = vrot.lane.b32.xlu1 %v603_v5, %s7907_s26 }
 0x75c   :  { %v606_v7 = vpop.permute.xlu1 %605 }
 0x75d   :  { %v608_v11 = vadd.f32 %v606_v7, %v598_v6 }
 0x75f   :  { %7768 = vtanh.f32 %v608_v11 }
 0x769   :  { %v7769_v13 = vpop.eup %7768 }
 0x76a   :  { %611 = vrot.lane.b32.xlu0 %v7769_v13, %s7906_s1 }
 0x7dc   :  { %v612_v15 = vpop.permute.xlu0 %611 }
 0x7dd   :  { %v614_v16 = vmul.f32 %v7767_v2, %v612_v15 }
 0x7df   :  { %618 = vrot.lane.b32.xlu1 %v614_v16, %s7907_s26 }
 0x851   :  { %v8149_v19 = vpop.permute.xlu1 %618 }
 0x852   :  { %6945 = vmatmul.mubr.msk.f32.vlgmr.msra.gmra.mrb[6].mxu1 %vm86_vm2, %v8149_v19 }
 0x853   :  { %7330 = vmatpush3.bf16.msra.mxu1 %v8058_v9  ;;  %6969 = vmatprep.mubr.msk.f32.mxu1 %vm7904_vm0, %v7905_v8 }
 0x854   :  { %7331 = vmatprep.subr.bf16.mxu1 %v7903_v0 }
 0x856   :  { %6970 = vmatmul.mubr.msk.f32.vlgmr.msra.gmra.mrb[8].mxu1 %vm160_vm1, %v6296_v34 }
 0x857   :  { %7333 = vmatpush3.bf16.msra.mxu1 %v8043_v4  ;;  %6980 = vmatprep.mubr.msk.f32.mxu1 %vm7904_vm0, %v7905_v8 }
 0x858   :  { %7334 = vmatprep.subr.bf16.mxu1 %v7903_v0 }
 0x85b   :  { %7336 = vmatpush3.bf16.msra.mxu1 %v8061_v10 }
 0x85c   :  { %7346 = vmatprep.subr.bf16.mxu1 %v7903_v0 }
 0x925   :  { %v688_v20 = vpop.f32.mrb[6].mxu1 }
 0x926   :  { %v762_v21 = vadd.f32 %v761_v17, %v688_v20  ;;  %v6946_v22 = vpop.f32.mrb[7].mxu1 }
 0x928   :  { %v765_v23 = vadd.f32 %v8086_v14, %v762_v21  ;;  %v6304_v21 = vld [vmem:[%s9962_s30 + $0xc] sm:$0x3] }
 0x929   :  { %v936_v39 = vpop.f32.mrb[8].mxu1 }
 0x92a   :  { %7770 = vtanh.f32 %v765_v23  ;;  %v6295_v25 = vmul.f32 -1.442695, %v765_v23  ;;  %v6971_v40 = vpop.f32.mrb[9].mxu1 }
 0x92c   :  { %7772 = vpow2.f32 %v6295_v25 }
 0x934   :  { %v7771_v24 = vpop.eup %7770 }
 0x935   :  { %775 = vrot.lane.b32.xlu0 %v7771_v24, %s7906_s1 }
 0x936   :  { %v7773_v26 = vpop.eup %7772 }
 0x937   :  { %v769_v27 = vadd.f32 1.0, %v7773_v26 }
 0x939   :  { %7774 = vrcp.f32 %v769_v27 }
 0x943   :  { %v7775_v28 = vpop.eup %7774 }
 0x944   :  { %v773_v31 = vmul.f32 %v7775_v28, %v608_v11 }
 0x9a7   :  { %v776_v29 = vpop.permute.xlu0 %775 }
 0x9a8   :  { %v778_v30 = vmul.f32 %v7775_v28, %v776_v29 }
 0x9aa   :  { %780 = vrot.lane.b32.xlu1 %v778_v30, %s7907_s26 }
 0xa1c   :  { %v781_v32 = vpop.permute.xlu1 %780 }
 0xa1d   :  { %v783_v33 = vadd.f32 %v781_v32, %v773_v31 }
 0xa1f   :  { %7776 = vtanh.f32 %v783_v33 }
 0xa29   :  { %v7777_v36 = vpop.eup %7776 }
 0xa2a   :  { %786 = vrot.lane.b32.xlu0 %v7777_v36, %s7906_s1 }
 0xa9c   :  { %v787_v37 = vpop.permute.xlu0 %786 }
 0xa9d   :  { %v789_v38 = vmul.f32 %v7775_v28, %v787_v37 }
 0xa9f   :  { %793 = vrot.lane.b32.xlu1 %v789_v38, %s7907_s26 }
 0xb11   :  { %v8172_v41 = vpop.permute.xlu1 %793 }
 0xb12   :  { %6963 = vmatmul.mubr.msk.f32.vlgmr.msra.gmra.mrb[8].mxu0 %vm86_vm2, %v8172_v41 }
 0xb13   :  { %7339 = vmatpush3.bf16.msra.mxu0 %v8058_v9  ;;  %6987 = vmatprep.mubr.msk.f32.mxu0 %vm7904_vm0, %v7905_v8 }
 0xb14   :  { %7340 = vmatprep.subr.bf16.mxu0 %v7903_v0 }
 0xb16   :  { %6988 = vmatmul.mubr.msk.f32.vlgmr.msra.gmra.mrb[10].mxu0 %vm160_vm1, %v6300_v57 }
 0xb17   :  { %7342 = vmatpush3.bf16.msra.mxu0 %v8043_v4  ;;  %6998 = vmatprep.mubr.msk.f32.mxu0 %vm7904_vm0, %v7905_v8 }
 0xb18   :  { %7343 = vmatprep.subr.bf16.mxu0 %v7903_v0 }
 0xb1b   :  { %7345 = vmatpush3.bf16.msra.mxu0 %v8061_v10 }
 0xb1c   :  { %7355 = vmatprep.subr.bf16.mxu0 %v7903_v0 }
 0xbe5   :  { %v863_v42 = vpop.f32.mrb[8].mxu0 }
 0xbe6   :  { %v937_v43 = vadd.f32 %v936_v39, %v863_v42  ;;  %v6964_v44 = vpop.f32.mrb[9].mxu0 }
 0xbe7   :  { %v6308_v44 = vld [vmem:[%s9962_s30 + $0xe] sm:$0x3] }
 0xbe8   :  { %v940_v45 = vadd.f32 %v8086_v14, %v937_v43 }
 0xbe9   :  { %v1111_v61 = vpop.f32.mrb[10].mxu0 }
 0xbea   :  { %7778 = vtanh.f32 %v940_v45  ;;  %v6299_v47 = vmul.f32 -1.442695, %v940_v45  ;;  %v6989_v62 = vpop.f32.mrb[11].mxu0 }
 0xbec   :  { %7780 = vpow2.f32 %v6299_v47 }
 0xbf4   :  { %v7779_v46 = vpop.eup %7778 }
 0xbf5   :  { %950 = vrot.lane.b32.xlu0 %v7779_v46, %s7906_s1 }
 0xbf6   :  { %v7781_v48 = vpop.eup %7780 }
 0xbf7   :  { %v944_v49 = vadd.f32 1.0, %v7781_v48 }
 0xbf9   :  { %7782 = vrcp.f32 %v944_v49 }
 0xc03   :  { %v7783_v50 = vpop.eup %7782 }
 0xc04   :  { %v948_v53 = vmul.f32 %v7783_v50, %v783_v33 }
 0xc67   :  { %v951_v51 = vpop.permute.xlu0 %950 }
 0xc68   :  { %v953_v52 = vmul.f32 %v7783_v50, %v951_v51 }
 0xc6a   :  { %955 = vrot.lane.b32.xlu1 %v953_v52, %s7907_s26 }
 0xcdc   :  { %v956_v54 = vpop.permute.xlu1 %955 }
 0xcdd   :  { %v958_v55 = vadd.f32 %v956_v54, %v948_v53 }
 0xcdf   :  { %7784 = vtanh.f32 %v958_v55 }
 0xce9   :  { %v7785_v58 = vpop.eup %7784 }
 0xcea   :  { %961 = vrot.lane.b32.xlu0 %v7785_v58, %s7906_s1 }
 0xd5c   :  { %v962_v59 = vpop.permute.xlu0 %961 }
 0xd5d   :  { %v964_v60 = vmul.f32 %v7783_v50, %v962_v59 }
 0xd5f   :  { %968 = vrot.lane.b32.xlu1 %v964_v60, %s7907_s26 }
 0xdd1   :  { %v8195_v63 = vpop.permute.xlu1 %968 }
 0xdd2   :  { %6981 = vmatmul.mubr.msk.f32.vlgmr.msra.gmra.mrb[10].mxu1 %vm86_vm2, %v8195_v63 }
 0xdd3   :  { %7348 = vmatpush3.bf16.msra.mxu1 %v8058_v9  ;;  %7005 = vmatprep.mubr.msk.f32.mxu1 %vm7904_vm0, %v7905_v8 }
 0xdd4   :  { %7349 = vmatprep.subr.bf16.mxu1 %v7903_v0 }
 0xdd6   :  { %7006 = vmatmul.mubr.msk.f32.vlgmr.msra.gmra.mrb[12].mxu1 %vm160_vm1, %v6304_v21 }
 0xdd7   :  { %7351 = vmatpush3.bf16.msra.mxu1 %v8043_v4  ;;  %7016 = vmatprep.mubr.msk.f32.mxu1 %vm7904_vm0, %v7905_v8 }
 0xdd8   :  { %7352 = vmatprep.subr.bf16.mxu1 %v7903_v0 }
 0xddb   :  { %7354 = vmatpush3.bf16.msra.mxu1 %v8061_v10 }
 0xddc   :  { %7364 = vmatprep.subr.bf16.mxu1 %v7903_v0 }
 0xea5   :  { %v1038_v1 = vpop.f32.mrb[10].mxu1 }
 0xea6   :  { %v1112_v2 = vadd.f32 %v1111_v61, %v1038_v1  ;;  %v6982_v3 = vpop.f32.mrb[11].mxu1 }
 0xea8   :  { %v1115_v5 = vadd.f32 %v8086_v14, %v1112_v2 }
 0xea9   :  { %v1286_v25 = vpop.f32.mrb[12].mxu1 }
 0xeaa   :  { %7786 = vtanh.f32 %v1115_v5  ;;  %v6303_v7 = vmul.f32 -1.442695, %v1115_v5  ;;  %v7007_v26 = vpop.f32.mrb[13].mxu1  ;;  %v6312_v5 = vld [vmem:[%s9962_s30 + $0x10] sm:$0x3] }
 0xeac   :  { %7788 = vpow2.f32 %v6303_v7 }
 0xeb4   :  { %v7787_v6 = vpop.eup %7786 }
 0xeb5   :  { %1125 = vrot.lane.b32.xlu0 %v7787_v6, %s7906_s1 }
 0xeb6   :  { %v7789_v11 = vpop.eup %7788 }
 0xeb7   :  { %v1119_v12 = vadd.f32 1.0, %v7789_v11 }
 0xeb9   :  { %7790 = vrcp.f32 %v1119_v12 }
 0xec3   :  { %v7791_v13 = vpop.eup %7790 }
 0xec4   :  { %v1123_v17 = vmul.f32 %v7791_v13, %v958_v55 }
 0xf27   :  { %v1126_v15 = vpop.permute.xlu0 %1125 }
 0xf28   :  { %v1128_v16 = vmul.f32 %v7791_v13, %v1126_v15 }
 0xf2a   :  { %1130 = vrot.lane.b32.xlu1 %v1128_v16, %s7907_s26 }
 0xf9c   :  { %v1131_v18 = vpop.permute.xlu1 %1130 }
 0xf9d   :  { %v1133_v20 = vadd.f32 %v1131_v18, %v1123_v17 }
 0xf9f   :  { %7792 = vtanh.f32 %v1133_v20 }
 0xfa9   :  { %v7793_v22 = vpop.eup %7792 }
 0xfaa   :  { %1136 = vrot.lane.b32.xlu0 %v7793_v22, %s7906_s1 }
0x101c   :  { %v1137_v23 = vpop.permute.xlu0 %1136 }
0x101d   :  { %v1139_v24 = vmul.f32 %v7791_v13, %v1137_v23 }
0x101f   :  { %1143 = vrot.lane.b32.xlu1 %v1139_v24, %s7907_s26 }
0x1091   :  { %v8218_v27 = vpop.permute.xlu1 %1143 }
0x1092   :  { %6999 = vmatmul.mubr.msk.f32.vlgmr.msra.gmra.mrb[12].mxu0 %vm86_vm2, %v8218_v27 }
0x1093   :  { %7357 = vmatpush3.bf16.msra.mxu0 %v8058_v9  ;;  %7023 = vmatprep.mubr.msk.f32.mxu0 %vm7904_vm0, %v7905_v8 }
0x1094   :  { %7358 = vmatprep.subr.bf16.mxu0 %v7903_v0 }
0x1096   :  { %7024 = vmatmul.mubr.msk.f32.vlgmr.msra.gmra.mrb[14].mxu0 %vm160_vm1, %v6308_v44 }
0x1097   :  { %7360 = vmatpush3.bf16.msra.mxu0 %v8043_v4  ;;  %7034 = vmatprep.mubr.msk.f32.mxu0 %vm7904_vm0, %v7905_v8 }
0x1098   :  { %7361 = vmatprep.subr.bf16.mxu0 %v7903_v0 }
0x109b   :  { %7363 = vmatpush3.bf16.msra.mxu0 %v8061_v10 }
0x109c   :  { %7373 = vmatprep.subr.bf16.mxu0 %v7903_v0 }
0x1165   :  { %v1213_v28 = vpop.f32.mrb[12].mxu0 }
0x1166   :  { %v1287_v29 = vadd.f32 %v1286_v25, %v1213_v28  ;;  %v7000_v30 = vpop.f32.mrb[13].mxu0 }
0x1168   :  { %v1290_v31 = vadd.f32 %v8086_v14, %v1287_v29 }
0x1169   :  { %v1461_v48 = vpop.f32.mrb[14].mxu0 }
0x116a   :  { %7794 = vtanh.f32 %v1290_v31  ;;  %v6307_v33 = vmul.f32 -1.442695, %v1290_v31  ;;  %v7025_v49 = vpop.f32.mrb[15].mxu0 }
0x116c   :  { %7796 = vpow2.f32 %v6307_v33 }
0x1174   :  { %v7795_v32 = vpop.eup %7794 }
0x1175   :  { %1300 = vrot.lane.b32.xlu0 %v7795_v32, %s7906_s1  ;;  %v6316_v32 = vld [vmem:[%s9962_s30 + $0x12] sm:$0x3] }
0x1176   :  { %v7797_v34 = vpop.eup %7796 }
0x1177   :  { %v1294_v36 = vadd.f32 1.0, %v7797_v34 }
0x1179   :  { %7798 = vrcp.f32 %v1294_v36 }
0x1183   :  { %v7799_v37 = vpop.eup %7798 }
0x1184   :  { %v1298_v40 = vmul.f32 %v7799_v37, %v1133_v20 }
0x11e7   :  { %v1301_v38 = vpop.permute.xlu0 %1300 }
0x11e8   :  { %v1303_v39 = vmul.f32 %v7799_v37, %v1301_v38 }
0x11ea   :  { %1305 = vrot.lane.b32.xlu1 %v1303_v39, %s7907_s26 }
0x125c   :  { %v1306_v42 = vpop.permute.xlu1 %1305 }
0x125d   :  { %v1308_v43 = vadd.f32 %v1306_v42, %v1298_v40 }
0x125f   :  { %7800 = vtanh.f32 %v1308_v43 }
0x1269   :  { %v7801_v45 = vpop.eup %7800 }
0x126a   :  { %1311 = vrot.lane.b32.xlu0 %v7801_v45, %s7906_s1 }
0x12dc   :  { %v1312_v46 = vpop.permute.xlu0 %1311 }
0x12dd   :  { %v1314_v47 = vmul.f32 %v7799_v37, %v1312_v46 }
0x12df   :  { %1318 = vrot.lane.b32.xlu1 %v1314_v47, %s7907_s26 }
0x1351   :  { %v8241_v50 = vpop.permute.xlu1 %1318 }
0x1352   :  { %7017 = vmatmul.mubr.msk.f32.vlgmr.msra.gmra.mrb[14].mxu1 %vm86_vm2, %v8241_v50 }
0x1353   :  { %7366 = vmatpush3.bf16.msra.mxu1 %v8058_v9  ;;  %7041 = vmatprep.mubr.msk.f32.mxu1 %vm7904_vm0, %v7905_v8 }
0x1354   :  { %7367 = vmatprep.subr.bf16.mxu1 %v7903_v0 }
0x1356   :  { %7042 = vmatmul.mubr.msk.f32.vlgmr.msra.gmra.mrb[16].mxu1 %vm160_vm1, %v6312_v5 }
0x1357   :  { %7369 = vmatpush3.bf16.msra.mxu1 %v8043_v4  ;;  %7052 = vmatprep.mubr.msk.f32.mxu1 %vm7904_vm0, %v7905_v8 }
0x1358   :  { %7370 = vmatprep.subr.bf16.mxu1 %v7903_v0 }
0x135b   :  { %7372 = vmatpush3.bf16.msra.mxu1 %v8061_v10 }
0x135c   :  { %7382 = vmatprep.subr.bf16.mxu1 %v7903_v0 }
0x1425   :  { %v1388_v51 = vpop.f32.mrb[14].mxu1 }
0x1426   :  { %v1462_v52 = vadd.f32 %v1461_v48, %v1388_v51  ;;  %v7018_v53 = vpop.f32.mrb[15].mxu1 }
0x1428   :  { %v1465_v54 = vadd.f32 %v8086_v14, %v1462_v52 }
0x1429   :  { %v1636_v12 = vpop.f32.mrb[16].mxu1 }
0x142a   :  { %7802 = vtanh.f32 %v1465_v54  ;;  %v6311_v57 = vmul.f32 -1.442695, %v1465_v54  ;;  %v7043_v13 = vpop.f32.mrb[17].mxu1 }
0x142c   :  { %7804 = vpow2.f32 %v6311_v57  ;;  %v6320_v57 = vld [vmem:[%s9962_s30 + $0x14] sm:$0x3] }
0x1434   :  { %v7803_v55 = vpop.eup %7802 }
0x1435   :  { %1475 = vrot.lane.b32.xlu0 %v7803_v55, %s7906_s1 }
0x1436   :  { %v7805_v58 = vpop.eup %7804 }
0x1437   :  { %v1469_v59 = vadd.f32 1.0, %v7805_v58 }
0x1439   :  { %7806 = vrcp.f32 %v1469_v59 }
0x1443   :  { %v7807_v60 = vpop.eup %7806 }
0x1444   :  { %v1473_v1 = vmul.f32 %v7807_v60, %v1308_v43 }
0x14a7   :  { %v1476_v61 = vpop.permute.xlu0 %1475 }
0x14a8   :  { %v1478_v62 = vmul.f32 %v7807_v60, %v1476_v61 }
0x14aa   :  { %1480 = vrot.lane.b32.xlu1 %v1478_v62, %s7907_s26 }
0x151c   :  { %v1481_v2 = vpop.permute.xlu1 %1480 }
0x151d   :  { %v1483_v3 = vadd.f32 %v1481_v2, %v1473_v1 }
0x151f   :  { %7808 = vtanh.f32 %v1483_v3 }
0x1529   :  { %v7809_v6 = vpop.eup %7808 }
0x152a   :  { %1486 = vrot.lane.b32.xlu0 %v7809_v6, %s7906_s1 }
0x159c   :  { %v1487_v7 = vpop.permute.xlu0 %1486 }
0x159d   :  { %v1489_v11 = vmul.f32 %v7807_v60, %v1487_v7 }
0x159f   :  { %1493 = vrot.lane.b32.xlu1 %v1489_v11, %s7907_s26 }
0x1611   :  { %v8264_v15 = vpop.permute.xlu1 %1493 }
0x1612   :  { %7035 = vmatmul.mubr.msk.f32.vlgmr.msra.gmra.mrb[16].mxu0 %vm86_vm2, %v8264_v15 }
0x1613   :  { %7375 = vmatpush3.bf16.msra.mxu0 %v8058_v9  ;;  %7059 = vmatprep.mubr.msk.f32.mxu0 %vm7904_vm0, %v7905_v8 }
0x1614   :  { %7376 = vmatprep.subr.bf16.mxu0 %v7903_v0 }
0x1616   :  { %7060 = vmatmul.mubr.msk.f32.vlgmr.msra.gmra.mrb[18].mxu0 %vm160_vm1, %v6316_v32 }
0x1617   :  { %7378 = vmatpush3.bf16.msra.mxu0 %v8043_v4  ;;  %7070 = vmatprep.mubr.msk.f32.mxu0 %vm7904_vm0, %v7905_v8 }
0x1618   :  { %7379 = vmatprep.subr.bf16.mxu0 %v7903_v0 }
0x161b   :  { %7381 = vmatpush3.bf16.msra.mxu0 %v8061_v10 }
0x161c   :  { %7391 = vmatprep.subr.bf16.mxu0 %v7903_v0 }
0x16e5   :  { %v1563_v16 = vpop.f32.mrb[16].mxu0 }
0x16e6   :  { %v1637_v17 = vadd.f32 %v1636_v12, %v1563_v16  ;;  %v7036_v18 = vpop.f32.mrb[17].mxu0 }
0x16e8   :  { %v1640_v20 = vadd.f32 %v8086_v14, %v1637_v17 }
0x16e9   :  { %v1811_v37 = vpop.f32.mrb[18].mxu0 }
0x16ea   :  { %7810 = vtanh.f32 %v1640_v20  ;;  %v6315_v22 = vmul.f32 -1.442695, %v1640_v20  ;;  %v7061_v38 = vpop.f32.mrb[19].mxu0 }
0x16ec   :  { %7812 = vpow2.f32 %v6315_v22 }
0x16f4   :  { %v7811_v21 = vpop.eup %7810 }
0x16f5   :  { %1650 = vrot.lane.b32.xlu0 %v7811_v21, %s7906_s1 }
0x16f6   :  { %v7813_v23 = vpop.eup %7812 }
0x16f7   :  { %v1644_v24 = vadd.f32 1.0, %v7813_v23  ;;  %v6324_v23 = vld [vmem:[%s9962_s30 + $0x16] sm:$0x3] }
0x16f9   :  { %7814 = vrcp.f32 %v1644_v24 }
0x1703   :  { %v7815_v25 = vpop.eup %7814 }
0x1704   :  { %v1648_v29 = vmul.f32 %v7815_v25, %v1483_v3 }
0x1767   :  { %v1651_v26 = vpop.permute.xlu0 %1650 }
0x1768   :  { %v1653_v28 = vmul.f32 %v7815_v25, %v1651_v26 }
0x176a   :  { %1655 = vrot.lane.b32.xlu1 %v1653_v28, %s7907_s26 }
0x17dc   :  { %v1656_v30 = vpop.permute.xlu1 %1655 }
0x17dd   :  { %v1658_v31 = vadd.f32 %v1656_v30, %v1648_v29 }
0x17df   :  { %7816 = vtanh.f32 %v1658_v31 }
0x17e9   :  { %v7817_v33 = vpop.eup %7816 }
0x17ea   :  { %1661 = vrot.lane.b32.xlu0 %v7817_v33, %s7906_s1 }
0x185c   :  { %v1662_v34 = vpop.permute.xlu0 %1661 }
0x185d   :  { %v1664_v36 = vmul.f32 %v7815_v25, %v1662_v34 }
0x185f   :  { %1668 = vrot.lane.b32.xlu1 %v1664_v36, %s7907_s26 }
0x18d1   :  { %v8287_v39 = vpop.permute.xlu1 %1668 }
0x18d2   :  { %7053 = vmatmul.mubr.msk.f32.vlgmr.msra.gmra.mrb[18].mxu1 %vm86_vm2, %v8287_v39 }
0x18d3   :  { %7384 = vmatpush3.bf16.msra.mxu1 %v8058_v9  ;;  %7077 = vmatprep.mubr.msk.f32.mxu1 %vm7904_vm0, %v7905_v8 }
0x18d4   :  { %7385 = vmatprep.subr.bf16.mxu1 %v7903_v0 }
0x18d6   :  { %7078 = vmatmul.mubr.msk.f32.vlgmr.msra.gmra.mrb[20].mxu1 %vm160_vm1, %v6320_v57 }
0x18d7   :  { %7387 = vmatpush3.bf16.msra.mxu1 %v8043_v4  ;;  %7088 = vmatprep.mubr.msk.f32.mxu1 %vm7904_vm0, %v7905_v8 }
0x18d8   :  { %7388 = vmatprep.subr.bf16.mxu1 %v7903_v0 }
0x18db   :  { %7390 = vmatpush3.bf16.msra.mxu1 %v8061_v10 }
0x18dc   :  { %7400 = vmatprep.subr.bf16.mxu1 %v7903_v0 }
0x19a5   :  { %v1738_v40 = vpop.f32.mrb[18].mxu1 }
0x19a6   :  { %v1812_v42 = vadd.f32 %v1811_v37, %v1738_v40  ;;  %v7054_v43 = vpop.f32.mrb[19].mxu1 }
0x19a8   :  { %v1815_v44 = vadd.f32 %v8086_v14, %v1812_v42 }
0x19a9   :  { %v1986_v61 = vpop.f32.mrb[20].mxu1 }
0x19aa   :  { %7818 = vtanh.f32 %v1815_v44  ;;  %v6319_v46 = vmul.f32 -1.442695, %v1815_v44  ;;  %v7079_v62 = vpop.f32.mrb[21].mxu1 }
0x19ac   :  { %7820 = vpow2.f32 %v6319_v46 }
0x19b4   :  { %v7819_v45 = vpop.eup %7818 }
0x19b5   :  { %1825 = vrot.lane.b32.xlu0 %v7819_v45, %s7906_s1 }
0x19b6   :  { %v7821_v47 = vpop.eup %7820 }
0x19b7   :  { %v1819_v48 = vadd.f32 1.0, %v7821_v47 }
0x19b9   :  { %7822 = vrcp.f32 %v1819_v48  ;;  %v6328_v48 = vld [vmem:[%s9962_s30 + $0x18] sm:$0x3] }
0x19c3   :  { %v7823_v49 = vpop.eup %7822 }
0x19c4   :  { %v1823_v53 = vmul.f32 %v7823_v49, %v1658_v31 }
0x1a27   :  { %v1826_v51 = vpop.permute.xlu0 %1825 }
0x1a28   :  { %v1828_v52 = vmul.f32 %v7823_v49, %v1826_v51 }
0x1a2a   :  { %1830 = vrot.lane.b32.xlu1 %v1828_v52, %s7907_s26 }
0x1a9c   :  { %v1831_v54 = vpop.permute.xlu1 %1830 }
0x1a9d   :  { %v1833_v55 = vadd.f32 %v1831_v54, %v1823_v53 }
0x1a9f   :  { %7824 = vtanh.f32 %v1833_v55 }
0x1aa9   :  { %v7825_v58 = vpop.eup %7824 }
0x1aaa   :  { %1836 = vrot.lane.b32.xlu0 %v7825_v58, %s7906_s1 }
0x1b1c   :  { %v1837_v59 = vpop.permute.xlu0 %1836 }
0x1b1d   :  { %v1839_v60 = vmul.f32 %v7823_v49, %v1837_v59 }
0x1b1f   :  { %1843 = vrot.lane.b32.xlu1 %v1839_v60, %s7907_s26 }
0x1b91   :  { %v8310_v1 = vpop.permute.xlu1 %1843 }
0x1b92   :  { %7071 = vmatmul.mubr.msk.f32.vlgmr.msra.gmra.mrb[20].mxu0 %vm86_vm2, %v8310_v1 }
0x1b93   :  { %7393 = vmatpush3.bf16.msra.mxu0 %v8058_v9  ;;  %7095 = vmatprep.mubr.msk.f32.mxu0 %vm7904_vm0, %v7905_v8 }
0x1b94   :  { %7394 = vmatprep.subr.bf16.mxu0 %v7903_v0 }
0x1b96   :  { %7096 = vmatmul.mubr.msk.f32.vlgmr.msra.gmra.mrb[22].mxu0 %vm160_vm1, %v6324_v23 }
0x1b97   :  { %7396 = vmatpush3.bf16.msra.mxu0 %v8043_v4  ;;  %7106 = vmatprep.mubr.msk.f32.mxu0 %vm7904_vm0, %v7905_v8 }
0x1b98   :  { %7397 = vmatprep.subr.bf16.mxu0 %v7903_v0 }
0x1b9b   :  { %7399 = vmatpush3.bf16.msra.mxu0 %v8061_v10 }
0x1b9c   :  { %7409 = vmatprep.subr.bf16.mxu0 %v7903_v0 }
0x1c65   :  { %v1913_v2 = vpop.f32.mrb[20].mxu0 }
0x1c66   :  { %v1987_v3 = vadd.f32 %v1986_v61, %v1913_v2  ;;  %v7072_v5 = vpop.f32.mrb[21].mxu0 }
0x1c68   :  { %v1990_v6 = vadd.f32 %v8086_v14, %v1987_v3 }
0x1c69   :  { %v2161_v28 = vpop.f32.mrb[22].mxu0 }
0x1c6a   :  { %7826 = vtanh.f32 %v1990_v6  ;;  %v6323_v11 = vmul.f32 -1.442695, %v1990_v6  ;;  %v7097_v29 = vpop.f32.mrb[23].mxu0 }
0x1c6c   :  { %7828 = vpow2.f32 %v6323_v11 }
0x1c74   :  { %v7827_v7 = vpop.eup %7826 }
0x1c75   :  { %2000 = vrot.lane.b32.xlu0 %v7827_v7, %s7906_s1 }
0x1c76   :  { %v7829_v12 = vpop.eup %7828 }
0x1c77   :  { %v1994_v13 = vadd.f32 1.0, %v7829_v12 }
0x1c79   :  { %7830 = vrcp.f32 %v1994_v13 }
0x1c83   :  { %v7831_v16 = vpop.eup %7830 }
0x1c84   :  { %v1998_v20 = vmul.f32 %v7831_v16, %v1833_v55 }
0x1ce7   :  { %v2001_v17 = vpop.permute.xlu0 %2000 }
0x1ce8   :  { %v2003_v18 = vmul.f32 %v7831_v16, %v2001_v17 }
0x1cea   :  { %2005 = vrot.lane.b32.xlu1 %v2003_v18, %s7907_s26 }
0x1d5c   :  { %v2006_v21 = vpop.permute.xlu1 %2005 }
0x1d5d   :  { %v2008_v22 = vadd.f32 %v2006_v21, %v1998_v20 }
0x1d5f   :  { %7832 = vtanh.f32 %v2008_v22 }
0x1d69   :  { %v7833_v24 = vpop.eup %7832 }
0x1d6a   :  { %2011 = vrot.lane.b32.xlu0 %v7833_v24, %s7906_s1 }
0x1ddc   :  { %v2012_v25 = vpop.permute.xlu0 %2011 }
0x1ddd   :  { %v2014_v26 = vmul.f32 %v7831_v16, %v2012_v25 }
0x1ddf   :  { %2018 = vrot.lane.b32.xlu1 %v2014_v26, %s7907_s26  ;;  %v8390_v26 = vld [vmem:[%s9963_s7] ss:$0 sm:$0xff] }
0x1e51   :  { %v8333_v30 = vpop.permute.xlu1 %2018 }
0x1e52   :  { %7089 = vmatmul.mubr.msk.f32.vlgmr.msra.gmra.mrb[22].mxu1 %vm86_vm2, %v8333_v30 }
0x1e53   :  { %7402 = vmatpush3.bf16.msra.mxu1 %v8058_v9  ;;  %7113 = vmatprep.mubr.msk.f32.mxu1 %vm7904_vm0, %v7905_v8 }
0x1e54   :  { %7403 = vmatprep.subr.bf16.mxu1 %v7903_v0 }
0x1e56   :  { %7114 = vmatmul.mubr.msk.f32.vlgmr.msra.gmra.mrb[24].mxu1 %vm160_vm1, %v6328_v48 }
0x1e57   :  { %7405 = vmatpush3.bf16.msra.mxu1 %v8043_v4  ;;  %7124 = vmatprep.mubr.msk.f32.mxu1 %vm7904_vm0, %v7905_v8 }
0x1e58   :  { %7406 = vmatprep.subr.bf16.mxu1 %v7903_v0 }
0x1e5b   :  { %7408 = vmatpush3.bf16.msra.mxu1 %v8061_v10 }
0x1e5c   :  { %7418 = vmatprep.subr.bf16.mxu1 %v7903_v0 }
0x1f25   :  { %v2088_v31 = vpop.f32.mrb[22].mxu1 }
0x1f26   :  { %v2162_v32 = vadd.f32 %v2161_v28, %v2088_v31  ;;  %v7090_v33 = vpop.f32.mrb[23].mxu1 }
0x1f28   :  { %v2165_v34 = vadd.f32 %v8086_v14, %v2162_v32 }
0x1f29   :  { %v2336_v53 = vpop.f32.mrb[24].mxu1 }
0x1f2a   :  { %7834 = vtanh.f32 %v2165_v34  ;;  %v6327_v37 = vmul.f32 -1.442695, %v2165_v34  ;;  %v7115_v54 = vpop.f32.mrb[25].mxu1 }
0x1f2c   :  { %7836 = vpow2.f32 %v6327_v37 }
0x1f34   :  { %v7835_v36 = vpop.eup %7834 }
0x1f35   :  { %2175 = vrot.lane.b32.xlu0 %v7835_v36, %s7906_s1 }
0x1f36   :  { %v7837_v38 = vpop.eup %7836 }
0x1f37   :  { %v2169_v40 = vadd.f32 1.0, %v7837_v38 }
0x1f39   :  { %7838 = vrcp.f32 %v2169_v40 }
0x1f43   :  { %v7839_v42 = vpop.eup %7838 }
0x1f44   :  { %v2173_v45 = vmul.f32 %v7839_v42, %v2008_v22 }
0x1fa7   :  { %v2176_v43 = vpop.permute.xlu0 %2175 }
0x1fa8   :  { %v2178_v44 = vmul.f32 %v7839_v42, %v2176_v43  ;;  %v6336_v43 = vld [vmem:[%s9962_s30 + $0x1c] sm:$0x3] }
0x1faa   :  { %2180 = vrot.lane.b32.xlu1 %v2178_v44, %s7907_s26 }
0x201c   :  { %v2181_v46 = vpop.permute.xlu1 %2180 }
0x201d   :  { %v2183_v47 = vadd.f32 %v2181_v46, %v2173_v45 }
0x201f   :  { %7840 = vtanh.f32 %v2183_v47 }
0x2029   :  { %v7841_v49 = vpop.eup %7840 }
0x202a   :  { %2186 = vrot.lane.b32.xlu0 %v7841_v49, %s7906_s1 }
0x209c   :  { %v2187_v51 = vpop.permute.xlu0 %2186 }
0x209d   :  { %v2189_v52 = vmul.f32 %v7839_v42, %v2187_v51 }
0x209f   :  { %2193 = vrot.lane.b32.xlu1 %v2189_v52, %s7907_s26 }
0x2111   :  { %v8356_v55 = vpop.permute.xlu1 %2193 }
0x2112   :  { %7107 = vmatmul.mubr.msk.f32.vlgmr.msra.gmra.mrb[24].mxu0 %vm86_vm2, %v8356_v55 }
0x2113   :  { %7411 = vmatpush3.bf16.msra.mxu0 %v8058_v9  ;;  %7131 = vmatprep.mubr.msk.f32.mxu0 %vm7904_vm0, %v7905_v8 }
0x2114   :  { %7412 = vmatprep.subr.bf16.mxu0 %v7903_v0 }
0x21e5   :  { %v2263_v57 = vpop.f32.mrb[24].mxu0 }
0x21e6   :  { %v2337_v58 = vadd.f32 %v2336_v53, %v2263_v57  ;;  %v7108_v59 = vpop.f32.mrb[25].mxu0 }
0x21e8   :  { %v2340_v60 = vadd.f32 %v8086_v14, %v2337_v58  ;;  %v6332_v14 = vld [vmem:[%s9962_s30 + $0x1a] sm:$0x3] }
0x21e9   :  { %7132 = vmatmul.mubr.msk.f32.vlgmr.msra.gmra.mrb[26].mxu0 %vm160_vm1, %v6332_v14 }
0x21ea   :  { %7842 = vtanh.f32 %v2340_v60  ;;  %v6331_v62 = vmul.f32 -1.442695, %v2340_v60  ;;  %7414 = vmatpush3.bf16.msra.mxu0 %v8043_v4  ;;  %7142 = vmatprep.mubr.msk.f32.mxu0 %vm7904_vm0, %v7905_v8 }
0x21eb   :  { %7415 = vmatprep.subr.bf16.mxu0 %v7903_v0 }
0x21ec   :  { %7844 = vpow2.f32 %v6331_v62 }
0x21ee   :  { %7417 = vmatpush3.bf16.msra.mxu0 %v8061_v10 }
0x21ef   :  { %7427 = vmatprep.subr.bf16.mxu0 %v7903_v0 }
0x21f4   :  { %v7843_v61 = vpop.eup %7842 }
0x21f5   :  { %2350 = vrot.lane.b32.xlu0 %v7843_v61, %s7906_s1 }
0x21f6   :  { %v7845_v2 = vpop.eup %7844 }
0x21f7   :  { %v2344_v3 = vadd.f32 1.0, %v7845_v2 }
0x21f9   :  { %7846 = vrcp.f32 %v2344_v3  ;;  %v6340_v3 = vld [vmem:[%s9962_s30 + $0x1e] sm:$0x3] }
0x2203   :  { %v7847_v5 = vpop.eup %7846 }
0x2204   :  { %v2348_v11 = vmul.f32 %v7847_v5, %v2183_v47 }
0x2267   :  { %v2351_v6 = vpop.permute.xlu0 %2350 }
0x2268   :  { %v2353_v7 = vmul.f32 %v7847_v5, %v2351_v6 }
0x226a   :  { %2355 = vrot.lane.b32.xlu1 %v2353_v7, %s7907_s26 }
0x22bc   :  { %v2511_v20 = vpop.f32.mrb[26].mxu0 }
0x22bd   :  { %v7133_v21 = vpop.f32.mrb[27].mxu0 }
0x22dc   :  { %v2356_v12 = vpop.permute.xlu1 %2355 }
0x22dd   :  { %v2358_v13 = vadd.f32 %v2356_v12, %v2348_v11 }
0x22df   :  { %7848 = vtanh.f32 %v2358_v13 }
0x22e9   :  { %v7849_v16 = vpop.eup %7848 }
0x22ea   :  { %2361 = vrot.lane.b32.xlu0 %v7849_v16, %s7906_s1 }
0x235c   :  { %v2362_v17 = vpop.permute.xlu0 %2361 }
0x235d   :  { %v2364_v18 = vmul.f32 %v7847_v5, %v2362_v17 }
0x235f   :  { %2368 = vrot.lane.b32.xlu1 %v2364_v18, %s7907_s26 }
0x23d1   :  { %v8379_v22 = vpop.permute.xlu1 %2368 }
0x23d2   :  { %7125 = vmatmul.mubr.msk.f32.vlgmr.msra.gmra.mrb[26].mxu1 %vm86_vm2, %v8379_v22 }
0x23d3   :  { %7420 = vmatpush3.bf16.msra.mxu1 %v8058_v9  ;;  %7149 = vmatprep.mubr.msk.f32.mxu1 %vm7904_vm0, %v7905_v8 }
0x23d4   :  { %7421 = vmatprep.subr.bf16.mxu1 %v7903_v0 }
0x23d6   :  { %7150 = vmatmul.mubr.msk.f32.vlgmr.msra.gmra.mrb[28].mxu1 %vm160_vm1, %v6336_v43  ;;  %v8479_v43 = vsel %vm160_vm1, %v8218_v27, %v8333_v30 }
0x23d7   :  { %7423 = vmatpush3.bf16.msra.mxu1 %v8043_v4  ;;  %7160 = vmatprep.mubr.msk.f32.mxu1 %vm7904_vm0, %v7905_v8 }
0x23d8   :  { %7424 = vmatprep.subr.bf16.mxu1 %v7903_v0 }
0x23db   :  { %7426 = vmatpush3.bf16.msra.mxu1 %v8061_v10 }
0x24a5   :  { %v2438_v23 = vpop.f32.mrb[26].mxu1 }
0x24a6   :  { %v2512_v24 = vadd.f32 %v2511_v20, %v2438_v23  ;;  %v7126_v25 = vpop.f32.mrb[27].mxu1 }
0x24a8   :  { %v2515_v28 = vadd.f32 %v8390_v26, %v2512_v24 }
0x24a9   :  { %v2686_v47 = vpop.f32.mrb[28].mxu1 }
0x24aa   :  { %7850 = vtanh.f32 %v2515_v28  ;;  %v6335_v31 = vmul.f32 -1.442695, %v2515_v28  ;;  %v7151_v48 = vpop.f32.mrb[29].mxu1 }
0x24ab   :  { %v3075_v48 = vld [vmem:[%s9964_s25 + $0x28] sm:$0xff] }
0x24ac   :  { %7852 = vpow2.f32 %v6335_v31 }
0x24b4   :  { %v7851_v29 = vpop.eup %7850 }
0x24b5   :  { %2525 = vrot.lane.b32.xlu0 %v7851_v29, %s7906_s1 }
0x24b6   :  { %v7853_v32 = vpop.eup %7852 }
0x24b7   :  { %v2519_v33 = vadd.f32 1.0, %v7853_v32 }
0x24b9   :  { %7854 = vrcp.f32 %v2519_v33 }
0x24c3   :  { %v7855_v34 = vpop.eup %7854 }
0x24c4   :  { %v2523_v38 = vmul.f32 %v7855_v34, %v2358_v13 }
0x2527   :  { %v2526_v36 = vpop.permute.xlu0 %2525 }
0x2528   :  { %v2528_v37 = vmul.f32 %v7855_v34, %v2526_v36 }
0x252a   :  { %2530 = vrot.lane.b32.xlu1 %v2528_v37, %s7907_s26  ;;  %v8449_v37 = vsel %vm160_vm1, %v8287_v39, %v8264_v15 }
0x259c   :  { %v2531_v40 = vpop.permute.xlu1 %2530 }
0x259d   :  { %v2533_v42 = vadd.f32 %v2531_v40, %v2523_v38  ;;  %v8458_v38 = vsel %vm160_vm1, %v8333_v30, %v8218_v27  ;;  %v8465_v40 = vsel %vm160_vm1, %v8356_v55, %v8195_v63  ;;  %v8497_v27 = vsel %vm160_vm1, %v8264_v15, %v8287_v39 }
0x259e   :  { %v8520_v15 = vsel %vm160_vm1, %v8195_v63, %v8356_v55  ;;  %v8531_v39 = vsel %vm160_vm1, %v8379_v22, %v8172_v41  ;;  %v3070_v55 = vld [vmem:[%s9964_s25] sm:$0xff] }
0x259f   :  { %7856 = vtanh.f32 %v2533_v42 }
0x25a9   :  { %v7857_v44 = vpop.eup %7856 }
0x25aa   :  { %2536 = vrot.lane.b32.xlu0 %v7857_v44, %s7906_s1  ;;  %v8488_v44 = vsel %vm160_vm1, %v8241_v50, %v8310_v1 }
0x261c   :  { %v2537_v45 = vpop.permute.xlu0 %2536 }
0x261d   :  { %v2539_v46 = vmul.f32 %v7855_v34, %v2537_v45  ;;  %v3073_v45 = vld [vmem:[%s9964_s25 + $0x18] sm:$0xff] }
0x261f   :  { %2543 = vrot.lane.b32.xlu1 %v2539_v46, %s7907_s26 }
0x2691   :  { %v8406_v49 = vpop.permute.xlu1 %2543 }
0x2692   :  { %7143 = vmatmul.mubr.msk.f32.vlgmr.msra.gmra.mrb[28].mxu0 %vm86_vm2, %v8406_v49  ;;  %v8440_v36 = vsel %vm160_vm1, %v8149_v19, %v8406_v49  ;;  %v8540_v63 = vsel %vm160_vm1, %v8406_v49, %v8149_v19 }
0x2693   :  { %7429 = vmatpush3.bf16.msra.mxu0 %v8058_v9  ;;  %7167 = vmatprep.mubr.msk.f32.mxu0 %vm7904_vm0, %v7905_v8 }
0x2696   :  { %7168 = vmatmul.mubr.msk.f32.vlgmr.msra.gmra.mrb[30].mxu0 %vm160_vm1, %v6340_v3 }
0x2765   :  { %v2613_v4 = vpop.f32.mrb[28].mxu0 }
0x2766   :  { %v2687_v10 = vadd.f32 %v2686_v47, %v2613_v4  ;;  %v7144_v51 = vpop.f32.mrb[29].mxu0  ;;  %v3074_v47 = vld [vmem:[%s9964_s25 + $0x20] sm:$0xff] }
0x2767   :  { %v7438_v4 = vpack.c.bf16 %v3075_v48, %v3074_v47 }
0x2768   :  { %v2690_v52 = vadd.f32 %v8390_v26, %v2687_v10  ;;  %v3077_v10 = vld [vmem:[%s9964_s25 + $0x38] sm:$0xff] }
0x2769   :  { %v2861_v11 = vpop.f32.mrb[30].mxu0 }
0x276a   :  { %7858 = vtanh.f32 %v2690_v52  ;;  %v6339_v54 = vmul.f32 -1.442695, %v2690_v52  ;;  %v7169_v12 = vpop.f32.mrb[31].mxu0  ;;  %v3078_v52 = vld [vmem:[%s9964_s25 + $0x40] sm:$0xff] }
0x276c   :  { %7860 = vpow2.f32 %v6339_v54 }
0x2774   :  { %v7859_v53 = vpop.eup %7858 }
0x2775   :  { %2700 = vrot.lane.b32.xlu0 %v7859_v53, %s7906_s1  ;;  %v3079_v53 = vld [vmem:[%s9964_s25 + $0x48] sm:$0xff] }
0x2776   :  { %v7861_v57 = vpop.eup %7860  ;;  %v7446_v54 = vpack.c.bf16 %v3079_v53, %v3078_v52 }
0x2777   :  { %v2694_v58 = vadd.f32 1.0, %v7861_v57  ;;  %v3080_v57 = vld [vmem:[%s9964_s25 + $0x50] sm:$0xff] }
0x2779   :  { %7862 = vrcp.f32 %v2694_v58  ;;  %v3081_v58 = vld [vmem:[%s9964_s25 + $0x58] sm:$0xff] }
0x2783   :  { %v7863_v59 = vpop.eup %7862 }
0x2784   :  { %v2698_v61 = vmul.f32 %v7863_v59, %v2533_v42  ;;  %v8472_v42 = vsel %vm160_vm1, %v8310_v1, %v8241_v50  ;;  %v8509_v1 = vsel %vm160_vm1, %v8172_v41, %v8379_v22  ;;  %v3071_v41 = vld [vmem:[%s9964_s25 + $0x8] sm:$0xff]  ;;  %v3072_v22 = vld [vmem:[%s9964_s25 + $0x10] sm:$0xff] }
0x2785   :  { %v7430_v19 = vpack.c.bf16 %v3071_v41, %v3070_v55  ;;  %v7434_v46 = vpack.c.bf16 %v3073_v45, %v3072_v22 }
0x2787   :  { %7431 = vmatprep.subr.bf16.mxu0 %v7430_v19  ;;  %7455 = vmatprep.subr.bf16.mxu1 %v7430_v19 }
0x2788   :  { %7433 = vmatpush3.bf16.msra.mxu0 %v7430_v19 }
0x2789   :  { %7435 = vmatprep.subr.bf16.mxu0 %v7434_v46 }
0x278c   :  { %7437 = vmatpush3.bf16.msra.mxu0 %v7434_v46 }
0x278d   :  { %7439 = vmatprep.subr.bf16.mxu0 %v7438_v4 }
0x2790   :  { %7441 = vmatpush3.bf16.msra.mxu0 %v7438_v4 }
0x27e7   :  { %v2701_v60 = vpop.permute.xlu0 %2700 }
0x27e8   :  { %v2703_v9 = vmul.f32 %v7863_v59, %v2701_v60 }
0x27ea   :  { %2705 = vrot.lane.b32.xlu1 %v2703_v9, %s7907_s26 }
0x285c   :  { %v2706_v62 = vpop.permute.xlu1 %2705 }
0x285d   :  { %v2708_v2 = vadd.f32 %v2706_v62, %v2698_v61 }
0x285f   :  { %7864 = vtanh.f32 %v2708_v2 }
0x2869   :  { %v7865_v5 = vpop.eup %7864 }
0x286a   :  { %2711 = vrot.lane.b32.xlu0 %v7865_v5, %s7906_s1 }
0x28dc   :  { %v2712_v6 = vpop.permute.xlu0 %2711 }
0x28dd   :  { %v2714_v7 = vmul.f32 %v7863_v59, %v2712_v6  ;;  %v7450_v59 = vpack.c.bf16 %v3081_v58, %v3080_v57 }
0x28df   :  { %2718 = vrot.lane.b32.xlu1 %v2714_v7, %s7907_s26 }
0x2951   :  { %v8422_v13 = vpop.permute.xlu1 %2718 }
0x2952   :  { %7161 = vmatmul.mubr.msk.f32.vlgmr.msra.gmra.mrb[30].mxu1 %vm86_vm2, %v8422_v13  ;;  %v8567_v49 = vsel %vm160_vm1, %v8422_v13, %v8126_v56 }
0x2953   :  { %7457 = vmatpush3.bf16.msra.mxu1 %v7430_v19 }
0x2954   :  { %7459 = vmatprep.subr.bf16.mxu1 %v7434_v46 }
0x2957   :  { %7461 = vmatpush3.bf16.msra.mxu1 %v7434_v46 }
0x2958   :  { %7463 = vmatprep.subr.bf16.mxu1 %v7438_v4 }
0x295b   :  { %7465 = vmatpush3.bf16.msra.mxu1 %v7438_v4 }
0x2a25   :  { %v2788_v14 = vpop.f32.mrb[30].mxu1 }
0x2a26   :  { %v2862_v16 = vadd.f32 %v2861_v11, %v2788_v14  ;;  %v7162_v17 = vpop.f32.mrb[31].mxu1 }
0x2a28   :  { %v2865_v18 = vadd.f32 %v8390_v26, %v2862_v16  ;;  %v8433_v26 = vsel %vm160_vm1, %v8126_v56, %v8422_v13  ;;  %v3076_v56 = vld [vmem:[%s9964_s25 + $0x30] sm:$0xff]  ;;  %s9965_s25 = sld [smem:[#allocation9_spill]] }
0x2a29   :  { %v7442_v51 = vpack.c.bf16 %v3077_v10, %v3076_v56 }
0x2a2a   :  { %7866 = vtanh.f32 %v2865_v18  ;;  %v6343_v21 = vmul.f32 -1.442695, %v2865_v18 }
0x2a2b   :  { %7443 = vmatprep.subr.bf16.mxu0 %v7442_v51  ;;  %7467 = vmatprep.subr.bf16.mxu1 %v7442_v51 }
0x2a2c   :  { %7868 = vpow2.f32 %v6343_v21  ;;  %7445 = vmatpush3.bf16.msra.mxu0 %v7442_v51  ;;  %7469 = vmatpush3.bf16.msra.mxu1 %v7442_v51 }
0x2a2d   :  { %7447 = vmatprep.subr.bf16.mxu0 %v7446_v54  ;;  %7471 = vmatprep.subr.bf16.mxu1 %v7446_v54 }
0x2a30   :  { %7449 = vmatpush3.bf16.msra.mxu0 %v7446_v54  ;;  %7473 = vmatpush3.bf16.msra.mxu1 %v7446_v54 }
0x2a31   :  { %7451 = vmatprep.subr.bf16.mxu0 %v7450_v59  ;;  %7475 = vmatprep.subr.bf16.mxu1 %v7450_v59 }
0x2a34   :  { %v7867_v20 = vpop.eup %7866  ;;  %7453 = vmatpush3.bf16.msra.mxu0 %v7450_v59  ;;  %7477 = vmatpush3.bf16.msra.mxu1 %v7450_v59 }
0x2a35   :  { %2875 = vrot.lane.b32.xlu0 %v7867_v20, %s7906_s1  ;;  %7229 = vmatprep.subr.mxu1 %v7905_v8 }
0x2a36   :  { %v7869_v23 = vpop.eup %7868 }
0x2a37   :  { %v2869_v24 = vadd.f32 1.0, %v7869_v23 }
0x2a39   :  { %7870 = vrcp.f32 %v2869_v24 }
0x2a43   :  { %v7871_v25 = vpop.eup %7870 }
0x2a44   :  { %v2873_v31 = vmul.f32 %v7871_v25, %v2708_v2 }
0x2aa7   :  { %v2876_v28 = vpop.permute.xlu0 %2875 }
0x2aa8   :  { %v2878_v29 = vmul.f32 %v7871_v25, %v2876_v28 }
0x2aaa   :  { %2880 = vrot.lane.b32.xlu1 %v2878_v29, %s7907_s26 }
0x2b1c   :  { %v2881_v32 = vpop.permute.xlu1 %2880 }
0x2b1d   :  { %v2883_v33 = vadd.f32 %v2881_v32, %v2873_v31 }
0x2b1f   :  { %7872 = vtanh.f32 %v2883_v33 }
0x2b29   :  { %v7873_v34 = vpop.eup %7872 }
0x2b2a   :  { %2886 = vrot.lane.b32.xlu0 %v7873_v34, %s7906_s1 }
0x2b2e   :  { %2943 = vrot.lane.b32.xlu0 %v8433_v26, %s7907_s26 }
0x2b32   :  { %2945 = vrot.lane.b32.xlu0 %v8440_v36, %s7907_s26 }
0x2b36   :  { %2991 = vrot.lane.b32.xlu0 %v8440_v36, %s7906_s1 }
0x2b3a   :  { %2957 = vrot.lane.b32.xlu0 %v8449_v37, %s7907_s26 }
0x2b3e   :  { %2989 = vrot.lane.b32.xlu0 %v8433_v26, %s7906_s1 }
0x2b42   :  { %3007 = vrot.lane.b32.xlu0 %v8458_v38, %s7906_s1 }
0x2b46   :  { %2963 = vrot.lane.b32.xlu0 %v8465_v40, %s7907_s26 }
0x2b4a   :  { %3005 = vrot.lane.b32.xlu0 %v8472_v42, %s7906_s1 }
0x2b4e   :  { %2951 = vrot.lane.b32.xlu0 %v8479_v43, %s7907_s26 }
0x2b52   :  { %2997 = vrot.lane.b32.xlu0 %v8479_v43, %s7906_s1 }
0x2b56   :  { %2953 = vrot.lane.b32.xlu0 %v8488_v44, %s7907_s26 }
0x2b5a   :  { %2999 = vrot.lane.b32.xlu0 %v8488_v44, %s7906_s1 }
0x2b5e   :  { %2955 = vrot.lane.b32.xlu0 %v8497_v27, %s7907_s26 }
0x2b62   :  { %3001 = vrot.lane.b32.xlu0 %v8497_v27, %s7906_s1 }
0x2b9c   :  { %v2887_v30 = vpop.permute.xlu0 %2886 }
0x2b9d   :  { %v2889_v50 = vmul.f32 %v7871_v25, %v2887_v30 }
0x2b9f   :  { %2892 = vrot.lane.b32.xlu1 %v2889_v50, %s7907_s26 }
0x2ba0   :  { %v2944_v62 = vpop.permute.xlu0 %2943 }
0x2ba3   :  { %2959 = vrot.lane.b32.xlu1 %v8472_v42, %s7907_s26 }
0x2ba4   :  { %v2946_v2 = vpop.permute.xlu0 %2945 }
0x2ba5   :  { %v3039_v46 = vsel %vm86_vm2, %v8433_v26, %v2946_v2 }
0x2ba7   :  { %2947 = vrot.lane.b32.xlu1 %v8509_v1, %s7907_s26 }
0x2ba8   :  { %v2992_v3 = vpop.permute.xlu0 %2991 }
0x2bab   :  { %2961 = vrot.lane.b32.xlu1 %v8458_v38, %s7907_s26 }
0x2bac   :  { %v2958_v6 = vpop.permute.xlu0 %2957 }
0x2bad   :  { %v3045_v30 = vsel %vm86_vm2, %v8497_v27, %v2958_v6 }
0x2baf   :  { %2993 = vrot.lane.b32.xlu1 %v8509_v1, %s7906_s1 }
0x2bb0   :  { %v8603_v11 = vpop.permute.xlu0 %2989 }
0x2bb3   :  { %2949 = vrot.lane.b32.xlu1 %v8520_v15, %s7907_s26 }
0x2bb4   :  { %v3008_v12 = vpop.permute.xlu0 %3007 }
0x2bb7   :  { %2995 = vrot.lane.b32.xlu1 %v8520_v15, %s7906_s1 }
0x2bb8   :  { %v2964_v14 = vpop.permute.xlu0 %2963 }
0x2bbb   :  { %3009 = vrot.lane.b32.xlu1 %v8465_v40, %s7906_s1 }
0x2bbc   :  { %v3006_v17 = vpop.permute.xlu0 %3005 }
0x2bbd   :  { %v3062_v22 = vsel %vm3053_vm3, %v3045_v30, %v3006_v17 }
0x2bbe   :  { %v3342_v4 = vrot.slane %v3062_v22, 1 }
0x2bbf   :  { %2965 = vrot.lane.b32.xlu1 %v8531_v39, %s7907_s26 }
0x2bc0   :  { %v2952_v20 = vpop.permute.xlu0 %2951 }
0x2bc1   :  { %v3042_v50 = vsel %vm86_vm2, %v8520_v15, %v2952_v20  ;;  %v3048_v15 = vsel %vm86_vm2, %v8458_v38, %v2964_v14 }
0x2bc3   :  { %3011 = vrot.lane.b32.xlu1 %v8531_v39, %s7906_s1 }
0x2bc4   :  { %v2998_v23 = vpop.permute.xlu0 %2997 }
0x2bc7   :  { %2967 = vrot.lane.b32.xlu1 %v8540_v63, %s7907_s26 }
0x2bc8   :  { %v2954_v25 = vpop.permute.xlu0 %2953 }
0x2bcb   :  { %3013 = vrot.lane.b32.xlu1 %v8540_v63, %s7906_s1 }
0x2bcc   :  { %v3000_v29 = vpop.permute.xlu0 %2999 }
0x2bcd   :  { %v8614_v19 = vsel %vm3053_vm3, %v3042_v50, %v3000_v29 }
0x2bce   :  { %v3117_v56 = vrot.slane %v8614_v19, 3 }
0x2bcf   :  { %2969 = vrot.lane.b32.xlu1 %v8567_v49, %s7907_s26 }
0x2bd0   :  { %v2956_v32 = vpop.permute.xlu0 %2955 }
0x2bd1   :  { %v3044_v52 = vsel %vm86_vm2, %v8488_v44, %v2956_v32 }
0x2bd3   :  { %3015 = vrot.lane.b32.xlu1 %v8567_v49, %s7906_s1 }
0x2bd4   :  { %v3002_v55 = vpop.permute.xlu0 %3001 }
0x2c11   :  { %v2893_v60 = vpop.permute.xlu1 %2892 }
0x2c12   :  { %v2924_v9 = vsel %vm160_vm1, %v2893_v60, %v8103_v35  ;;  %v2895_v61 = vsel %vm160_vm1, %v8103_v35, %v2893_v60 }
0x2c13   :  { %2971 = vrot.lane.b32.xlu0 %v2924_v9, %s7907_s26  ;;  %2941 = vrot.lane.b32.xlu1 %v2895_v61, %s7907_s26  ;;  %v3038_v41 = vsel %vm86_vm2, %v2895_v61, %v2944_v62 }
0x2c14   :  { %v3055_v48 = vsel %vm3053_vm3, %v3038_v41, %v2992_v3 }
0x2c15   :  { %v2960_v5 = vpop.permute.xlu1 %2959  ;;  %v3105_v57 = vrot.slane %v3055_v48, 7 }
0x2c16   :  { %v3046_v34 = vsel %vm86_vm2, %v8449_v37, %v2960_v5 }
0x2c17   :  { %3017 = vrot.lane.b32.xlu0 %v2924_v9, %s7906_s1  ;;  %3003 = vrot.lane.b32.xlu1 %v8449_v37, %s7906_s1  ;;  %v3043_v37 = vsel %vm86_vm2, %v8479_v43, %v2954_v25  ;;  %v3063_v27 = vsel %vm3053_vm3, %v3046_v34, %v3008_v12  ;;  %v3336_v43 = vrot.slane %v8614_v19, 4 }
0x2c18   :  { %v8624_v47 = vsel %vm3053_vm3, %v3043_v37, %v3002_v55  ;;  %v3126_v10 = vrot.slane %v3063_v27, 7 }
0x2c19   :  { %v2948_v7 = vpop.permute.xlu1 %2947  ;;  %v3120_v53 = vrot.slane %v8624_v47, 2  ;;  %v3338_v54 = vrot.slane %v8624_v47, 3  ;;  %v3532_v47 = vld [vmem:[%s9965_s25] sm:$0xff] }
0x2c1a   :  { %v3040_v9 = vsel %vm86_vm2, %v8440_v36, %v2948_v7  ;;  %v3127_v3 = vsel %vm3106_vm4, %v3126_v10, %v3062_v22  ;;  %7224 = vmatprep.subr.mxu0 %v3532_v47 }
0x2c1b   :  { %3019 = vrot.lane.b32.xlu1 %v7905_v8, %s7906_s1  ;;  %s7911_s1 = smov 4  }
0x2c1d   :  { %v2962_v35 = vpop.permute.xlu1 %2961 }
0x2c1e   :  { %v3047_v26 = vsel %vm86_vm2, %v8472_v42, %v2962_v35  ;;  %v3343_v42 = vsel %vm3106_vm4, %v3063_v27, %v3342_v4 }
0x2c21   :  { %v2994_v13 = vpop.permute.xlu1 %2993 }
0x2c22   :  { %v3056_v58 = vsel %vm3053_vm3, %v3039_v46, %v2994_v13 }
0x2c23   :  { %v3330_v36 = vrot.slane %v3056_v58, 7 }
0x2c25   :  { %v2950_v16 = vpop.permute.xlu1 %2949 }
0x2c26   :  { %v3041_v51 = vsel %vm86_vm2, %v8509_v1, %v2950_v16 }
0x2c27   :  { %v3058_v44 = vsel %vm3053_vm3, %v3041_v51, %v2998_v23 }
0x2c28   :  { %v3114_v7 = vrot.slane %v3058_v44, 4  ;;  %v3334_v14 = vrot.slane %v3058_v44, 5 }
0x2c29   :  { %v2996_v18 = vpop.permute.xlu1 %2995 }
0x2c2a   :  { %v3057_v2 = vsel %vm3053_vm3, %v3040_v9, %v2996_v18 }
0x2c2b   :  { %v3111_v18 = vrot.slane %v3057_v2, 5 }
0x2c2d   :  { %v3010_v21 = vpop.permute.xlu1 %3009 }
0x2c2e   :  { %v3064_v38 = vsel %vm3053_vm3, %v3047_v26, %v3010_v21  ;;  %v3332_v21 = vrot.slane %v3057_v2, 6 }
0x2c2f   :  { %v3128_v61 = vrot.slane %v3064_v38, 6  ;;  %v3344_v5 = vrot.slane %v3064_v38, 7 }
0x2c31   :  { %v2966_v24 = vpop.permute.xlu1 %2965  ;;  %v3129_v23 = vsel %vm3109_vm5, %v3128_v61, %v3127_v3 }
0x2c32   :  { %v3049_v59 = vsel %vm86_vm2, %v8465_v40, %v2966_v24  ;;  %v3108_v40 = vrot.slane %v3056_v58, 6  ;;  %v3345_v24 = vsel %vm3109_vm5, %v3344_v5, %v3343_v42 }
0x2c35   :  { %v3012_v28 = vpop.permute.xlu1 %3011 }
0x2c36   :  { %v3065_v1 = vsel %vm3053_vm3, %v3048_v15, %v3012_v28 }
0x2c37   :  { %v3130_v35 = vrot.slane %v3065_v1, 5  ;;  %v3346_v12 = vrot.slane %v3065_v1, 6 }
0x2c39   :  { %v2968_v31 = vpop.permute.xlu1 %2967  ;;  %v3347_v32 = vsel %vm3112_vm6, %v3346_v12, %v3345_v24 }
0x2c3a   :  { %v3050_v6 = vsel %vm86_vm2, %v8531_v39, %v2968_v31  ;;  %v3131_v31 = vsel %vm3112_vm6, %v3130_v35, %v3129_v23 }
0x2c3d   :  { %v3014_v33 = vpop.permute.xlu1 %3013 }
0x2c3e   :  { %v3066_v62 = vsel %vm3053_vm3, %v3049_v59, %v3014_v33 }
0x2c3f   :  { %v3132_v16 = vrot.slane %v3066_v62, 4  ;;  %v3348_v25 = vrot.slane %v3066_v62, 5 }
0x2c41   :  { %v2970_v45 = vpop.permute.xlu1 %2969  ;;  %v3133_v30 = vsel %vm3115_vm7, %v3132_v16, %v3131_v31  ;;  %v3349_v4 = vsel %vm3115_vm7, %v3348_v25, %v3347_v32 }
0x2c42   :  { %v3051_v50 = vsel %vm86_vm2, %v8540_v63, %v2970_v45 }
0x2c45   :  { %v3016_v60 = vpop.permute.xlu1 %3015 }
0x2c46   :  { %v3067_v13 = vsel %vm3053_vm3, %v3050_v6, %v3016_v60 }
0x2c47   :  { %v3134_v28 = vrot.slane %v3067_v13, 3  ;;  %v3350_v55 = vrot.slane %v3067_v13, 4 }
0x2c49   :  { %v3135_v26 = vsel %vm3118_vm8, %v3134_v28, %v3133_v30  ;;  %v3351_v42 = vsel %vm3118_vm8, %v3350_v55, %v3349_v4 }
0x2c85   :  { %v2942_v17 = vpop.permute.xlu1 %2941  ;;  %v2972_v20 = vpop.permute.xlu0 %2971 }
0x2c86   :  { %v3037_v39 = vsel %vm86_vm2, 0.0, %v2942_v17 }
0x2c87   :  { %v3054_v29 = vsel %vm3053_vm3, %v3037_v39, %v8603_v11 }
0x2c88   :  { %v3107_v33 = vsel %vm3106_vm4, %v3105_v57, %v3054_v29  ;;  %v3328_v34 = vrot.slane %v3054_v29, 1 }
0x2c89   :  { %v3110_v41 = vsel %vm3109_vm5, %v3108_v40, %v3107_v33  ;;  %v3004_v22 = vpop.permute.xlu1 %3003  ;;  %v3018_v46 = vpop.permute.xlu0 %3017 }
0x2c8a   :  { %v3113_v37 = vsel %vm3112_vm6, %v3111_v18, %v3110_v41  ;;  %v3329_v11 = vsel %vm3106_vm4, %v3055_v48, %v3328_v34  ;;  %v3061_v27 = vsel %vm3053_vm3, %v3044_v52, %v3004_v22  ;;  %v3068_v15 = vsel %vm3053_vm3, %v3051_v50, %v3018_v46 }
0x2c8b   :  { %v3331_v10 = vsel %vm3109_vm5, %v3330_v36, %v3329_v11  ;;  %v3123_v63 = vrot.slane %v3061_v27, 1  ;;  %v3136_v45 = vrot.slane %v3068_v15, 2  ;;  %v3352_v51 = vrot.slane %v3068_v15, 3 }
0x2c8c   :  { %v3116_v38 = vsel %vm3115_vm7, %v3114_v7, %v3113_v37  ;;  %v3333_v57 = vsel %vm3112_vm6, %v3332_v21, %v3331_v10  ;;  %v3052_v48 = vsel %vm86_vm2, %v8567_v49, %v2972_v20  ;;  %v3340_v1 = vrot.slane %v3061_v27, 2 }
0x2c8d   :  { %v3020_v52 = vpop.permute.xlu1 %3019  ;;  %v3119_v58 = vsel %vm3118_vm8, %v3117_v56, %v3116_v38  ;;  %v3335_v59 = vsel %vm3115_vm7, %v3334_v14, %v3333_v57  ;;  %v3137_v2 = vsel %vm3121_vm9, %v3136_v45, %v3135_v26  ;;  %v3353_v3 = vsel %vm3121_vm9, %v3352_v51, %v3351_v42 }
0x2c8e   :  { %v3069_v60 = vsel %vm3053_vm3, %v3052_v48, %v3020_v52  ;;  %v3122_v9 = vsel %vm3121_vm9, %v3120_v53, %v3119_v58  ;;  %v3337_v44 = vsel %vm3118_vm8, %v3336_v43, %v3335_v59  ;;  %vm3282_vm2 = vcmask 1040384  }
0x2c8f   :  { %v3138_v61 = vrot.slane %v3069_v60, 1  ;;  %v3354_v49 = vrot.slane %v3069_v60, 2  ;;  %v3125_v62 = vsel %vm3124_vm10, %v3123_v63, %v3122_v9  ;;  %v3339_v56 = vsel %vm3121_vm9, %v3338_v54, %v3337_v44  ;;  %v6344_v54 = vld [vmem:[%s9966_s0] ss:$0 sm:$0xff] }
0x2c90   :  { %7194 = vmatprep.mubr.msk.f32.mxu0 %vm3140_vm11, %v3125_v62  ;;  %v3341_v53 = vsel %vm3124_vm10, %v3340_v1, %v3339_v56  ;;  %vm3284_vm3 = vcmask 1041408   ;;  %vm3286_vm4 = vcmask 1042432   ;;  %vm3288_vm5 = vcmask 1043456  }
0x2c91   :  { %7221 = vmatprep.mubr.msk.f32.mxu1 %vm3140_vm11, %v3341_v53  ;;  %v3139_v19 = vsel %vm3124_vm10, %v3138_v61, %v3137_v2  ;;  %v3355_v43 = vsel %vm3124_vm10, %v3354_v49, %v3353_v3  ;;  %vm3290_vm6 = vcmask 1044480   ;;  %vm3292_vm7 = vcmask 1045504  }
0x2c92   :  { %7195 = vmatmul.mubr.msk.f32.vlgmr.msra.gmra.mrb[32].mxu0 %vm3140_vm11, %v3139_v19  ;;  %7222 = vmatmul.mubr.msk.f32.vlgmr.msra.gmra.mrb[32].mxu1 %vm3140_vm11, %v3355_v43  ;;  %vm3294_vm8 = vcmask 1046528   ;;  %vm3540_vm9 = vcmask 64512   ;;  %vm3630_vm10 = vcmask 31744  }
0x2c93   :  { %7231 = vmatprep.mubr.msk.f32.mxu1 %vm7904_vm0, %v7905_v8  ;;  %7225 = vmatpush3.msra.mxu0 %v3532_v47 }
0x2c94   :  { %7234 = vmatprep.subr.mxu0 %v7905_v8 }
0x2d65   :  { %v7196_v5 = vpop.f32.mrb[32].mxu0  ;;  %v7223_v6 = vpop.f32.mrb[32].mxu1 }
0x2d66   :  { %v3217_v40 = vadd.f32 %v7196_v5, %v6344_v54  ;;  %v3432_v35 = vadd.f32 %v7223_v6, %v6344_v54  ;;  %v3211_v12 = vpop.f32.mrb[33].mxu0  ;;  %v3426_v13 = vpop.f32.mrb[33].mxu1 }
0x2d67   :  { %v3212_v36 = vadd.f32 %v6344_v54, %v3211_v12  ;;  %v3427_v7 = vadd.f32 %v6344_v54, %v3426_v13 }
0x2d68   :  { %v3221_v14 = vmax.f32 %v3217_v40, 0.0  ;;  %v3436_v16 = vmax.f32 %v3432_v35, 0.0 }
0x2d69   :  { %v3220_v17 = vmax.f32 %v3212_v36, 0.0  ;;  %v3435_v20 = vmax.f32 %v3427_v7, 0.0 }
0x2d6a   :  { %v3254_v18 = vsel %vm3222_vm12, %v3221_v14, -inf  ;;  %v3261_v21 = vsel %vm3230_vm13, %v3221_v14, -inf  ;;  %v3268_v23 = vsel %vm3238_vm14, %v3221_v14, -inf  ;;  %v8713_v39 = vsel %vm3246_vm15, %v3221_v14, -inf }
0x2d6b   :  { %v3255_v24 = vrot.slane %v3254_v18, 4  ;;  %v3262_v25 = vrot.slane %v3261_v21, 4  ;;  %v3269_v28 = vrot.slane %v3268_v23, 4  ;;  %v3276_v29 = vrot.slane %v8713_v39, 4 }
0x2d6c   :  { %v3465_v31 = vsel %vm3222_vm12, %v3436_v16, -inf  ;;  %v3472_v32 = vsel %vm3230_vm13, %v3436_v16, -inf  ;;  %v3479_v33 = vsel %vm3238_vm14, %v3436_v16, -inf  ;;  %v8720_v34 = vsel %vm3246_vm15, %v3436_v16, -inf }
0x2d6d   :  { %v3256_v30 = vmax.f32 %v3254_v18, %v3255_v24  ;;  %v8722_v50 = vmax.f32 %v3261_v21, %v3262_v25  ;;  %v8724_v55 = vmax.f32 %v3268_v23, %v3269_v28  ;;  %v3466_v41 = vrot.slane %v3465_v31, 4 }
0x2d6e   :  { %v3473_v22 = vrot.slane %v3472_v32, 4  ;;  %v3480_v46 = vrot.slane %v3479_v33, 4  ;;  %v3487_v37 = vrot.slane %v8720_v34, 4  ;;  %v3223_v11 = vsel %vm3222_vm12, %v3220_v17, -inf }
0x2d6f   :  { %v3257_v27 = vrot.slane %v3256_v30, 2  ;;  %v3264_v15 = vrot.slane %v8722_v50, 2  ;;  %v3467_v4 = vmax.f32 %v3465_v31, %v3466_v41  ;;  %v3224_v26 = vrot.slane %v3223_v11, 4 }
0x2d70   :  { %v8729_v10 = vmax.f32 %v3472_v32, %v3473_v22  ;;  %v8731_v63 = vmax.f32 %v3479_v33, %v3480_v46  ;;  %v3231_v45 = vsel %vm3230_vm13, %v3220_v17, -inf  ;;  %v3239_v51 = vsel %vm3238_vm14, %v3220_v17, -inf }
0x2d71   :  { %v3258_v38 = vmax.f32 %v3256_v30, %v3257_v27  ;;  %v3468_v57 = vrot.slane %v3467_v4, 2  ;;  %v3225_v42 = vmax.f32 %v3223_v11, %v3224_v26  ;;  %v3232_v48 = vrot.slane %v3231_v45, 4 }
0x2d72   :  { %v3475_v52 = vrot.slane %v8729_v10, 2  ;;  %v3240_v58 = vrot.slane %v3239_v51, 4  ;;  %v3247_v59 = vsel %vm3246_vm15, %v3220_v17, -inf  ;;  %v3437_v1 = vsel %vm3222_vm12, %v3435_v20, -inf }
0x2d73   :  { %v8738_v60 = vmax.f32 %v3467_v4, %v3468_v57  ;;  %v3226_v9 = vrot.slane %v3225_v42, 2  ;;  %v3233_v44 = vmax.f32 %v3231_v45, %v3232_v48  ;;  %v3248_v61 = vrot.slane %v3247_v59, 4 }
0x2d74   :  { %v3241_v49 = vmax.f32 %v3239_v51, %v3240_v58  ;;  %v3438_v62 = vrot.slane %v3437_v1, 4  ;;  %v3444_v56 = vsel %vm3230_vm13, %v3435_v20, -inf  ;;  %v3451_v2 = vsel %vm3238_vm14, %v3435_v20, -inf }
0x2d75   :  { %v3227_v3 = vmax.f32 %v3225_v42, %v3226_v9  ;;  %v3234_v53 = vrot.slane %v3233_v44, 2  ;;  %v3249_v19 = vmax.f32 %v3247_v59, %v3248_v61  ;;  %v3445_v43 = vrot.slane %v3444_v56, 4 }
0x2d76   :  { %v3242_v47 = vrot.slane %v3241_v49, 2  ;;  %v3439_v54 = vmax.f32 %v3437_v1, %v3438_v62  ;;  %v3452_v5 = vrot.slane %v3451_v2, 4  ;;  %v3458_v6 = vsel %vm3246_vm15, %v3435_v20, -inf }
0x2d77   :  { %v3228_v40 = vrot.slane %v3227_v3, 1  ;;  %v3235_v35 = vmax.f32 %v3233_v44, %v3234_v53  ;;  %v3250_v12 = vrot.slane %v3249_v19, 2  ;;  %v3446_v13 = vmax.f32 %v3444_v56, %v3445_v43 }
0x2d78   :  { %v3243_v36 = vmax.f32 %v3241_v49, %v3242_v47  ;;  %v3440_v7 = vrot.slane %v3439_v54, 2  ;;  %v3453_v14 = vmax.f32 %v3451_v2, %v3452_v5  ;;  %v3459_v16 = vrot.slane %v3458_v6, 4 }
0x2d79   :  { %v3229_v17 = vmax.f32 %v3227_v3, %v3228_v40  ;;  %v3236_v18 = vrot.slane %v3235_v35, 1  ;;  %v3251_v21 = vmax.f32 %v3249_v19, %v3250_v12  ;;  %v3447_v23 = vrot.slane %v3446_v13, 2 }
0x2d7a   :  { %v3244_v24 = vrot.slane %v3243_v36, 1  ;;  %v3441_v25 = vmax.f32 %v3439_v54, %v3440_v7  ;;  %v3454_v28 = vrot.slane %v3453_v14, 2  ;;  %v3460_v31 = vmax.f32 %v3458_v6, %v3459_v16 }
0x2d7b   :  { %v3237_v20 = vmax.f32 %v3235_v35, %v3236_v18  ;;  %v3252_v32 = vrot.slane %v3251_v21, 1  ;;  %v3448_v33 = vmax.f32 %v3446_v13, %v3447_v23  ;;  %v3259_v30 = vrot.slane %v3258_v38, 1 }
0x2d7c   :  { %v3245_v41 = vmax.f32 %v3243_v36, %v3244_v24  ;;  %v3442_v22 = vrot.slane %v3441_v25, 1  ;;  %v3455_v46 = vmax.f32 %v3453_v14, %v3454_v28  ;;  %v3461_v11 = vrot.slane %v3460_v31, 2  ;;  %v6349_v28 = vld [vmem:[%s9967_s8] ss:$0 sm:$0xff] }
0x2d7d   :  { %v3449_v27 = vrot.slane %v3448_v33, 1  ;;  %v3253_v4 = vmax.f32 %v3251_v21, %v3252_v32  ;;  %v3260_v26 = vmax.f32 %v3258_v38, %v3259_v30  ;;  %v3265_v45 = vmax.f32 %v8722_v50, %v3264_v15 }
0x2d7e   :  { %v3443_v51 = vmax.f32 %v3441_v25, %v3442_v22  ;;  %v3456_v57 = vrot.slane %v3455_v46, 1  ;;  %v3462_v42 = vmax.f32 %v3460_v31, %v3461_v11  ;;  %v3271_v48 = vrot.slane %v8724_v55, 2 }
0x2d7f   :  { %v3450_v58 = vmax.f32 %v3448_v33, %v3449_v27  ;;  %v3266_v59 = vrot.slane %v3265_v45, 1  ;;  %v3277_v1 = vmax.f32 %v8713_v39, %v3276_v29  ;;  %v3283_v9 = vsel %vm3282_vm2, %v3229_v17, %v3237_v20 }
0x2d80   :  { %v3457_v44 = vmax.f32 %v3455_v46, %v3456_v57  ;;  %v3463_v61 = vrot.slane %v3462_v42, 1  ;;  %v3272_v38 = vmax.f32 %v8724_v55, %v3271_v48  ;;  %v3285_v49 = vsel %vm3284_vm3, %v3283_v9, %v3245_v41 }
0x2d81   :  { %v3267_v50 = vmax.f32 %v3265_v45, %v3266_v59  ;;  %v3278_v15 = vrot.slane %v3277_v1, 2  ;;  %v3287_v62 = vsel %vm3286_vm4, %v3285_v49, %v3253_v4  ;;  %v3470_v56 = vrot.slane %v8738_v60, 1 }
0x2d82   :  { %v3273_v2 = vrot.slane %v3272_v38, 1  ;;  %v3289_v3 = vsel %vm3288_vm5, %v3287_v62, %v3260_v26  ;;  %v3476_v39 = vmax.f32 %v8729_v10, %v3475_v52  ;;  %v3464_v55 = vmax.f32 %v3462_v42, %v3463_v61  ;;  %v3937_v26 = vld [vmem:[%s9931_s6] sm:$0xff]  ;;  %s7910_s6 = smov 112  }
0x2d83   :  { %v3279_v29 = vmax.f32 %v3277_v1, %v3278_v15  ;;  %v3291_v53 = vsel %vm3290_vm6, %v3289_v3, %v3267_v50  ;;  %v3482_v19 = vrot.slane %v8731_v63, 2  ;;  %v3488_v54 = vmax.f32 %v8720_v34, %v3487_v37 }
0x2d84   :  { %v3274_v43 = vmax.f32 %v3272_v38, %v3273_v2  ;;  %v3477_v47 = vrot.slane %v3476_v39, 1  ;;  %v3493_v5 = vsel %vm3282_vm2, %v3443_v51, %v3450_v58  ;;  %v3471_v40 = vmax.f32 %v8738_v60, %v3470_v56 }
0x2d85   :  { %v3280_v6 = vrot.slane %v3279_v29, 1  ;;  %v3483_v35 = vmax.f32 %v8731_v63, %v3482_v19  ;;  %v3494_v10 = vsel %vm3284_vm3, %v3493_v5, %v3457_v44  ;;  %v3489_v13 = vrot.slane %v3488_v54, 2 }
0x2d86   :  { %v3293_v52 = vsel %vm3292_vm7, %v3291_v53, %v3274_v43  ;;  %v3478_v12 = vmax.f32 %v3476_v39, %v3477_v47  ;;  %v3495_v36 = vsel %vm3286_vm4, %v3494_v10, %v3464_v55 }
0x2d87   :  { %v3281_v7 = vmax.f32 %v3279_v29, %v3280_v6  ;;  %v3484_v14 = vrot.slane %v3483_v35, 1  ;;  %v3496_v16 = vsel %vm3288_vm5, %v3495_v36, %v3471_v40  ;;  %v3490_v34 = vmax.f32 %v3488_v54, %v3489_v13 }
0x2d88   :  { %v3497_v37 = vsel %vm3290_vm6, %v3496_v16, %v3478_v12 }
0x2d89   :  { %v3295_v17 = vsel %vm3294_vm8, %v3293_v52, %v3281_v7  ;;  %v3485_v60 = vmax.f32 %v3483_v35, %v3484_v14  ;;  %v3491_v63 = vrot.slane %v3490_v34, 1 }
0x2d8a   :  { %3296 = vxpose.xlu0.b32.start.end [1/1] (short) (narrow) %v3295_v17, 8 }
0x2d8b   :  { %v3498_v18 = vsel %vm3292_vm7, %v3497_v37, %v3485_v60  ;;  %v3492_v21 = vmax.f32 %v3490_v34, %v3491_v63 }
0x2d8d   :  { %v3499_v23 = vsel %vm3294_vm8, %v3498_v18, %v3492_v21 }
0x2d8e   :  { %3500 = vxpose.xlu1.b32.start.end [1/1] (short) (narrow) %v3499_v23, 8 }
0x2e0a   :  { %v8775_v24 = vpop.trf.xlu0 }
0x2e0b   :  { %7226 = vmatprep.mubr.msk.f32.mxu0 %vm3540_vm9, %v8775_v24 }
0x2e0e   :  { %v8779_v25 = vpop.trf.xlu1 }
0x2e0f   :  { %7227 = vmatmul.mubr.msk.f32.vlgmr.msra.gmra.mrb[34].mxu0 %vm3540_vm9, %v8779_v25 }
0x2e10   :  { %7236 = vmatprep.mubr.msk.f32.mxu0 %vm7904_vm0, %v7905_v8 }
0x2ee2   :  { %v7228_v31 = vpop.f32.mrb[34].mxu0 }
0x2ee3   :  { %v8788_v20 = vadd.f32 %v7228_v31, %v6349_v28  ;;  %v3613_v32 = vpop.f32.mrb[35].mxu0 }
0x2ee4   :  { %v8790_v33 = vadd.f32 %v6349_v28, %v3613_v32 }
0x2ee5   :  { %3626 = vrot.lane.b32.xlu1 %v8788_v20, %s7908_s28 }
0x2ee6   :  { %3623 = vrot.lane.b32.xlu0 %v8790_v33, %s7908_s28 }
0x2f57   :  { %v8794_v30 = vpop.permute.xlu1 %3626 }
0x2f58   :  { %3857 = vrot.lane.b32.xlu1 %v8794_v30, %s7909_s29  ;;  %v8797_v41 = vpop.permute.xlu0 %3623 }
0x2f59   :  { %3705 = vrot.lane.b32.xlu0 %v8797_v41, %s7909_s29 }
0x2f5c   :  { %3781 = vrot.lane.b32.xlu1 %v8788_v20, %s7909_s29 }
0x2f5d   :  { %3628 = vrot.lane.b32.xlu0 %v8790_v33, %s7909_s29 }
0x2fca   :  { %v3858_v46 = vpop.permute.xlu1 %3857 }
0x2fcb   :  { %v3706_v22 = vpop.permute.xlu0 %3705 }
0x2fcc   :  { %7235 = vmatpush3.xpose.msk.msra.mxu0 %vm3630_vm10, %v3706_v22 }
0x2fcd   :  { %7244 = vmatprep.subr.mxu0 %v7905_v8 }
0x2fce   :  { %v3782_v27 = vpop.permute.xlu1 %3781 }
0x2fcf   :  { %7237 = vmatmul.mubr.msk.f32.vlgmr.msra.gmra.mrb[36].mxu0 %vm3630_vm10, %v8797_v41  ;;  %v3629_v11 = vpop.permute.xlu0 %3628 }
0x2fd0   :  { %7230 = vmatpush3.xpose.msk.msra.mxu1 %vm3630_vm10, %v3629_v11  ;;  %7245 = vmatpush3.xpose.msk.msra.mxu0 %vm3630_vm10, %v3858_v46  ;;  %v4300_v46 = vld [vmem:[%s9932_s9] sm:$0xff] }
0x2fd1   :  { %7246 = vmatprep.mubr.msk.f32.mxu0 %vm7904_vm0, %v7905_v8  ;;  %7239 = vmatprep.subr.mxu1 %v7905_v8 }
0x2fd2   :  { %7254 = vmatprep.subr.mxu0 %v7905_v8 }
0x2fd3   :  { %7232 = vmatmul.mubr.msk.f32.vlgmr.msra.gmra.mrb[34].mxu1 %vm3630_vm10, %v8790_v33  ;;  %7247 = vmatmul.mubr.msk.f32.vlgmr.msra.gmra.mrb[38].mxu0 %vm3630_vm10, %v8794_v30 }
0x2fd4   :  { %7240 = vmatpush3.xpose.msk.msra.mxu1 %vm3630_vm10, %v3782_v27  ;;  %7241 = vmatprep.mubr.msk.f32.mxu1 %vm7904_vm0, %v7905_v8 }
0x2fd5   :  { %7256 = vmatprep.mubr.msk.f32.mxu0 %vm7904_vm0, %v7905_v8  ;;  %7249 = vmatprep.subr.mxu1 %v7905_v8 }
0x2fd7   :  { %7242 = vmatmul.mubr.msk.f32.vlgmr.msra.gmra.mrb[36].mxu1 %vm3630_vm10, %v8788_v20 }
0x2fd8   :  { %7251 = vmatprep.mubr.msk.f32.mxu1 %vm7904_vm0, %v7905_v8 }
0x30a2   :  { %v3777_v4 = vpop.f32.mrb[36].mxu0 }
0x30a3   :  { %v3934_v45 = vmul.f32 0.5, %v3777_v4  ;;  %v7238_v51 = vpop.f32.mrb[37].mxu0 }
0x30a5   :  { %v3939_v57 = vadd.f32 %v3937_v26, %v3934_v45 }
0x30a6   :  { %v3701_v42 = vpop.f32.mrb[34].mxu1  ;;  %v3929_v48 = vpop.f32.mrb[38].mxu0 }
0x30a7   :  { %v3933_v58 = vmul.f32 0.5, %v3701_v42  ;;  %v3936_v59 = vmul.f32 0.5, %v3929_v48  ;;  %v7233_v1 = vpop.f32.mrb[35].mxu1  ;;  %v7248_v9 = vpop.f32.mrb[39].mxu0  ;;  %v3945_v44 = vsel %vm3540_vm9, %v3939_v57, -inf }
0x30a8   :  { %3946 = vmax.xlane.f32.xlu0 %v3945_v44  ;;  %v6364_v9 = vld [vmem:[%s9933_s10] ss:$0 sm:$0xff] }
0x30a9   :  { %v3938_v61 = vadd.f32 %v3937_v26, %v3933_v58  ;;  %v3941_v38 = vadd.f32 %v3937_v26, %v3936_v59 }
0x30aa   :  { %v3853_v49 = vpop.f32.mrb[36].mxu1 }
0x30ab   :  { %v3935_v50 = vmul.f32 0.5, %v3853_v49  ;;  %v7243_v15 = vpop.f32.mrb[37].mxu1  ;;  %v3951_v62 = vsel %vm3540_vm9, %v3941_v38, -inf  ;;  %v3942_v56 = vsel %vm3540_vm9, %v3938_v61, -inf }
0x30ac   :  { %3952 = vmax.xlane.f32.xlu1 %v3951_v62  ;;  %3943 = vmax.xlane.f32.xlu0 %v3942_v56 }
0x30ad   :  { %v3940_v2 = vadd.f32 %v3937_v26, %v3935_v50 }
0x30af   :  { %v3948_v3 = vsel %vm3540_vm9, %v3940_v2, -inf }
0x30b0   :  { %3949 = vmax.xlane.f32.xlu0 %v3948_v3 }
0x3135   :  { %v3947_v39 = vpop.xlane.xlu0 %3946 }
0x3136   :  { %v3955_v29 = vsub.f32 %v3939_v57, %v3947_v39 }
0x3138   :  { %v3960_v53 = vmul.f32 1.442695, %v3955_v29 }
0x3139   :  { %v3953_v55 = vpop.xlane.xlu1 %3952  ;;  %v3944_v40 = vpop.xlane.xlu0 %3943 }
0x313a   :  { %7874 = vpow2.f32 %v3960_v53  ;;  %v3957_v19 = vsub.f32 %v3941_v38, %v3953_v55  ;;  %v3954_v35 = vsub.f32 %v3938_v61, %v3944_v40  ;;  %v4441_v40 = vld [vmem:[%s9934_s11 + $0x28] sm:$0xff] }
0x313c   :  { %v3964_v43 = vmul.f32 1.442695, %v3957_v19  ;;  %v3958_v52 = vmul.f32 1.442695, %v3954_v35  ;;  %v4443_v35 = vld [vmem:[%s9934_s11 + $0x38] sm:$0xff] }
0x313d   :  { %v3950_v10 = vpop.xlane.xlu0 %3949 }
0x313e   :  { %7876 = vpow2.f32 %v3964_v43  ;;  %v3956_v12 = vsub.f32 %v3940_v2, %v3950_v10 }
0x313f   :  { %7878 = vpow2.f32 %v3958_v52 }
0x3140   :  { %v3962_v13 = vmul.f32 1.442695, %v3956_v12 }
0x3142   :  { %7880 = vpow2.f32 %v3962_v13 }
0x3144   :  { %v7875_v47 = vpop.eup %7874 }
0x3145   :  { %v3969_v54 = vsel %vm3540_vm9, %v7875_v47, 0.0 }
0x3146   :  { %3970 = vadd.xlane.f32.xlu1 %v3969_v54  ;;  %v4439_v54 = vld [vmem:[%s9934_s11 + $0x18] sm:$0xff] }
0x3148   :  { %v7877_v5 = vpop.eup %7876 }
0x3149   :  { %v3975_v6 = vsel %vm3540_vm9, %v7877_v5, 0.0  ;;  %v7879_v36 = vpop.eup %7878 }
0x314a   :  { %3976 = vadd.xlane.f32.xlu0 %v3975_v6  ;;  %v3966_v7 = vsel %vm3540_vm9, %v7879_v36, 0.0  ;;  %v4438_v6 = vld [vmem:[%s9934_s11 + $0x10] sm:$0xff] }
0x314c   :  { %v7881_v14 = vpop.eup %7880 }
0x314d   :  { %v3972_v16 = vsel %vm3540_vm9, %v7881_v14, 0.0 }
0x3157   :  { %4062 = vrot.lane.b32.xlu1 %v8797_v41, %s7910_s6 }
0x3160   :  { %4214 = vrot.lane.b32.xlu0 %v8794_v30, %s7910_s6 }
0x317b   :  { %3967 = vadd.xlane.f32.xlu1 %v3966_v7 }
0x317f   :  { %3973 = vadd.xlane.f32.xlu0 %v3972_v16  ;;  %v6367_v16 = vld [vmem:[%s9935_s15] ss:$0 sm:$0xff] }
0x318c   :  { %3986 = vrot.lane.b32.xlu1 %v8790_v33, %s7910_s6 }
0x3195   :  { %4138 = vrot.lane.b32.xlu0 %v8788_v20, %s7910_s6 }
0x31d3   :  { %v3971_v34 = vpop.xlane.xlu1 %3970 }
0x31d4   :  { %7882 = vrcp.f32 %v3971_v34 }
0x31d7   :  { %v4063_v37 = vpop.permute.xlu1 %4062  ;;  %v3977_v17 = vpop.xlane.xlu0 %3976 }
0x31d8   :  { %7884 = vrcp.f32 %v3977_v17  ;;  %7255 = vmatpush3.msra.mxu0 %v4063_v37  ;;  %v6368_v37 = vld [vmem:[%s9936_s16] ss:$0 sm:$0xff] }
0x31d9   :  { %7264 = vmatprep.subr.mxu0 %v7905_v8 }
0x31db   :  { %v4215_v18 = vpop.permute.xlu0 %4214 }
0x31de   :  { %v7883_v60 = vpop.eup %7882 }
0x31df   :  { %v3983_v63 = vmul.f32 %v7883_v60, %v7875_v47 }
0x31e1   :  { %7257 = vmatmul.mubr.msk.f32.vlgmr.msra.gmra.mrb[40].mxu0 %vm3540_vm9, %v3983_v63 }
0x31e2   :  { %v7885_v21 = vpop.eup %7884  ;;  %7265 = vmatpush3.msra.mxu0 %v4215_v18  ;;  %7266 = vmatprep.mubr.msk.f32.mxu0 %vm7904_vm0, %v7905_v8 }
0x31e3   :  { %v3985_v23 = vmul.f32 %v7885_v21, %v7877_v5  ;;  %v4436_v5 = vld [vmem:[%s9934_s11] sm:$0xff] }
0x31e4   :  { %v4440_v21 = vld [vmem:[%s9934_s11 + $0x20] sm:$0xff] }
0x31e5   :  { %7267 = vmatmul.mubr.msk.f32.vlgmr.msra.gmra.mrb[42].mxu0 %vm3540_vm9, %v3985_v23  ;;  %v4442_v23 = vld [vmem:[%s9934_s11 + $0x30] sm:$0xff] }
0x31e6   :  { %4606 = vmatprep.mubr.f32.mxu0 %v7905_v8 }
0x3208   :  { %v3968_v28 = vpop.xlane.xlu1 %3967 }
0x3209   :  { %7886 = vrcp.f32 %v3968_v28 }
0x320c   :  { %v3987_v31 = vpop.permute.xlu1 %3986  ;;  %v3974_v20 = vpop.xlane.xlu0 %3973 }
0x320d   :  { %7888 = vrcp.f32 %v3974_v20  ;;  %7250 = vmatpush3.msra.mxu1 %v3987_v31  ;;  %v4445_v31 = vld [vmem:[%s9934_s11 + $0x48] sm:$0xff]  ;;  %v4447_v20 = vld [vmem:[%s9934_s11 + $0x58] sm:$0xff] }
0x320e   :  { %7259 = vmatprep.subr.mxu1 %v7905_v8 }
0x3210   :  { %v4139_v30 = vpop.permute.xlu0 %4138 }
0x3213   :  { %v7887_v32 = vpop.eup %7886 }
0x3214   :  { %v3982_v33 = vmul.f32 %v7887_v32, %v7879_v36 }
0x3216   :  { %7252 = vmatmul.mubr.msk.f32.vlgmr.msra.gmra.mrb[38].mxu1 %vm3540_vm9, %v3982_v33  ;;  %v4444_v33 = vld [vmem:[%s9934_s11 + $0x40] sm:$0xff] }
0x3217   :  { %v7889_v41 = vpop.eup %7888  ;;  %7260 = vmatpush3.msra.mxu1 %v4139_v30  ;;  %7261 = vmatprep.mubr.msk.f32.mxu1 %vm7904_vm0, %v7905_v8  ;;  %v4446_v30 = vld [vmem:[%s9934_s11 + $0x50] sm:$0xff] }
0x3218   :  { %v3984_v22 = vmul.f32 %v7889_v41, %v7881_v14  ;;  %7269 = vmatprep.subr.mxu1 %v4300_v46  ;;  %v4449_v41 = vld [vmem:[%s9934_s11 + $0x68] sm:$0xff] }
0x321a   :  { %7262 = vmatmul.mubr.msk.f32.vlgmr.msra.gmra.mrb[40].mxu1 %vm3540_vm9, %v3984_v22  ;;  %v4451_v22 = vld [vmem:[%s9934_s11 + $0x78] sm:$0xff] }
0x321b   :  { %7270 = vmatpush3.msra.mxu1 %v4300_v46  ;;  %v5206_v46 = vld [vmem:[%s9937_s13 + $0x80] sm:$0xff] }
0x321c   :  { %4619 = vmatprep.subr.mxu1 %v4439_v54 }
0x32b4   :  { %v4134_v11 = vpop.f32.mrb[40].mxu0 }
0x32b5   :  { %v7258_v27 = vpop.f32.mrb[41].mxu0  ;;  %4291 = vrot.lane.b32.xlu1 %v4134_v11, %s7911_s1  ;;  %v5207_v11 = vld [vmem:[%s9937_s13 + $0x88] sm:$0xff] }
0x32b6   :  { %v5238_v27 = vld [vmem:[%s9937_s13 + $0x180] sm:$0xff] }
0x32b8   :  { %v4286_v4 = vpop.f32.mrb[42].mxu0 }
0x32b9   :  { %4296 = vrot.lane.b32.xlu1 %v4286_v4, %s7911_s1  ;;  %v7268_v26 = vpop.f32.mrb[43].mxu0  ;;  %v5239_v4 = vld [vmem:[%s9937_s13 + $0x188] sm:$0xff] }
0x32ba   :  { %v4448_v26 = vld [vmem:[%s9934_s11 + $0x60] sm:$0xff] }
0x32e9   :  { %v4058_v45 = vpop.f32.mrb[38].mxu1 }
0x32ea   :  { %v7253_v51 = vpop.f32.mrb[39].mxu1 }
0x32eb   :  { %v7478_v51 = vpack.c.bf16 %v5207_v11, %v5206_v46  ;;  %v5216_v46 = vld [vmem:[%s9937_s13 + $0xd0] sm:$0xff]  ;;  %v5217_v11 = vld [vmem:[%s9937_s13 + $0xd8] sm:$0xff] }
0x32ed   :  { %v4210_v57 = vpop.f32.mrb[40].mxu1 }
0x32ee   :  { %v7263_v42 = vpop.f32.mrb[41].mxu1 }
0x32ef   :  { %v5190_v42 = vld [vmem:[%s9937_s13] sm:$0xff] }
0x3327   :  { %v4292_v48 = vpop.permute.xlu1 %4291 }
0x3328   :  { %v4294_v58 = vsel %vm3630_vm10, %v4058_v45, %v4292_v48  ;;  %v4450_v45 = vld [vmem:[%s9934_s11 + $0x70] sm:$0xff]  ;;  %v5191_v48 = vld [vmem:[%s9937_s13 + $0x8] sm:$0xff] }
0x3329   :  { %7271 = vmatprep.mubr.msk.f32.mxu1 %vm3540_vm9, %v4294_v58  ;;  %v5222_v58 = vld [vmem:[%s9937_s13 + $0x100] sm:$0xff] }
0x332b   :  { %v4297_v59 = vpop.permute.xlu1 %4296 }
0x332c   :  { %v4299_v1 = vsel %vm3630_vm10, %v4210_v57, %v4297_v59  ;;  %v7510_v57 = vpack.c.bf16 %v5239_v4, %v5238_v27  ;;  %v5223_v59 = vld [vmem:[%s9937_s13 + $0x108] sm:$0xff]  ;;  %v5248_v27 = vld [vmem:[%s9937_s13 + $0x1d0] sm:$0xff]  ;;  %v5249_v4 = vld [vmem:[%s9937_s13 + $0x1d8] sm:$0xff] }
0x332d   :  { %7272 = vmatmul.mubr.msk.f32.vlgmr.msra.gmra.mrb[42].mxu1 %vm3540_vm9, %v4299_v1  ;;  %v5208_v1 = vld [vmem:[%s9937_s13 + $0x90] sm:$0xff] }
0x332e   :  { %4683 = vmatprep.mubr.f32.mxu1 %v7905_v8  ;;  %4620 = vmatpush1.msra.mxu1 %v4438_v6  ;;  %v5227_v6 = vld [vmem:[%s9937_s13 + $0x128] sm:$0xff] }
0x332f   :  { %4773 = vmatprep.subr.mxu1 %v4443_v35  ;;  %v5213_v35 = vld [vmem:[%s9937_s13 + $0xb8] sm:$0xff] }
0x3400   :  { %v7273_v44 = vpop.f32.mrb[42].mxu1 }
0x3401   :  { %v4386_v61 = vadd.f32 %v7273_v44, %v6364_v9  ;;  %v4380_v38 = vpop.f32.mrb[43].mxu1  ;;  %v5240_v44 = vld [vmem:[%s9937_s13 + $0x190] sm:$0xff] }
0x3402   :  { %v4381_v49 = vadd.f32 %v6364_v9, %v4380_v38  ;;  %v5209_v9 = vld [vmem:[%s9937_s13 + $0x98] sm:$0xff]  ;;  %v7480_v38 = vpack.c.bf16 %v5191_v48, %v5190_v42  ;;  %v7498_v42 = vpack.c.bf16 %v5217_v11, %v5216_v46  ;;  %v7530_v48 = vpack.c.bf16 %v5249_v4, %v5248_v27  ;;  %v5286_v46 = vld [vmem:[%s9937_s13 + $0x300] sm:$0xff]  ;;  %v5287_v11 = vld [vmem:[%s9937_s13 + $0x308] sm:$0xff] }
0x3403   :  { %v4390_v50 = vadd.f32 %v4386_v61, %v8779_v25  ;;  %v5241_v61 = vld [vmem:[%s9937_s13 + $0x198] sm:$0xff]  ;;  %v5272_v27 = vld [vmem:[%s9937_s13 + $0x290] sm:$0xff] }
0x3404   :  { %v4389_v15 = vadd.f32 %v4381_v49, %v8775_v24  ;;  %v4437_v24 = vld [vmem:[%s9934_s11 + $0x8] sm:$0xff]  ;;  %v7512_v49 = vpack.c.bf16 %v5223_v59, %v5222_v58  ;;  %v5232_v58 = vld [vmem:[%s9937_s13 + $0x150] sm:$0xff]  ;;  %v5233_v59 = vld [vmem:[%s9937_s13 + $0x158] sm:$0xff] }
0x3405   :  { %v4396_v62 = vsel %vm3540_vm9, %v4390_v50, 0.0  ;;  %4542 = vmatprep.subr.mxu0 %v4437_v24 }
0x3406   :  { %4397 = vadd.xlane.f32.xlu1 %v4396_v62  ;;  %v4393_v56 = vsel %vm3540_vm9, %v4389_v15, 0.0  ;;  %4543 = vmatpush1.msra.mxu0 %v4436_v5  ;;  %v7482_v62 = vpack.c.bf16 %v5209_v9, %v5208_v1  ;;  %v5226_v5 = vld [vmem:[%s9937_s13 + $0x120] sm:$0xff]  ;;  %v5219_v9 = vld [vmem:[%s9937_s13 + $0xe8] sm:$0xff] }
0x3407   :  { %4394 = vadd.xlane.f32.xlu0 %v4393_v56  ;;  %4696 = vmatprep.subr.mxu0 %v4441_v40  ;;  %v7514_v56 = vpack.c.bf16 %v5241_v61, %v5240_v44  ;;  %v5212_v40 = vld [vmem:[%s9937_s13 + $0xb0] sm:$0xff]  ;;  %v5218_v1 = vld [vmem:[%s9937_s13 + $0xe0] sm:$0xff]  ;;  %v5251_v61 = vld [vmem:[%s9937_s13 + $0x1e8] sm:$0xff] }
0x3408   :  { %v5250_v44 = vld [vmem:[%s9937_s13 + $0x1e0] sm:$0xff] }
0x3493   :  { %v4398_v2 = vpop.xlane.xlu1 %4397 }
0x3494   :  { %v4401_v3 = vmul.f32 0.125, %v4398_v2  ;;  %v4395_v39 = vpop.xlane.xlu0 %4394  ;;  %v5224_v2 = vld [vmem:[%s9937_s13 + $0x110] sm:$0xff] }
0x3495   :  { %v4400_v29 = vmul.f32 0.125, %v4395_v39  ;;  %v5210_v39 = vld [vmem:[%s9937_s13 + $0xa0] sm:$0xff] }
0x3496   :  { %v4403_v53 = vsub.f32 %v4390_v50, %v4401_v3  ;;  %v5192_v50 = vld [vmem:[%s9937_s13 + $0x10] sm:$0xff]  ;;  %v5225_v3 = vld [vmem:[%s9937_s13 + $0x118] sm:$0xff] }
0x3497   :  { %v4402_v55 = vsub.f32 %v4389_v15, %v4400_v29  ;;  %v5193_v15 = vld [vmem:[%s9937_s13 + $0x18] sm:$0xff]  ;;  %v5211_v29 = vld [vmem:[%s9937_s13 + $0xa8] sm:$0xff] }
0x3498   :  { %v4405_v47 = vmul.f32 %v4403_v53, %v4403_v53  ;;  %v7486_v24 = vpack.c.bf16 %v5211_v29, %v5210_v39 }
0x3499   :  { %v4404_v19 = vmul.f32 %v4402_v55, %v4402_v55 }
0x349a   :  { %v4409_v25 = vsel %vm3540_vm9, %v4405_v47, 0.0  ;;  %v5194_v47 = vld [vmem:[%s9937_s13 + $0x20] sm:$0xff] }
0x349b   :  { %v4406_v43 = vsel %vm3540_vm9, %v4404_v19, 0.0  ;;  %v7484_v19 = vpack.c.bf16 %v5193_v15, %v5192_v50  ;;  %v5202_v50 = vld [vmem:[%s9937_s13 + $0x60] sm:$0xff]  ;;  %v7502_v15 = vpack.c.bf16 %v5219_v9, %v5218_v1 }
0x349c   :  { %4407 = vadd.xlane.f32.xlu0 %v4406_v43  ;;  %v7516_v43 = vpack.c.bf16 %v5225_v3, %v5224_v2  ;;  %v5234_v2 = vld [vmem:[%s9937_s13 + $0x160] sm:$0xff]  ;;  %v5235_v3 = vld [vmem:[%s9937_s13 + $0x168] sm:$0xff] }
0x349d   :  { %v7536_v29 = vpack.c.bf16 %v5235_v3, %v5234_v2  ;;  %v5257_v3 = vld [vmem:[%s9937_s13 + $0x218] sm:$0xff] }
0x34a0   :  { %4410 = vadd.xlane.f32.xlu0 %v4409_v25  ;;  %v5195_v25 = vld [vmem:[%s9937_s13 + $0x28] sm:$0xff] }
0x3529   :  { %v4408_v10 = vpop.xlane.xlu0 %4407 }
0x352a   :  { %v4412_v52 = vmul.f32 0.125, %v4408_v10  ;;  %v5244_v10 = vld [vmem:[%s9937_s13 + $0x1b0] sm:$0xff] }
0x352c   :  { %v4414_v12 = vadd.f32 1e-05, %v4412_v52  ;;  %v5245_v52 = vld [vmem:[%s9937_s13 + $0x1b8] sm:$0xff] }
0x352d   :  { %v4411_v13 = vpop.xlane.xlu0 %4410 }
0x352e   :  { %7890 = vrsqrt.f32 %v4414_v12  ;;  %v4413_v36 = vmul.f32 0.125, %v4411_v13  ;;  %v7488_v12 = vpack.c.bf16 %v5195_v25, %v5194_v47  ;;  %v7520_v13 = vpack.c.bf16 %v5227_v6, %v5226_v5  ;;  %v5253_v47 = vld [vmem:[%s9937_s13 + $0x1f8] sm:$0xff]  ;;  %v5204_v25 = vld [vmem:[%s9937_s13 + $0x70] sm:$0xff] }
0x352f   :  { %v5236_v6 = vld [vmem:[%s9937_s13 + $0x170] sm:$0xff] }
0x3530   :  { %v4415_v7 = vadd.f32 1e-05, %v4413_v36  ;;  %v5196_v36 = vld [vmem:[%s9937_s13 + $0x30] sm:$0xff] }
0x3532   :  { %7892 = vrsqrt.f32 %v4415_v7  ;;  %v5197_v7 = vld [vmem:[%s9937_s13 + $0x38] sm:$0xff] }
0x3538   :  { %v7891_v14 = vpop.eup %7890 }
0x3539   :  { %v4418_v34 = vmul.f32 %v7891_v14, %v4402_v55  ;;  %v5243_v55 = vld [vmem:[%s9937_s13 + $0x1a8] sm:$0xff]  ;;  %v7490_v14 = vpack.c.bf16 %v5213_v35, %v5212_v40  ;;  %v5237_v40 = vld [vmem:[%s9937_s13 + $0x178] sm:$0xff] }
0x353a   :  { %v7540_v35 = vpack.c.bf16 %v5237_v40, %v5236_v6  ;;  %v5275_v40 = vld [vmem:[%s9937_s13 + $0x2a8] sm:$0xff] }
0x353b   :  { %v4426_v17 = vmul.f32 %v6367_v16, %v4418_v34  ;;  %v5228_v34 = vld [vmem:[%s9937_s13 + $0x130] sm:$0xff] }
0x353c   :  { %v7893_v60 = vpop.eup %7892 }
0x353d   :  { %v8893_v63 = vadd.f32 %v6368_v37, %v4426_v17  ;;  %v4419_v18 = vmul.f32 %v7893_v60, %v4403_v53  ;;  %v5242_v53 = vld [vmem:[%s9937_s13 + $0x1a0] sm:$0xff]  ;;  %v5215_v60 = vld [vmem:[%s9937_s13 + $0xc8] sm:$0xff] }
0x353e   :  { %v7518_v54 = vpack.c.bf16 %v5243_v55, %v5242_v53  ;;  %v5214_v17 = vld [vmem:[%s9937_s13 + $0xc0] sm:$0xff]  ;;  %v5220_v53 = vld [vmem:[%s9937_s13 + $0xf0] sm:$0xff]  ;;  %v5221_v55 = vld [vmem:[%s9937_s13 + $0xf8] sm:$0xff] }
0x353f   :  { %v4427_v28 = vmul.f32 %v6367_v16, %v4419_v18  ;;  %6369 = vmatmul.mubr.msk.f32.vlgmr.msra.gmra.mrb[44].mxu0 %vm3540_vm9, %v8893_v63  ;;  %6371 = vmatmul.mubr.msk.f32.vlgmr.msra.gmra.mrb[44].mxu1 %vm3540_vm9, %v8893_v63  ;;  %v7522_v16 = vpack.c.bf16 %v5245_v52, %v5244_v10  ;;  %v5246_v18 = vld [vmem:[%s9937_s13 + $0x1c0] sm:$0xff]  ;;  %v5271_v52 = vld [vmem:[%s9937_s13 + $0x288] sm:$0xff] }
0x3540   :  { %4612 = vmatprep.mubr.f32.mxu0 %v7905_v8  ;;  %4689 = vmatprep.mubr.f32.mxu1 %v7905_v8  ;;  %v5270_v10 = vld [vmem:[%s9937_s13 + $0x280] sm:$0xff] }
0x3541   :  { %v8913_v32 = vadd.f32 %v6368_v37, %v4427_v28  ;;  %4697 = vmatpush1.msra.mxu0 %v4440_v21  ;;  %4774 = vmatpush1.msra.mxu1 %v4442_v23  ;;  %v5229_v37 = vld [vmem:[%s9937_s13 + $0x138] sm:$0xff]  ;;  %v5247_v21 = vld [vmem:[%s9937_s13 + $0x1c8] sm:$0xff]  ;;  %v7492_v23 = vpack.c.bf16 %v5197_v7, %v5196_v36 }
0x3542   :  { %4850 = vmatprep.subr.mxu0 %v4445_v31  ;;  %4927 = vmatprep.subr.mxu1 %v4447_v20  ;;  %v7524_v28 = vpack.c.bf16 %v5229_v37, %v5228_v34  ;;  %v5198_v31 = vld [vmem:[%s9937_s13 + $0x40] sm:$0xff]  ;;  %v5199_v20 = vld [vmem:[%s9937_s13 + $0x48] sm:$0xff] }
0x3543   :  { %6370 = vmatmul.mubr.msk.f32.gmra.mrb[46].mxu0 %vm3540_vm9, %v8913_v32  ;;  %6372 = vmatmul.mubr.msk.f32.gmra.mrb[46].mxu1 %vm3540_vm9, %v8913_v32  ;;  %v5303_v36 = vld [vmem:[%s9937_s13 + $0x388] sm:$0xff] }
0x3544   :  { %4760 = vmatprep.mubr.f32.mxu0 %v7905_v8  ;;  %4837 = vmatprep.mubr.f32.mxu1 %v7905_v8 }
0x3547   :  { %6373 = vmatmul.mubr.msk.f32.vlgmr.msra.gmra.mrb[48].mxu0 %vm3540_vm9, %v8893_v63  ;;  %6375 = vmatmul.mubr.msk.f32.vlgmr.msra.gmra.mrb[48].mxu1 %vm3540_vm9, %v8893_v63 }
0x3548   :  { %4766 = vmatprep.mubr.f32.mxu0 %v7905_v8  ;;  %4843 = vmatprep.mubr.f32.mxu1 %v7905_v8 }
0x3549   :  { %4851 = vmatpush1.msra.mxu0 %v4444_v33  ;;  %4928 = vmatpush1.msra.mxu1 %v4446_v30  ;;  %v7494_v33 = vpack.c.bf16 %v5215_v60, %v5214_v17  ;;  %v7526_v30 = vpack.c.bf16 %v5247_v21, %v5246_v18  ;;  %v9184_v17 = vld [vmem:[%s9938_s12] sm:$0xff] }
0x354a   :  { %5004 = vmatprep.subr.mxu0 %v4449_v41  ;;  %5081 = vmatprep.subr.mxu1 %v4451_v22  ;;  %v5230_v41 = vld [vmem:[%s9937_s13 + $0x140] sm:$0xff]  ;;  %v5231_v22 = vld [vmem:[%s9937_s13 + $0x148] sm:$0xff] }
0x354b   :  { %6374 = vmatmul.mubr.msk.f32.gmra.mrb[50].mxu0 %vm3540_vm9, %v8913_v32  ;;  %6376 = vmatmul.mubr.msk.f32.gmra.mrb[50].mxu1 %vm3540_vm9, %v8913_v32 }
0x354c   :  { %4914 = vmatprep.mubr.f32.mxu0 %v7905_v8  ;;  %4991 = vmatprep.mubr.f32.mxu1 %v7905_v8 }
0x354f   :  { %6377 = vmatmul.mubr.msk.f32.vlgmr.msra.gmra.mrb[52].mxu0 %vm3540_vm9, %v8893_v63  ;;  %6379 = vmatmul.mubr.msk.f32.vlgmr.msra.gmra.mrb[52].mxu1 %vm3540_vm9, %v8893_v63 }
0x3550   :  { %4920 = vmatprep.mubr.f32.mxu0 %v7905_v8  ;;  %4997 = vmatprep.mubr.f32.mxu1 %v7905_v8 }
0x3551   :  { %5005 = vmatpush1.msra.mxu0 %v4448_v26  ;;  %5082 = vmatpush1.msra.mxu1 %v4450_v45  ;;  %v7496_v26 = vpack.c.bf16 %v5199_v20, %v5198_v31  ;;  %v7528_v45 = vpack.c.bf16 %v5231_v22, %v5230_v41  ;;  %v5254_v20 = vld [vmem:[%s9937_s13 + $0x200] sm:$0xff] }
0x3552   :  { %7479 = vmatprep.subr.bf16.mxu0 %v7478_v51  ;;  %7511 = vmatprep.subr.bf16.mxu1 %v7510_v57  ;;  %v5200_v51 = vld [vmem:[%s9937_s13 + $0x50] sm:$0xff]  ;;  %v5201_v57 = vld [vmem:[%s9937_s13 + $0x58] sm:$0xff] }
0x3553   :  { %6378 = vmatmul.mubr.msk.f32.gmra.mrb[54].mxu0 %vm3540_vm9, %v8913_v32  ;;  %6380 = vmatmul.mubr.msk.f32.gmra.mrb[54].mxu1 %vm3540_vm9, %v8913_v32 }
0x3554   :  { %5068 = vmatprep.mubr.f32.mxu0 %v7905_v8  ;;  %5145 = vmatprep.mubr.f32.mxu1 %v7905_v8 }
0x3557   :  { %6381 = vmatmul.mubr.msk.f32.vlgmr.msra.gmra.mrb[56].mxu0 %vm3540_vm9, %v8893_v63  ;;  %6383 = vmatmul.mubr.msk.f32.vlgmr.msra.gmra.mrb[56].mxu1 %vm3540_vm9, %v8893_v63 }
0x3558   :  { %5074 = vmatprep.mubr.f32.mxu0 %v7905_v8  ;;  %5151 = vmatprep.mubr.f32.mxu1 %v7905_v8 }
0x3559   :  { %7481 = vmatpush3.bf16.msra.mxu0 %v7480_v38  ;;  %7513 = vmatpush3.bf16.msra.mxu1 %v7512_v49  ;;  %v7500_v38 = vpack.c.bf16 %v5201_v57, %v5200_v51  ;;  %v7532_v49 = vpack.c.bf16 %v5233_v59, %v5232_v58  ;;  %v5273_v57 = vld [vmem:[%s9937_s13 + $0x298] sm:$0xff] }
0x355a   :  { %7483 = vmatprep.subr.bf16.mxu0 %v7482_v62  ;;  %7515 = vmatprep.subr.bf16.mxu1 %v7514_v56  ;;  %v7534_v62 = vpack.c.bf16 %v5251_v61, %v5250_v44  ;;  %v5203_v56 = vld [vmem:[%s9937_s13 + $0x68] sm:$0xff]  ;;  %v7576_v44 = vpack.c.bf16 %v5287_v11, %v5286_v46 }
0x355b   :  { %6382 = vmatmul.mubr.msk.f32.gmra.mrb[58].mxu0 %vm3540_vm9, %v8913_v32  ;;  %6384 = vmatmul.mubr.msk.f32.gmra.mrb[58].mxu1 %vm3540_vm9, %v8913_v32  ;;  %v7504_v39 = vpack.c.bf16 %v5203_v56, %v5202_v50  ;;  %v7546_v56 = vpack.c.bf16 %v5273_v57, %v5272_v27  ;;  %v9279_v27 = vld [vmem:[%s9938_s12 + $0x8] sm:$0xff]  ;;  %v5308_v57 = vld [vmem:[%s9937_s13 + $0x3b0] sm:$0xff] }
0x355d   :  { %7485 = vmatpush3.bf16.msra.mxu0 %v7484_v19  ;;  %7517 = vmatpush3.bf16.msra.mxu1 %v7516_v43  ;;  %v5252_v19 = vld [vmem:[%s9937_s13 + $0x1f0] sm:$0xff]  ;;  %v7506_v43 = vpack.c.bf16 %v5221_v55, %v5220_v53 }
0x355e   :  { %7487 = vmatprep.subr.bf16.mxu0 %v7486_v24  ;;  %7519 = vmatprep.subr.bf16.mxu1 %v7518_v54  ;;  %v5205_v24 = vld [vmem:[%s9937_s13 + $0x78] sm:$0xff]  ;;  %v7538_v54 = vpack.c.bf16 %v5253_v47, %v5252_v19 }
0x355f   :  { %v7508_v5 = vpack.c.bf16 %v5205_v24, %v5204_v25  ;;  %v5289_v25 = vld [vmem:[%s9937_s13 + $0x318] sm:$0xff]  ;;  %v5274_v24 = vld [vmem:[%s9937_s13 + $0x2a0] sm:$0xff] }
0x3560   :  { %v7550_v46 = vpack.c.bf16 %v5275_v40, %v5274_v24 }
0x3561   :  { %7489 = vmatpush3.bf16.msra.mxu0 %v7488_v12  ;;  %7521 = vmatpush3.bf16.msra.mxu1 %v7520_v13  ;;  %v5302_v12 = vld [vmem:[%s9937_s13 + $0x380] sm:$0xff]  ;;  %v7542_v13 = vpack.c.bf16 %v5271_v52, %v5270_v10  ;;  %v5307_v10 = vld [vmem:[%s9937_s13 + $0x3a8] sm:$0xff] }
0x3562   :  { %7491 = vmatprep.subr.bf16.mxu0 %v7490_v14  ;;  %7523 = vmatprep.subr.bf16.mxu1 %v7522_v16  ;;  %v7574_v7 = vpack.c.bf16 %v5303_v36, %v5302_v12  ;;  %v4456_v14 = vlaneseq  ;;  %v5258_v52 = vld [vmem:[%s9937_s13 + $0x220] sm:$0xff]  ;;  %v5259_v12 = vld [vmem:[%s9937_s13 + $0x228] sm:$0xff] }
0x3564   :  { %v9177_v16 = vshrl.u32 %v4456_v14, 7 }
0x3565   :  { %7493 = vmatpush3.bf16.msra.mxu0 %v7492_v23  ;;  %7525 = vmatpush3.bf16.msra.mxu1 %v7524_v28 }
0x3566   :  { %7495 = vmatprep.subr.bf16.mxu0 %v7494_v33  ;;  %7527 = vmatprep.subr.bf16.mxu1 %v7526_v30  ;;  %v4458_v34 = vsub.s32 0, %v9177_v16  ;;  %v4466_v37 = vsub.s32 2, %v9177_v16  ;;  %v4462_v60 = vsub.s32 1, %v9177_v16  ;;  %v4470_v18 = vsub.s32 3, %v9177_v16  ;;  %v5255_v33 = vld [vmem:[%s9937_s13 + $0x208] sm:$0xff] }
0x3567   :  { %v4478_v30 = vsub.s32 5, %v9177_v16  ;;  %v4486_v1 = vsub.s32 7, %v9177_v16  ;;  %v7544_v9 = vpack.c.bf16 %v5255_v33, %v5254_v20  ;;  %v4474_v40 = vsub.s32 4, %v9177_v16 }
0x3568   :  { %v4459_v21 = vrot.slane %v9184_v17, %v4458_v34  ;;  %v4467_v23 = vrot.slane %v9184_v17, %v4466_v37  ;;  %v4463_v28 = vrot.slane %v9184_v17, %v4462_v60  ;;  %v4471_v31 = vrot.slane %v9184_v17, %v4470_v18 }
0x3569   :  { %7497 = vmatpush3.bf16.msra.mxu0 %v7496_v26  ;;  %7529 = vmatpush3.bf16.msra.mxu1 %v7528_v45  ;;  %v9229_v61 = vrot.slane %v9184_v17, %v4478_v30  ;;  %v9249_v6 = vrot.slane %v9184_v17, %v4486_v1 }
0x356a   :  { %7499 = vmatprep.subr.bf16.mxu0 %v7498_v42  ;;  %7531 = vmatprep.subr.bf16.mxu1 %v7530_v48  ;;  %v5304_v42 = vld [vmem:[%s9937_s13 + $0x390] sm:$0xff]  ;;  %v5305_v48 = vld [vmem:[%s9937_s13 + $0x398] sm:$0xff] }
0x356b   :  { %v7578_v2 = vpack.c.bf16 %v5305_v48, %v5304_v42  ;;  %v5309_v42 = vld [vmem:[%s9937_s13 + $0x3b8] sm:$0xff] }
0x356d   :  { %7501 = vmatpush3.bf16.msra.mxu0 %v7500_v38  ;;  %7533 = vmatpush3.bf16.msra.mxu1 %v7532_v49  ;;  %v5256_v38 = vld [vmem:[%s9937_s13 + $0x210] sm:$0xff] }
0x356e   :  { %7503 = vmatprep.subr.bf16.mxu0 %v7502_v15  ;;  %7535 = vmatprep.subr.bf16.mxu1 %v7534_v62 }
0x3571   :  { %7505 = vmatpush3.bf16.msra.mxu0 %v7504_v39  ;;  %7537 = vmatpush3.bf16.msra.mxu1 %v7536_v29  ;;  %v5288_v39 = vld [vmem:[%s9937_s13 + $0x310] sm:$0xff] }
0x3572   :  { %7507 = vmatprep.subr.bf16.mxu0 %v7506_v43  ;;  %7539 = vmatprep.subr.bf16.mxu1 %v7538_v54 }
0x3575   :  { %7509 = vmatpush3.bf16.msra.mxu0 %v7508_v5  ;;  %7541 = vmatpush3.bf16.msra.mxu1 %v7540_v35  ;;  %v5306_v35 = vld [vmem:[%s9937_s13 + $0x3a0] sm:$0xff] }
0x3576   :  { %7543 = vmatprep.subr.bf16.mxu0 %v7542_v13  ;;  %7575 = vmatprep.subr.bf16.mxu1 %v7574_v7  ;;  %v7582_v11 = vpack.c.bf16 %v5307_v10, %v5306_v35 }
0x3612   :  { %v4608_v41 = vpop.f32.mrb[44].mxu0  ;;  %v4685_v22 = vpop.f32.mrb[44].mxu1 }
0x3613   :  { %v4609_v4 = vadd.f32 %v4608_v41, %v4459_v21  ;;  %v4686_v26 = vadd.f32 %v4685_v22, %v4467_v23  ;;  %v4610_v45 = vpop.f32.mrb[45].mxu0  ;;  %v4687_v51 = vpop.f32.mrb[45].mxu1 }
0x3614   :  { %v4611_v58 = vadd.f32 %v4610_v45, %v4463_v28  ;;  %v4688_v59 = vadd.f32 %v4687_v51, %v4471_v31  ;;  %v5277_v51 = vld [vmem:[%s9937_s13 + $0x2b8] sm:$0xff] }
0x3615   :  { %v5158_v29 = vmax.f32 %v4609_v4, 0.0  ;;  %v5160_v53 = vmax.f32 %v4686_v26, 0.0  ;;  %v5276_v4 = vld [vmem:[%s9937_s13 + $0x2b0] sm:$0xff] }
0x3616   :  { %v5159_v49 = vmax.f32 %v4611_v58, 0.0  ;;  %v5161_v50 = vmax.f32 %v4688_v59, 0.0  ;;  %v4614_v15 = vpop.f32.mrb[46].mxu0  ;;  %v4691_v62 = vpop.f32.mrb[46].mxu1 }
0x3617   :  { %v4615_v55 = vadd.f32 %v4614_v15, %v4459_v21  ;;  %v4692_v19 = vadd.f32 %v4691_v62, %v4467_v23  ;;  %v4616_v43 = vpop.f32.mrb[47].mxu0  ;;  %v4693_v47 = vpop.f32.mrb[47].mxu1  ;;  %v7548_v21 = vpack.c.bf16 %v5257_v3, %v5256_v38  ;;  %v7580_v23 = vpack.c.bf16 %v5289_v25, %v5288_v39  ;;  %v5292_v39 = vld [vmem:[%s9937_s13 + $0x330] sm:$0xff] }
0x3618   :  { %v4617_v54 = vadd.f32 %v4616_v43, %v4463_v28  ;;  %v4694_v5 = vadd.f32 %v4693_v47, %v4471_v31  ;;  %5517 = vmatprep.mubr.f32.mxu0 %v5159_v49  ;;  %5592 = vmatprep.mubr.f32.mxu1 %v5161_v50  ;;  %v5290_v28 = vld [vmem:[%s9937_s13 + $0x320] sm:$0xff]  ;;  %v5291_v31 = vld [vmem:[%s9937_s13 + $0x328] sm:$0xff]  ;;  %v5260_v49 = vld [vmem:[%s9937_s13 + $0x230] sm:$0xff]  ;;  %v7586_v3 = vpack.c.bf16 %v5309_v42, %v5308_v57 }
0x3619   :  { %5518 = vmatmul.mubr.f32.vlgmr.msra.gmra.mrb[60].mxu0 %v5158_v29  ;;  %5593 = vmatmul.mubr.f32.vlgmr.msra.gmra.mrb[60].mxu1 %v5160_v53  ;;  %v5174_v20 = vmax.f32 %v4615_v55, 0.0  ;;  %v5176_v33 = vmax.f32 %v4692_v19, 0.0  ;;  %v7584_v38 = vpack.c.bf16 %v5291_v31, %v5290_v28  ;;  %v5261_v50 = vld [vmem:[%s9937_s13 + $0x238] sm:$0xff]  ;;  %v5278_v53 = vld [vmem:[%s9937_s13 + $0x2c0] sm:$0xff]  ;;  %v5311_v19 = vld [vmem:[%s9937_s13 + $0x3c8] sm:$0xff]  ;;  %v4482_v28 = vsub.s32 6, %v9177_v16 }
0x361a   :  { %v5175_v13 = vmax.f32 %v4617_v54, 0.0  ;;  %v5177_v36 = vmax.f32 %v4694_v5, 0.0  ;;  %7545 = vmatpush3.bf16.msra.mxu0 %v7544_v9  ;;  %7577 = vmatpush3.bf16.msra.mxu1 %v7576_v44  ;;  %v9266_v7 = vpop.f32.mrb[48].mxu0  ;;  %v9268_v14 = vpop.f32.mrb[48].mxu1  ;;  %v7552_v44 = vpack.c.bf16 %v5259_v12, %v5258_v52  ;;  %v5293_v29 = vld [vmem:[%s9937_s13 + $0x338] sm:$0xff]  ;;  %v5310_v55 = vld [vmem:[%s9937_s13 + $0x3c0] sm:$0xff]  ;;  %v7556_v25 = vpack.c.bf16 %v5261_v50, %v5260_v49 }
0x361b   :  { %v4764_v41 = vpop.f32.mrb[49].mxu0  ;;  %v4841_v22 = vpop.f32.mrb[49].mxu1  ;;  %7547 = vmatprep.subr.bf16.mxu0 %v7546_v56  ;;  %7579 = vmatprep.subr.bf16.mxu1 %v7578_v2  ;;  %v4499_v56 = vrot.slane %v9279_v27, %v4466_v37  ;;  %v7554_v2 = vpack.c.bf16 %v5277_v51, %v5276_v4  ;;  %v5279_v37 = vld [vmem:[%s9937_s13 + $0x2c8] sm:$0xff]  ;;  %v7588_v24 = vpack.c.bf16 %v5293_v29, %v5292_v39  ;;  %v5262_v54 = vld [vmem:[%s9937_s13 + $0x240] sm:$0xff]  ;;  %v5281_v31 = vld [vmem:[%s9937_s13 + $0x2d8] sm:$0xff] }
0x361c   :  { %v4765_v26 = vadd.f32 %v4764_v41, %v9229_v61  ;;  %v4842_v45 = vadd.f32 %v4841_v22, %v9249_v6  ;;  %5522 = vmatprep.mubr.f32.mxu0 %v5175_v13  ;;  %5597 = vmatprep.mubr.f32.mxu1 %v5177_v36  ;;  %v5263_v5 = vld [vmem:[%s9937_s13 + $0x248] sm:$0xff]  ;;  %v7558_v12 = vpack.c.bf16 %v5279_v37, %v5278_v53  ;;  %v5294_v36 = vld [vmem:[%s9937_s13 + $0x340] sm:$0xff]  ;;  %v5265_v51 = vld [vmem:[%s9937_s13 + $0x258] sm:$0xff] }
0x361d   :  { %5523 = vmatmul.mubr.f32.gmra.mrb[62].mxu0 %v5174_v20  ;;  %5598 = vmatmul.mubr.f32.gmra.mrb[62].mxu1 %v5176_v33  ;;  %v7590_v13 = vpack.c.bf16 %v5311_v19, %v5310_v55  ;;  %v5312_v20 = vld [vmem:[%s9937_s13 + $0x3d0] sm:$0xff]  ;;  %v5313_v33 = vld [vmem:[%s9937_s13 + $0x3d8] sm:$0xff]  ;;  %v4507_v41 = vrot.slane %v9279_v27, %v4474_v40  ;;  %v5282_v50 = vld [vmem:[%s9937_s13 + $0x2e0] sm:$0xff] }
0x361e   :  { %v5163_v48 = vmax.f32 %v4765_v26, 0.0  ;;  %v5165_v58 = vmax.f32 %v4842_v45, 0.0  ;;  %7549 = vmatpush3.bf16.msra.mxu0 %v7548_v21  ;;  %7581 = vmatpush3.bf16.msra.mxu1 %v7580_v23  ;;  %v9295_v59 = vpop.f32.mrb[50].mxu0  ;;  %v9297_v9 = vpop.f32.mrb[50].mxu1  ;;  %v5295_v21 = vld [vmem:[%s9937_s13 + $0x348] sm:$0xff]  ;;  %v5280_v23 = vld [vmem:[%s9937_s13 + $0x2d0] sm:$0xff]  ;;  %v4515_v26 = vrot.slane %v9279_v27, %v4482_v28 }
0x361f   :  { %v9305_v15 = vpop.f32.mrb[51].mxu0  ;;  %v9307_v62 = vpop.f32.mrb[51].mxu1  ;;  %7551 = vmatprep.subr.bf16.mxu0 %v7550_v46  ;;  %7583 = vmatprep.subr.bf16.mxu1 %v7582_v11  ;;  %v7560_v11 = vpack.c.bf16 %v5263_v5, %v5262_v54  ;;  %v7592_v4 = vpack.c.bf16 %v5295_v21, %v5294_v36  ;;  %v5264_v45 = vld [vmem:[%s9937_s13 + $0x250] sm:$0xff]  ;;  %v5297_v49 = vld [vmem:[%s9937_s13 + $0x358] sm:$0xff]  ;;  %v5314_v39 = vld [vmem:[%s9937_s13 + $0x3e0] sm:$0xff] }
0x3620   :  { %5667 = vmatprep.mubr.f32.mxu0 %v5163_v48  ;;  %5742 = vmatprep.mubr.f32.mxu1 %v5165_v58  ;;  %v5296_v57 = vld [vmem:[%s9937_s13 + $0x350] sm:$0xff]  ;;  %v5315_v29 = vld [vmem:[%s9937_s13 + $0x3e8] sm:$0xff]  ;;  %v7564_v55 = vpack.c.bf16 %v5265_v51, %v5264_v45 }
0x3621   :  { %v7596_v19 = vpack.c.bf16 %v5297_v49, %v5296_v57  ;;  %v5299_v36 = vld [vmem:[%s9937_s13 + $0x368] sm:$0xff]  ;;  %v5284_v21 = vld [vmem:[%s9937_s13 + $0x2f0] sm:$0xff] }
0x3622   :  { %7553 = vmatpush3.bf16.msra.mxu0 %v7552_v44  ;;  %7585 = vmatpush3.bf16.msra.mxu1 %v7584_v38  ;;  %v9330_v43 = vpop.f32.mrb[52].mxu0  ;;  %v4993_v47 = vpop.f32.mrb[52].mxu1  ;;  %v7562_v44 = vpack.c.bf16 %v5281_v31, %v5280_v23  ;;  %v7594_v38 = vpack.c.bf16 %v5313_v33, %v5312_v20  ;;  %v5285_v23 = vld [vmem:[%s9937_s13 + $0x2f8] sm:$0xff]  ;;  %v5316_v33 = vld [vmem:[%s9937_s13 + $0x3f0] sm:$0xff]  ;;  %v5399_v16 = vld [vmem:[%s9937_s13 + $0x688] sm:$0xff] }
0x3623   :  { %v9339_v35 = vadd.f32 %v4993_v47, %v4499_v56  ;;  %v9341_v10 = vpop.f32.mrb[53].mxu0  ;;  %v9343_v52 = vpop.f32.mrb[53].mxu1  ;;  %7555 = vmatprep.subr.bf16.mxu0 %v7554_v2  ;;  %7587 = vmatprep.subr.bf16.mxu1 %v7586_v3  ;;  %v4511_v2 = vrot.slane %v9279_v27, %v4478_v30  ;;  %v4519_v3 = vrot.slane %v9279_v27, %v4486_v1  ;;  %v5266_v30 = vld [vmem:[%s9937_s13 + $0x260] sm:$0xff]  ;;  %v5267_v1 = vld [vmem:[%s9937_s13 + $0x268] sm:$0xff]  ;;  %v5268_v49 = vld [vmem:[%s9937_s13 + $0x270] sm:$0xff] }
0x3624   :  { %v7568_v57 = vpack.c.bf16 %v5267_v1, %v5266_v30  ;;  %v5318_v30 = vld [vmem:[%s9937_s13 + $0x400] sm:$0xff]  ;;  %v5319_v1 = vld [vmem:[%s9937_s13 + $0x408] sm:$0xff] }
0x3626   :  { %7557 = vmatpush3.bf16.msra.mxu0 %v7556_v25  ;;  %7589 = vmatpush3.bf16.msra.mxu1 %v7588_v24  ;;  %v9367_v22 = vpop.f32.mrb[54].mxu0  ;;  %v4999_v46 = vpop.f32.mrb[54].mxu1  ;;  %v5298_v25 = vld [vmem:[%s9937_s13 + $0x360] sm:$0xff] }
0x3627   :  { %v9379_v42 = vadd.f32 %v4999_v46, %v4499_v56  ;;  %v9381_v48 = vpop.f32.mrb[55].mxu0  ;;  %v9383_v58 = vpop.f32.mrb[55].mxu1  ;;  %7559 = vmatprep.subr.bf16.mxu0 %v7558_v12  ;;  %7591 = vmatprep.subr.bf16.mxu1 %v7590_v13  ;;  %v5283_v56 = vld [vmem:[%s9937_s13 + $0x2e8] sm:$0xff]  ;;  %v7598_v13 = vpack.c.bf16 %v5315_v29, %v5314_v39  ;;  %v5317_v46 = vld [vmem:[%s9937_s13 + $0x3f8] sm:$0xff] }
0x3628   :  { %v7566_v47 = vpack.c.bf16 %v5283_v56, %v5282_v50  ;;  %v5269_v50 = vld [vmem:[%s9937_s13 + $0x278] sm:$0xff]  ;;  %v7602_v29 = vpack.c.bf16 %v5317_v46, %v5316_v33  ;;  %v5368_v46 = vld [vmem:[%s9937_s13 + $0x590] sm:$0xff] }
0x3629   :  { %v5337_v33 = vld [vmem:[%s9937_s13 + $0x498] sm:$0xff] }
0x362a   :  { %7561 = vmatpush3.bf16.msra.mxu0 %v7560_v11  ;;  %7593 = vmatpush3.bf16.msra.mxu1 %v7592_v4  ;;  %v5070_v53 = vpop.f32.mrb[56].mxu0  ;;  %v5147_v37 = vpop.f32.mrb[56].mxu1  ;;  %v4475_v11 = vrot.slane %v9184_v17, %v4474_v40  ;;  %v4483_v4 = vrot.slane %v9184_v17, %v4482_v28  ;;  %v5300_v40 = vld [vmem:[%s9937_s13 + $0x370] sm:$0xff] }
0x362b   :  { %v9415_v24 = vadd.f32 %v5070_v53, %v4507_v41  ;;  %v9417_v54 = vadd.f32 %v5147_v37, %v4515_v26  ;;  %v5072_v5 = vpop.f32.mrb[57].mxu0  ;;  %v5149_v12 = vpop.f32.mrb[57].mxu1  ;;  %7563 = vmatprep.subr.bf16.mxu0 %v7562_v44  ;;  %7595 = vmatprep.subr.bf16.mxu1 %v7594_v38  ;;  %v7600_v44 = vpack.c.bf16 %v5299_v36, %v5298_v25  ;;  %v5301_v53 = vld [vmem:[%s9937_s13 + $0x378] sm:$0xff]  ;;  %v5334_v37 = vld [vmem:[%s9937_s13 + $0x480] sm:$0xff] }
0x362c   :  { %v9428_v31 = vadd.f32 %v5072_v5, %v4511_v2  ;;  %v9430_v20 = vadd.f32 %v5149_v12, %v4519_v3  ;;  %v7570_v38 = vpack.c.bf16 %v5285_v23, %v5284_v21  ;;  %v5350_v5 = vld [vmem:[%s9937_s13 + $0x500] sm:$0xff]  ;;  %v5351_v12 = vld [vmem:[%s9937_s13 + $0x508] sm:$0xff]  ;;  %v4763_v36 = vadd.f32 %v9266_v7, %v4475_v11 }
0x362d   :  { %v4840_v21 = vadd.f32 %v9268_v14, %v4483_v4  ;;  %v4771_v7 = vadd.f32 %v9305_v15, %v9229_v61  ;;  %v4848_v14 = vadd.f32 %v9307_v62, %v9249_v6  ;;  %v4769_v6 = vadd.f32 %v9295_v59, %v4475_v11  ;;  %v5353_v11 = vld [vmem:[%s9937_s13 + $0x518] sm:$0xff] }
0x362e   :  { %7565 = vmatpush3.bf16.msra.mxu0 %v7564_v55  ;;  %7597 = vmatpush3.bf16.msra.mxu1 %v7596_v19  ;;  %v5076_v45 = vpop.f32.mrb[58].mxu0  ;;  %v5153_v51 = vpop.f32.mrb[58].mxu1  ;;  %v5366_v19 = vld [vmem:[%s9937_s13 + $0x580] sm:$0xff]  ;;  %v5162_v61 = vmax.f32 %v4763_v36, 0.0  ;;  %v4846_v62 = vadd.f32 %v9297_v9, %v4483_v4  ;;  %v5352_v9 = vld [vmem:[%s9937_s13 + $0x510] sm:$0xff]  ;;  %v5341_v36 = vld [vmem:[%s9937_s13 + $0x4b8] sm:$0xff] }
0x362f   :  { %v9451_v17 = vadd.f32 %v5076_v45, %v4507_v41  ;;  %v9453_v28 = vadd.f32 %v5153_v51, %v4515_v26  ;;  %v5078_v56 = vpop.f32.mrb[59].mxu0  ;;  %v5155_v39 = vpop.f32.mrb[59].mxu1  ;;  %7567 = vmatprep.subr.bf16.mxu0 %v7566_v47  ;;  %7599 = vmatprep.subr.bf16.mxu1 %v7598_v13  ;;  %v5335_v41 = vld [vmem:[%s9937_s13 + $0x488] sm:$0xff]  ;;  %v5336_v13 = vld [vmem:[%s9937_s13 + $0x490] sm:$0xff]  ;;  %v5369_v45 = vld [vmem:[%s9937_s13 + $0x598] sm:$0xff]  ;;  %v9507_v51 = vrot.slane %v9279_v27, %v4462_v60  ;;  %v5164_v15 = vmax.f32 %v4840_v21, 0.0 }
0x3630   :  { %v9464_v55 = vadd.f32 %v5078_v56, %v4511_v2  ;;  %v9466_v26 = vadd.f32 %v5155_v39, %v4519_v3  ;;  %v5367_v47 = vld [vmem:[%s9937_s13 + $0x588] sm:$0xff]  ;;  %v7572_v2 = vpack.c.bf16 %v5269_v50, %v5268_v49  ;;  %v7604_v3 = vpack.c.bf16 %v5301_v53, %v5300_v40  ;;  %v5320_v60 = vld [vmem:[%s9937_s13 + $0x410] sm:$0xff]  ;;  %v5338_v4 = vld [vmem:[%s9937_s13 + $0x4a0] sm:$0xff] }
0x3631   :  { %v7606_v25 = vpack.c.bf16 %v5335_v41, %v5334_v37  ;;  %v7638_v23 = vpack.c.bf16 %v5367_v47, %v5366_v19  ;;  %v7610_v49 = vpack.c.bf16 %v5337_v33, %v5336_v13  ;;  %v7642_v50 = vpack.c.bf16 %v5369_v45, %v5368_v46  ;;  %v5322_v47 = vld [vmem:[%s9937_s13 + $0x420] sm:$0xff]  ;;  %v5340_v13 = vld [vmem:[%s9937_s13 + $0x4b0] sm:$0xff] }
0x3632   :  { %7569 = vmatpush3.bf16.msra.mxu0 %v7568_v57  ;;  %7601 = vmatpush3.bf16.msra.mxu1 %v7600_v44  ;;  %v9512_v57 = vrot.slane %v9279_v27, %v4470_v18  ;;  %v7608_v44 = vpack.c.bf16 %v5319_v1, %v5318_v30  ;;  %v5321_v18 = vld [vmem:[%s9937_s13 + $0x418] sm:$0xff]  ;;  %v5179_v40 = vmax.f32 %v4771_v7, 0.0  ;;  %v5181_v56 = vmax.f32 %v4848_v14, 0.0  ;;  %v5323_v30 = vld [vmem:[%s9937_s13 + $0x428] sm:$0xff]  ;;  %v5372_v21 = vld [vmem:[%s9937_s13 + $0x5b0] sm:$0xff] }
0x3633   :  { %7571 = vmatprep.subr.bf16.mxu0 %v7570_v38  ;;  %7603 = vmatprep.subr.bf16.mxu1 %v7602_v29  ;;  %v7640_v38 = vpack.c.bf16 %v5351_v12, %v5350_v5  ;;  %v4919_v39 = vadd.f32 %v9341_v10, %v9507_v51  ;;  %v5339_v10 = vld [vmem:[%s9937_s13 + $0x4a8] sm:$0xff]  ;;  %v5178_v53 = vmax.f32 %v4769_v6, 0.0  ;;  %v5180_v37 = vmax.f32 %v4846_v62, 0.0  ;;  %v5354_v5 = vld [vmem:[%s9937_s13 + $0x520] sm:$0xff]  ;;  %v5324_v45 = vld [vmem:[%s9937_s13 + $0x430] sm:$0xff] }
0x3634   :  { %v4996_v59 = vadd.f32 %v9343_v52, %v9512_v57  ;;  %v5370_v52 = vld [vmem:[%s9937_s13 + $0x5a0] sm:$0xff]  ;;  %v5371_v29 = vld [vmem:[%s9937_s13 + $0x5a8] sm:$0xff]  ;;  %v7612_v41 = vpack.c.bf16 %v5321_v18, %v5320_v60  ;;  %v7644_v19 = vpack.c.bf16 %v5353_v11, %v5352_v9  ;;  %v7616_v33 = vpack.c.bf16 %v5323_v30, %v5322_v47  ;;  %v5325_v7 = vld [vmem:[%s9937_s13 + $0x438] sm:$0xff] }
0x3635   :  { %v5167_v1 = vmax.f32 %v4919_v39, 0.0  ;;  %v5355_v12 = vld [vmem:[%s9937_s13 + $0x528] sm:$0xff]  ;;  %v7618_v14 = vpack.c.bf16 %v5341_v36, %v5340_v13  ;;  %v7620_v62 = vpack.c.bf16 %v5325_v7, %v5324_v45  ;;  %v5326_v18 = vld [vmem:[%s9937_s13 + $0x440] sm:$0xff]  ;;  %v5344_v11 = vld [vmem:[%s9937_s13 + $0x4d0] sm:$0xff] }
0x3636   :  { %7573 = vmatpush3.bf16.msra.mxu0 %v7572_v2  ;;  %7605 = vmatpush3.bf16.msra.mxu1 %v7604_v3  ;;  %v5169_v2 = vmax.f32 %v4996_v59, 0.0  ;;  %v7614_v3 = vpack.c.bf16 %v5339_v10, %v5338_v4  ;;  %v7648_v46 = vpack.c.bf16 %v5355_v12, %v5354_v5  ;;  %v5375_v6 = vld [vmem:[%s9937_s13 + $0x5c8] sm:$0xff]  ;;  %v5358_v59 = vld [vmem:[%s9937_s13 + $0x540] sm:$0xff]  ;;  %v5345_v4 = vld [vmem:[%s9937_s13 + $0x4d8] sm:$0xff] }
0x3637   :  { %7607 = vmatprep.subr.bf16.mxu0 %v7606_v25  ;;  %7639 = vmatprep.subr.bf16.mxu1 %v7638_v23  ;;  %v7646_v25 = vpack.c.bf16 %v5371_v29, %v5370_v52  ;;  %v5373_v23 = vld [vmem:[%s9937_s13 + $0x5b8] sm:$0xff]  ;;  %v5359_v9 = vld [vmem:[%s9937_s13 + $0x548] sm:$0xff]  ;;  %v5376_v10 = vld [vmem:[%s9937_s13 + $0x5d0] sm:$0xff] }
0x3638   :  { %v5377_v52 = vld [vmem:[%s9937_s13 + $0x5d8] sm:$0xff]  ;;  %v5360_v30 = vld [vmem:[%s9937_s13 + $0x550] sm:$0xff]  ;;  %v5379_v5 = vld [vmem:[%s9937_s13 + $0x5e8] sm:$0xff] }
0x3639   :  { %5668 = vmatmul.mubr.f32.vlgmr.msra.gmra.mrb[64].mxu0 %v5162_v61  ;;  %5743 = vmatmul.mubr.f32.vlgmr.msra.gmra.mrb[64].mxu1 %v5164_v15  ;;  %v5343_v61 = vld [vmem:[%s9937_s13 + $0x4c8] sm:$0xff]  ;;  %v5374_v15 = vld [vmem:[%s9937_s13 + $0x5c0] sm:$0xff]  ;;  %v7658_v47 = vpack.c.bf16 %v5377_v52, %v5376_v10  ;;  %v5348_v7 = vld [vmem:[%s9937_s13 + $0x4f0] sm:$0xff] }
0x363a   :  { %5672 = vmatprep.mubr.f32.mxu0 %v5179_v40  ;;  %5747 = vmatprep.mubr.f32.mxu1 %v5181_v56  ;;  %v5327_v40 = vld [vmem:[%s9937_s13 + $0x448] sm:$0xff]  ;;  %v7654_v39 = vpack.c.bf16 %v5375_v6, %v5374_v15  ;;  %v5330_v36 = vld [vmem:[%s9937_s13 + $0x460] sm:$0xff]  ;;  %v5333_v15 = vld [vmem:[%s9937_s13 + $0x478] sm:$0xff]  ;;  %v4491_v6 = vrot.slane %v9279_v27, %v4458_v34 }
0x363b   :  { %7609 = vmatpush3.bf16.msra.mxu0 %v7608_v44  ;;  %7641 = vmatpush3.bf16.msra.mxu1 %v7640_v38  ;;  %v7650_v44 = vpack.c.bf16 %v5373_v23, %v5372_v21  ;;  %v5356_v38 = vld [vmem:[%s9937_s13 + $0x530] sm:$0xff]  ;;  %v7624_v29 = vpack.c.bf16 %v5327_v40, %v5326_v18  ;;  %v5331_v21 = vld [vmem:[%s9937_s13 + $0x468] sm:$0xff]  ;;  %v5365_v40 = vld [vmem:[%s9937_s13 + $0x578] sm:$0xff] }
0x363c   :  { %7611 = vmatprep.subr.bf16.mxu0 %v7610_v49  ;;  %7643 = vmatprep.subr.bf16.mxu1 %v7642_v50  ;;  %v5357_v49 = vld [vmem:[%s9937_s13 + $0x538] sm:$0xff]  ;;  %v5342_v50 = vld [vmem:[%s9937_s13 + $0x4c0] sm:$0xff]  ;;  %v5363_v45 = vld [vmem:[%s9937_s13 + $0x568] sm:$0xff] }
0x363d   :  { %5673 = vmatmul.mubr.f32.gmra.mrb[66].mxu0 %v5178_v53  ;;  %5748 = vmatmul.mubr.f32.gmra.mrb[66].mxu1 %v5180_v37  ;;  %v7652_v60 = vpack.c.bf16 %v5357_v49, %v5356_v38  ;;  %v7622_v56 = vpack.c.bf16 %v5343_v61, %v5342_v50  ;;  %v7656_v53 = vpack.c.bf16 %v5359_v9, %v5358_v59  ;;  %v5328_v37 = vld [vmem:[%s9937_s13 + $0x450] sm:$0xff]  ;;  %v5381_v38 = vld [vmem:[%s9937_s13 + $0x5f8] sm:$0xff]  ;;  %v5430_v34 = vld [vmem:[%s9937_s13 + $0x780] sm:$0xff] }
0x363e   :  { %5817 = vmatprep.mubr.f32.mxu0 %v5167_v1  ;;  %5892 = vmatprep.mubr.f32.mxu1 %v5169_v2  ;;  %v5361_v1 = vld [vmem:[%s9937_s13 + $0x558] sm:$0xff]  ;;  %v5346_v2 = vld [vmem:[%s9937_s13 + $0x4e0] sm:$0xff]  ;;  %v7632_v49 = vpack.c.bf16 %v5331_v21, %v5330_v36  ;;  %v5332_v61 = vld [vmem:[%s9937_s13 + $0x470] sm:$0xff]  ;;  %v4917_v9 = vadd.f32 %v9330_v43, %v4491_v6 }
0x363f   :  { %7613 = vmatpush3.bf16.msra.mxu0 %v7612_v41  ;;  %7645 = vmatpush3.bf16.msra.mxu1 %v7644_v19  ;;  %v5329_v41 = vld [vmem:[%s9937_s13 + $0x458] sm:$0xff]  ;;  %v7626_v19 = vpack.c.bf16 %v5345_v4, %v5344_v11  ;;  %v7660_v13 = vpack.c.bf16 %v5361_v1, %v5360_v30  ;;  %v5364_v18 = vld [vmem:[%s9937_s13 + $0x570] sm:$0xff]  ;;  %v5431_v27 = vld [vmem:[%s9937_s13 + $0x788] sm:$0xff]  ;;  %v4923_v30 = vadd.f32 %v9367_v22, %v4491_v6 }
0x3640   :  { %7615 = vmatprep.subr.bf16.mxu0 %v7614_v3  ;;  %7647 = vmatprep.subr.bf16.mxu1 %v7646_v25  ;;  %v5347_v3 = vld [vmem:[%s9937_s13 + $0x4e8] sm:$0xff]  ;;  %v5378_v25 = vld [vmem:[%s9937_s13 + $0x5e0] sm:$0xff]  ;;  %v7628_v12 = vpack.c.bf16 %v5329_v41, %v5328_v37  ;;  %v7668_v59 = vpack.c.bf16 %v5365_v40, %v5364_v18  ;;  %v7702_v4 = vpack.c.bf16 %v5431_v27, %v5430_v34  ;;  %v5400_v41 = vld [vmem:[%s9937_s13 + $0x690] sm:$0xff] }
0x3641   :  { %v7630_v23 = vpack.c.bf16 %v5347_v3, %v5346_v2  ;;  %v5382_v10 = vld [vmem:[%s9937_s13 + $0x600] sm:$0xff]  ;;  %v5383_v52 = vld [vmem:[%s9937_s13 + $0x608] sm:$0xff]  ;;  %v5384_v2 = vld [vmem:[%s9937_s13 + $0x610] sm:$0xff] }
0x3642   :  { %v5414_v43 = vld [vmem:[%s9937_s13 + $0x700] sm:$0xff]  ;;  %v5415_v37 = vld [vmem:[%s9937_s13 + $0x708] sm:$0xff]  ;;  %v5385_v3 = vld [vmem:[%s9937_s13 + $0x618] sm:$0xff] }
0x3643   :  { %7617 = vmatpush3.bf16.msra.mxu0 %v7616_v33  ;;  %7649 = vmatpush3.bf16.msra.mxu1 %v7648_v46  ;;  %v7662_v33 = vpack.c.bf16 %v5379_v5, %v5378_v25  ;;  %v5362_v46 = vld [vmem:[%s9937_s13 + $0x560] sm:$0xff]  ;;  %v7704_v1 = vpack.c.bf16 %v5415_v37, %v5414_v43  ;;  %v5417_v22 = vld [vmem:[%s9937_s13 + $0x718] sm:$0xff]  ;;  %v5403_v21 = vld [vmem:[%s9937_s13 + $0x6a8] sm:$0xff] }
0x3644   :  { %7619 = vmatprep.subr.bf16.mxu0 %v7618_v14  ;;  %7651 = vmatprep.subr.bf16.mxu1 %v7650_v44  ;;  %v5349_v14 = vld [vmem:[%s9937_s13 + $0x4f8] sm:$0xff]  ;;  %v5380_v44 = vld [vmem:[%s9937_s13 + $0x5f0] sm:$0xff]  ;;  %v7664_v50 = vpack.c.bf16 %v5363_v45, %v5362_v46  ;;  %v5402_v36 = vld [vmem:[%s9937_s13 + $0x6a0] sm:$0xff]  ;;  %v5182_v46 = vmax.f32 %v4923_v30, 0.0  ;;  %v5184_v45 = vmax.f32 %v9379_v42, 0.0 }
0x3645   :  { %v5419_v6 = vld [vmem:[%s9937_s13 + $0x728] sm:$0xff] }
0x3646   :  { %v5391_v43 = vld [vmem:[%s9937_s13 + $0x648] sm:$0xff] }
0x3647   :  { %7621 = vmatpush3.bf16.msra.mxu0 %v7620_v62  ;;  %7653 = vmatpush3.bf16.msra.mxu1 %v7652_v60  ;;  %v7634_v62 = vpack.c.bf16 %v5349_v14, %v5348_v7  ;;  %v7666_v60 = vpack.c.bf16 %v5381_v38, %v5380_v44  ;;  %v7676_v7 = vpack.c.bf16 %v5385_v3, %v5384_v2  ;;  %v5386_v44 = vld [vmem:[%s9937_s13 + $0x620] sm:$0xff]  ;;  %v5387_v38 = vld [vmem:[%s9937_s13 + $0x628] sm:$0xff]  ;;  %v5392_v2 = vld [vmem:[%s9937_s13 + $0x650] sm:$0xff] }
0x3648   :  { %7623 = vmatprep.subr.bf16.mxu0 %v7622_v56  ;;  %7655 = vmatprep.subr.bf16.mxu1 %v7654_v39  ;;  %v5398_v56 = vld [vmem:[%s9937_s13 + $0x680] sm:$0xff]  ;;  %v7636_v39 = vpack.c.bf16 %v5333_v15, %v5332_v61  ;;  %v7678_v61 = vpack.c.bf16 %v5403_v21, %v5402_v36  ;;  %v7680_v18 = vpack.c.bf16 %v5387_v38, %v5386_v44  ;;  %v5393_v3 = vld [vmem:[%s9937_s13 + $0x658] sm:$0xff]  ;;  %v5443_v21 = vld [vmem:[%s9937_s13 + $0x7e8] sm:$0xff] }
0x3649   :  { %v7670_v11 = vpack.c.bf16 %v5399_v16, %v5398_v56  ;;  %v5418_v15 = vld [vmem:[%s9937_s13 + $0x720] sm:$0xff]  ;;  %v5388_v56 = vld [vmem:[%s9937_s13 + $0x630] sm:$0xff]  ;;  %v5389_v16 = vld [vmem:[%s9937_s13 + $0x638] sm:$0xff] }
0x364a   :  { %v7712_v40 = vpack.c.bf16 %v5419_v6, %v5418_v15  ;;  %v5442_v36 = vld [vmem:[%s9937_s13 + $0x7e0] sm:$0xff]  ;;  %v5427_v38 = vld [vmem:[%s9937_s13 + $0x768] sm:$0xff] }
0x364b   :  { %7625 = vmatpush3.bf16.msra.mxu0 %v7624_v29  ;;  %7657 = vmatpush3.bf16.msra.mxu1 %v7656_v53  ;;  %v4925_v29 = vadd.f32 %v9381_v48, %v9507_v51  ;;  %v5002_v53 = vadd.f32 %v9383_v58, %v9512_v57  ;;  %v5432_v48 = vld [vmem:[%s9937_s13 + $0x790] sm:$0xff]  ;;  %v5433_v58 = vld [vmem:[%s9937_s13 + $0x798] sm:$0xff]  ;;  %v7672_v51 = vpack.c.bf16 %v5383_v52, %v5382_v10  ;;  %v5166_v57 = vmax.f32 %v4917_v9, 0.0  ;;  %v5406_v9 = vld [vmem:[%s9937_s13 + $0x6c0] sm:$0xff] }
0x364c   :  { %7627 = vmatprep.subr.bf16.mxu0 %v7626_v19  ;;  %7659 = vmatprep.subr.bf16.mxu1 %v7658_v47  ;;  %v5401_v19 = vld [vmem:[%s9937_s13 + $0x698] sm:$0xff]  ;;  %v5168_v47 = vmax.f32 %v9339_v35, 0.0  ;;  %v5416_v35 = vld [vmem:[%s9937_s13 + $0x710] sm:$0xff]  ;;  %v5439_v10 = vld [vmem:[%s9937_s13 + $0x7c8] sm:$0xff]  ;;  %v7684_v52 = vpack.c.bf16 %v5389_v16, %v5388_v56 }
0x364d   :  { %v5183_v25 = vmax.f32 %v4925_v29, 0.0  ;;  %v5185_v5 = vmax.f32 %v5002_v53, 0.0  ;;  %v7708_v14 = vpack.c.bf16 %v5417_v22, %v5416_v35  ;;  %v5390_v53 = vld [vmem:[%s9937_s13 + $0x640] sm:$0xff]  ;;  %v5411_v22 = vld [vmem:[%s9937_s13 + $0x6e8] sm:$0xff] }
0x364e   :  { %v7688_v30 = vpack.c.bf16 %v5391_v43, %v5390_v53  ;;  %v5410_v35 = vld [vmem:[%s9937_s13 + $0x6e0] sm:$0xff] }
0x364f   :  { %7629 = vmatpush3.bf16.msra.mxu0 %v7628_v12  ;;  %7661 = vmatpush3.bf16.msra.mxu1 %v7660_v13  ;;  %v7674_v12 = vpack.c.bf16 %v5401_v19, %v5400_v41  ;;  %v7706_v13 = vpack.c.bf16 %v5433_v58, %v5432_v48  ;;  %v5422_v19 = vld [vmem:[%s9937_s13 + $0x740] sm:$0xff]  ;;  %v5423_v48 = vld [vmem:[%s9937_s13 + $0x748] sm:$0xff]  ;;  %v5408_v58 = vld [vmem:[%s9937_s13 + $0x6d0] sm:$0xff] }
0x3650   :  { %7631 = vmatprep.subr.bf16.mxu0 %v7630_v23  ;;  %7663 = vmatprep.subr.bf16.mxu1 %v7662_v33  ;;  %v5434_v23 = vld [vmem:[%s9937_s13 + $0x7a0] sm:$0xff]  ;;  %v5435_v33 = vld [vmem:[%s9937_s13 + $0x7a8] sm:$0xff] }
0x3651   :  { %v7710_v42 = vpack.c.bf16 %v5435_v33, %v5434_v23  ;;  %v7692_v23 = vpack.c.bf16 %v5393_v3, %v5392_v2  ;;  %v5426_v44 = vld [vmem:[%s9937_s13 + $0x760] sm:$0xff] }
0x3652   :  { %v7728_v6 = vpack.c.bf16 %v5427_v38, %v5426_v44 }
0x3653   :  { %7633 = vmatpush3.bf16.msra.mxu0 %v7632_v49  ;;  %7665 = vmatpush3.bf16.msra.mxu1 %v7664_v50  ;;  %v5171_v49 = vmax.f32 %v9428_v31, 0.0  ;;  %v5173_v50 = vmax.f32 %v9430_v20, 0.0  ;;  %v5405_v31 = vld [vmem:[%s9937_s13 + $0x6b8] sm:$0xff]  ;;  %v5436_v20 = vld [vmem:[%s9937_s13 + $0x7b0] sm:$0xff] }
0x3654   :  { %7635 = vmatprep.subr.bf16.mxu0 %v7634_v62  ;;  %7667 = vmatprep.subr.bf16.mxu1 %v7666_v60  ;;  %v5404_v62 = vld [vmem:[%s9937_s13 + $0x6b0] sm:$0xff]  ;;  %v5437_v60 = vld [vmem:[%s9937_s13 + $0x7b8] sm:$0xff] }
0x3655   :  { %v7682_v34 = vpack.c.bf16 %v5405_v31, %v5404_v62  ;;  %v7714_v27 = vpack.c.bf16 %v5437_v60, %v5436_v20  ;;  %v5396_v62 = vld [vmem:[%s9937_s13 + $0x670] sm:$0xff]  ;;  %v5397_v60 = vld [vmem:[%s9937_s13 + $0x678] sm:$0xff] }
0x3656   :  { %v7700_v56 = vpack.c.bf16 %v5397_v60, %v5396_v62 }
0x3657   :  { %7637 = vmatpush3.bf16.msra.mxu0 %v7636_v39  ;;  %7669 = vmatpush3.bf16.msra.mxu1 %v7668_v59  ;;  %v5420_v39 = vld [vmem:[%s9937_s13 + $0x730] sm:$0xff]  ;;  %v5421_v59 = vld [vmem:[%s9937_s13 + $0x738] sm:$0xff] }
0x3658   :  { %7671 = vmatprep.subr.bf16.mxu0 %v7670_v11  ;;  %7703 = vmatprep.subr.bf16.mxu1 %v7702_v4  ;;  %v5407_v11 = vld [vmem:[%s9937_s13 + $0x6c8] sm:$0xff]  ;;  %v5438_v4 = vld [vmem:[%s9937_s13 + $0x7c0] sm:$0xff]  ;;  %v7716_v29 = vpack.c.bf16 %v5421_v59, %v5420_v39  ;;  %v5187_v39 = vmax.f32 %v9464_v55, 0.0  ;;  %v5189_v59 = vmax.f32 %v9466_v26, 0.0 }
0x3659   :  { %v7686_v37 = vpack.c.bf16 %v5407_v11, %v5406_v9  ;;  %v7718_v41 = vpack.c.bf16 %v5439_v10, %v5438_v4  ;;  %v5186_v9 = vmax.f32 %v9451_v17, 0.0  ;;  %v5188_v11 = vmax.f32 %v9453_v28, 0.0 }
0x365a   :  { %5818 = vmatmul.mubr.f32.vlgmr.msra.gmra.mrb[68].mxu0 %v5166_v57  ;;  %5893 = vmatmul.mubr.f32.vlgmr.msra.gmra.mrb[68].mxu1 %v5168_v47  ;;  %v5440_v57 = vld [vmem:[%s9937_s13 + $0x7d0] sm:$0xff]  ;;  %v5441_v47 = vld [vmem:[%s9937_s13 + $0x7d8] sm:$0xff] }
0x365b   :  { %5822 = vmatprep.mubr.f32.mxu0 %v5183_v25  ;;  %5897 = vmatprep.mubr.f32.mxu1 %v5185_v5  ;;  %v7722_v5 = vpack.c.bf16 %v5441_v47, %v5440_v57 }
0x365c   :  { %7673 = vmatpush3.bf16.msra.mxu0 %v7672_v51  ;;  %7705 = vmatpush3.bf16.msra.mxu1 %v7704_v1  ;;  %v5409_v51 = vld [vmem:[%s9937_s13 + $0x6d8] sm:$0xff]  ;;  %v7720_v1 = vpack.c.bf16 %v5423_v48, %v5422_v19 }
0x365d   :  { %7675 = vmatprep.subr.bf16.mxu0 %v7674_v12  ;;  %7707 = vmatprep.subr.bf16.mxu1 %v7706_v13  ;;  %v7690_v25 = vpack.c.bf16 %v5409_v51, %v5408_v58  ;;  %v5424_v12 = vld [vmem:[%s9937_s13 + $0x750] sm:$0xff]  ;;  %v5425_v13 = vld [vmem:[%s9937_s13 + $0x758] sm:$0xff] }
0x365e   :  { %5823 = vmatmul.mubr.f32.gmra.mrb[70].mxu0 %v5182_v46  ;;  %5898 = vmatmul.mubr.f32.gmra.mrb[70].mxu1 %v5184_v45  ;;  %v7724_v33 = vpack.c.bf16 %v5425_v13, %v5424_v12  ;;  %v5394_v46 = vld [vmem:[%s9937_s13 + $0x660] sm:$0xff]  ;;  %v5395_v45 = vld [vmem:[%s9937_s13 + $0x668] sm:$0xff] }
0x365f   :  { %5967 = vmatprep.mubr.f32.mxu0 %v5171_v49  ;;  %6042 = vmatprep.mubr.f32.mxu1 %v5173_v50  ;;  %v5412_v49 = vld [vmem:[%s9937_s13 + $0x6f0] sm:$0xff]  ;;  %v5413_v50 = vld [vmem:[%s9937_s13 + $0x6f8] sm:$0xff]  ;;  %v7696_v15 = vpack.c.bf16 %v5395_v45, %v5394_v46 }
0x3660   :  { %7677 = vmatpush3.bf16.msra.mxu0 %v7676_v7  ;;  %7709 = vmatpush3.bf16.msra.mxu1 %v7708_v14  ;;  %v7694_v7 = vpack.c.bf16 %v5411_v22, %v5410_v35  ;;  %v7726_v14 = vpack.c.bf16 %v5443_v21, %v5442_v36  ;;  %v7698_v31 = vpack.c.bf16 %v5413_v50, %v5412_v49 }
0x3661   :  { %7679 = vmatprep.subr.bf16.mxu0 %v7678_v61  ;;  %7711 = vmatprep.subr.bf16.mxu1 %v7710_v42  ;;  %v5444_v61 = vld [vmem:[%s9937_s13 + $0x7f0] sm:$0xff]  ;;  %v5445_v42 = vld [vmem:[%s9937_s13 + $0x7f8] sm:$0xff] }
0x3662   :  { %v7730_v20 = vpack.c.bf16 %v5445_v42, %v5444_v61 }
0x3664   :  { %7681 = vmatpush3.bf16.msra.mxu0 %v7680_v18  ;;  %7713 = vmatpush3.bf16.msra.mxu1 %v7712_v40  ;;  %v5428_v18 = vld [vmem:[%s9937_s13 + $0x770] sm:$0xff]  ;;  %v5429_v40 = vld [vmem:[%s9937_s13 + $0x778] sm:$0xff] }
0x3665   :  { %7683 = vmatprep.subr.bf16.mxu0 %v7682_v34  ;;  %7715 = vmatprep.subr.bf16.mxu1 %v7714_v27  ;;  %v7732_v16 = vpack.c.bf16 %v5429_v40, %v5428_v18  ;;  %v5170_v34 = vmax.f32 %v9415_v24, 0.0  ;;  %v5172_v27 = vmax.f32 %v9417_v54, 0.0 }
0x3668   :  { %7685 = vmatpush3.bf16.msra.mxu0 %v7684_v52  ;;  %7717 = vmatpush3.bf16.msra.mxu1 %v7716_v29 }
0x3669   :  { %7687 = vmatprep.subr.bf16.mxu0 %v7686_v37  ;;  %7719 = vmatprep.subr.bf16.mxu1 %v7718_v41 }
0x366c   :  { %7689 = vmatpush3.bf16.msra.mxu0 %v7688_v30  ;;  %7721 = vmatpush3.bf16.msra.mxu1 %v7720_v1 }
0x366d   :  { %7691 = vmatprep.subr.bf16.mxu0 %v7690_v25  ;;  %7723 = vmatprep.subr.bf16.mxu1 %v7722_v5 }
0x3670   :  { %7693 = vmatpush3.bf16.msra.mxu0 %v7692_v23  ;;  %7725 = vmatpush3.bf16.msra.mxu1 %v7724_v33 }
0x3671   :  { %7695 = vmatprep.subr.bf16.mxu0 %v7694_v7  ;;  %7727 = vmatprep.subr.bf16.mxu1 %v7726_v14 }
0x3674   :  { %7697 = vmatpush3.bf16.msra.mxu0 %v7696_v15  ;;  %7729 = vmatpush3.bf16.msra.mxu1 %v7728_v6 }
0x3675   :  { %7699 = vmatprep.subr.bf16.mxu0 %v7698_v31  ;;  %7731 = vmatprep.subr.bf16.mxu1 %v7730_v20 }
0x3678   :  { %7701 = vmatpush3.bf16.msra.mxu0 %v7700_v56  ;;  %7733 = vmatpush3.bf16.msra.mxu1 %v7732_v16 }
0x3679   :  { %7734 = vmatprep.subr.bf16.mxu1 %v7903_v0  ;;  %v6385_v0 = vld [vmem:[%s9939_s14] ss:$0 sm:$0xff] }
0x367b   :  { %5968 = vmatmul.mubr.f32.vlgmr.msra.gmra.mrb[72].mxu0 %v5170_v34  ;;  %6043 = vmatmul.mubr.f32.vlgmr.msra.gmra.mrb[72].mxu1 %v5172_v27 }
0x367c   :  { %5972 = vmatprep.mubr.f32.mxu0 %v5187_v39  ;;  %6047 = vmatprep.mubr.f32.mxu1 %v5189_v59 }
0x367f   :  { %5973 = vmatmul.mubr.f32.gmra.mrb[74].mxu0 %v5186_v9  ;;  %6048 = vmatmul.mubr.f32.gmra.mrb[74].mxu1 %v5188_v11 }
0x3680   :  { %7283 = vmatprep.mubr.msk.f32.mxu1 %vm7904_vm0, %v7905_v8  ;;  %vm6275_vm0 = vcmask 1024  }
0x36ec   :  { %v6604_v24 = vpop.f32.mrb[60].mxu0  ;;  %v6642_v54 = vpop.f32.mrb[60].mxu1 }
0x36ed   :  { %v6605_v55 = vpop.f32.mrb[61].mxu0  ;;  %v6643_v26 = vpop.f32.mrb[61].mxu1 }
0x36ee   :  { %v6606_v4 = vadd.f32 %v6605_v55, %v6604_v24  ;;  %v6644_v10 = vadd.f32 %v6643_v26, %v6642_v54 }
0x36f0   :  { %v5520_v52 = vadd.f32 %v6606_v4, %v6385_v0  ;;  %v6607_v29 = vpop.f32.mrb[62].mxu0  ;;  %v6645_v17 = vpop.f32.mrb[62].mxu1 }
0x36f1   :  { %v6608_v53 = vpop.f32.mrb[63].mxu0  ;;  %v6646_v28 = vpop.f32.mrb[63].mxu1 }
0x36f2   :  { %v5595_v43 = vadd.f32 %v6644_v10, %v5520_v52  ;;  %v6609_v37 = vadd.f32 %v6608_v53, %v6607_v29  ;;  %v6647_v41 = vadd.f32 %v6646_v28, %v6645_v17 }
0x36f4   :  { %v5525_v19 = vadd.f32 %v6609_v37, %v6385_v0 }
0x36f6   :  { %v5600_v8 = vadd.f32 %v6647_v41, %v5525_v19 }
0x370c   :  { %v6680_v48 = vpop.f32.mrb[64].mxu0  ;;  %v6718_v58 = vpop.f32.mrb[64].mxu1 }
0x370d   :  { %v6681_v51 = vpop.f32.mrb[65].mxu0  ;;  %v6719_v57 = vpop.f32.mrb[65].mxu1 }
0x370e   :  { %v6682_v47 = vadd.f32 %v6681_v51, %v6680_v48  ;;  %v6720_v30 = vadd.f32 %v6719_v57, %v6718_v58 }
0x3710   :  { %v5670_v1 = vadd.f32 %v6682_v47, %v5595_v43  ;;  %v6683_v2 = vpop.f32.mrb[66].mxu0  ;;  %v6721_v3 = vpop.f32.mrb[66].mxu1 }
0x3711   :  { %v6684_v25 = vpop.f32.mrb[67].mxu0  ;;  %v6722_v5 = vpop.f32.mrb[67].mxu1 }
0x3712   :  { %v5745_v12 = vadd.f32 %v6720_v30, %v5670_v1  ;;  %v6685_v13 = vadd.f32 %v6684_v25, %v6683_v2  ;;  %v6723_v35 = vadd.f32 %v6722_v5, %v6721_v3  ;;  %v6386_v2 = vld [vmem:[%s9942_s17] ss:$0 sm:$0xff] }
0x3713   :  { %v6387_v25 = vld [vmem:[%s9943_s18] ss:$0 sm:$0xff] }
0x3714   :  { %v5675_v22 = vadd.f32 %v6685_v13, %v5600_v8  ;;  %v28_v8 = vstv %s9941_s20 }
0x3715   :  { %29 = vst [vmem:[#allocation2] sm:$0x1] %v28_v8 }
0x3716   :  { %v5750_v36 = vadd.f32 %v6723_v35, %v5675_v22 }
0x372d   :  { %v6756_v21 = vpop.f32.mrb[68].mxu0  ;;  %v6794_v23 = vpop.f32.mrb[68].mxu1 }
0x372e   :  { %v6757_v33 = vpop.f32.mrb[69].mxu0  ;;  %v6795_v46 = vpop.f32.mrb[69].mxu1 }
0x372f   :  { %v6758_v45 = vadd.f32 %v6757_v33, %v6756_v21  ;;  %v6796_v7 = vadd.f32 %v6795_v46, %v6794_v23  ;;  %v30_v21 = vstv %s9944_s22  ;;  %v6388_v23 = vld [vmem:[#allocation2] ss:$0 sm:$0xff] }
0x3730   :  { %31 = vst [vmem:[#allocation3] sm:$0x1] %v30_v21 }
0x3731   :  { %v5820_v14 = vadd.f32 %v6758_v45, %v5745_v12  ;;  %v6759_v44 = vpop.f32.mrb[70].mxu0  ;;  %v6797_v38 = vpop.f32.mrb[70].mxu1 }
0x3732   :  { %v6760_v49 = vpop.f32.mrb[71].mxu0  ;;  %v6798_v50 = vpop.f32.mrb[71].mxu1 }
0x3733   :  { %v5895_v61 = vadd.f32 %v6796_v7, %v5820_v14  ;;  %v6761_v42 = vadd.f32 %v6760_v49, %v6759_v44  ;;  %v6799_v15 = vadd.f32 %v6798_v50, %v6797_v38  ;;  %v6188_v44 = vld [vmem:[%s9945_s21] sm:$0x3] }
0x3735   :  { %v5825_v6 = vadd.f32 %v6761_v42, %v5750_v36 }
0x3737   :  { %v5900_v62 = vadd.f32 %v6799_v15, %v5825_v6  ;;  %v6391_v38 = vld [vmem:[#allocation3] ss:$0 sm:$0xff] }
0x374e   :  { %v6832_v31 = vpop.f32.mrb[72].mxu0  ;;  %v6870_v20 = vpop.f32.mrb[72].mxu1 }
0x374f   :  { %v6833_v60 = vpop.f32.mrb[73].mxu0  ;;  %v6871_v18 = vpop.f32.mrb[73].mxu1 }
0x3750   :  { %v6834_v40 = vadd.f32 %v6833_v60, %v6832_v31  ;;  %v6872_v56 = vadd.f32 %v6871_v18, %v6870_v20 }
0x3752   :  { %v5970_v16 = vadd.f32 %v6834_v40, %v5895_v61  ;;  %v6835_v34 = vpop.f32.mrb[74].mxu0  ;;  %v6873_v27 = vpop.f32.mrb[74].mxu1 }
0x3753   :  { %v6836_v39 = vpop.f32.mrb[75].mxu0  ;;  %v6874_v59 = vpop.f32.mrb[75].mxu1 }
0x3754   :  { %v6045_v9 = vadd.f32 %v6872_v56, %v5970_v16  ;;  %v6837_v11 = vadd.f32 %v6836_v39, %v6835_v34  ;;  %v6875_v24 = vadd.f32 %v6874_v59, %v6873_v27 }
0x3756   :  { %v5975_v54 = vadd.f32 %v6837_v11, %v5900_v62  ;;  %v6053_v0 = vadd.f32 %v6045_v9, %v8893_v63 }
0x3758   :  { %v6050_v55 = vadd.f32 %v6875_v24, %v5975_v54  ;;  %v6057_v26 = vsel %vm3540_vm9, %v6053_v0, 0.0 }
0x3759   :  { %6058 = vadd.xlane.f32.xlu1 %v6057_v26 }
0x375a   :  { %v6054_v4 = vadd.f32 %v6050_v55, %v8913_v32  ;;  %v6099_v32 = vld [vmem:[%s9940_s19] sm:$0xff] }
0x375b   :  { %7274 = vmatprep.subr.mxu0 %v6099_v32 }
0x375c   :  { %v6060_v10 = vsel %vm3540_vm9, %v6054_v4, 0.0  ;;  %7275 = vmatpush3.msra.mxu0 %v6099_v32 }
0x375d   :  { %6061 = vadd.xlane.f32.xlu0 %v6060_v10 }
0x37e6   :  { %v6059_v52 = vpop.xlane.xlu1 %6058 }
0x37e7   :  { %v6063_v29 = vmul.f32 0.125, %v6059_v52 }
0x37e9   :  { %v6065_v17 = vsub.f32 %v6053_v0, %v6063_v29 }
0x37ea   :  { %v6062_v53 = vpop.xlane.xlu0 %6061 }
0x37eb   :  { %v6064_v28 = vmul.f32 0.125, %v6062_v53  ;;  %v6067_v43 = vmul.f32 %v6065_v17, %v6065_v17 }
0x37ed   :  { %v6066_v37 = vsub.f32 %v6054_v4, %v6064_v28  ;;  %v6069_v41 = vsel %vm3540_vm9, %v6067_v43, 0.0 }
0x37ee   :  { %6070 = vadd.xlane.f32.xlu1 %v6069_v41 }
0x37ef   :  { %v6068_v63 = vmul.f32 %v6066_v37, %v6066_v37 }
0x37f1   :  { %v6072_v19 = vsel %vm3540_vm9, %v6068_v63, 0.0 }
0x37f2   :  { %6073 = vadd.xlane.f32.xlu0 %v6072_v19 }
0x387b   :  { %v6071_v48 = vpop.xlane.xlu1 %6070 }
0x387c   :  { %v6075_v58 = vmul.f32 0.125, %v6071_v48 }
0x387e   :  { %v6077_v51 = vadd.f32 1e-05, %v6075_v58 }
0x387f   :  { %v6074_v57 = vpop.xlane.xlu0 %6073 }
0x3880   :  { %7894 = vrsqrt.f32 %v6077_v51  ;;  %v6076_v47 = vmul.f32 0.125, %v6074_v57 }
0x3882   :  { %v6078_v30 = vadd.f32 1e-05, %v6076_v47 }
0x3884   :  { %7896 = vrsqrt.f32 %v6078_v30 }
0x388a   :  { %v7895_v1 = vpop.eup %7894 }
0x388b   :  { %v6081_v3 = vmul.f32 %v7895_v1, %v6065_v17 }
0x388d   :  { %v6089_v5 = vmul.f32 %v6386_v2, %v6081_v3 }
0x388e   :  { %v7897_v12 = vpop.eup %7896 }
0x388f   :  { %v6082_v13 = vmul.f32 %v7897_v12, %v6066_v37  ;;  %v6097_v35 = vadd.f32 %v6387_v25, %v6089_v5 }
0x3891   :  { %v6090_v22 = vmul.f32 %v6386_v2, %v6082_v13  ;;  %7276 = vmatprep.mubr.msk.f32.mxu0 %vm3540_vm9, %v6097_v35 }
0x3893   :  { %v6098_v36 = vadd.f32 %v6387_v25, %v6090_v22 }
0x3895   :  { %7277 = vmatmul.mubr.msk.f32.vlgmr.msra.gmra.mrb[76].mxu0 %vm3540_vm9, %v6098_v36 }
0x3968   :  { %v7278_v33 = vpop.f32.mrb[76].mxu0 }
0x3969   :  { %v6185_v46 = vadd.f32 %v7278_v33, %v6388_v23  ;;  %v6179_v45 = vpop.f32.mrb[77].mxu0 }
0x396a   :  { %v6180_v7 = vadd.f32 %v6388_v23, %v6179_v45 }
0x396c   :  { %v7735_v14 = vpack.c.bf16 %v6185_v46, %v6180_v7 }
0x396e   :  { %7736 = vmatpush3.bf16.msra.mxu1 %v7735_v14 }
0x3971   :  { %7284 = vmatmul.mubr.msk.f32.vlgmr.msra.gmra.mrb[76].mxu1 %vm160_vm1, %v6188_v44 }
0x3a44   :  { %v6265_v49 = vpop.f32.mrb[76].mxu1 }
0x3a45   :  { %v6266_v50 = vadd.f32 %v6391_v38, %v6265_v49  ;;  %v7285_v61 = vpop.f32.mrb[77].mxu1 }
0x3a47   :  { %v6393_v42 = vmul.f32 -1.442695, %v6266_v50 }
0x3a49   :  { %7898 = vpow2.f32 %v6393_v42 }
0x3a53   :  { %v7899_v15 = vpop.eup %7898 }
0x3a54   :  { %v6272_v6 = vadd.f32 1.0, %v7899_v15 }
0x3a56   :  { %7900 = vrcp.f32 %v6272_v6 }
0x3a60   :  { %v7901_v62 = vpop.eup %7900 }
0x3a61   :  { %6276 = vst.msk [vmem:[%s9946_s23] sm:$0x3] %vm6275_vm0, %v7901_v62 }

</bundles_post_ra>
